<compile_context>
chip_gen: v7x
topology: tpu7x:2x2x1
jax: 0.10.0
libtpu: 0.0.40
codegen_flags: <defaults>
</compile_context>

<pallas_src>
import functools

import jax
import jax.numpy as jnp
import numpy as np
from jax import lax
from jax.experimental import pallas as pl
from jax.experimental.pallas import tpu as pltpu


def _round_up(x, m):
    return ((x + m - 1) // m) * m


def _cdiv(a, b):
    return -(-a // b)


def _vmem_capacity_bytes():
    """Physical VMEM of the local chip; conservative 64 MiB (v7x) fallback."""
    try:
        cap = getattr(pltpu.get_tpu_info(), "vmem_capacity_bytes", None)
        if cap:
            return int(cap)
    except Exception:
        pass
    return 64 << 20


def _vmem_limit(need_bytes):
    cap = _vmem_capacity_bytes()
    return int(min(max(2 * need_bytes, 16 << 20), int(cap * 0.9)))


def _pick_chunk_steps(T, Bp, Hp):
    """Steps per time chunk: bound the f32 (Kc*Bp, 3Hp) gx scratch to ~2 MiB."""
    budget_rows = max(Bp, (((2 << 20) // (3 * Hp * 4)) // Bp) * Bp)
    return max(1, min(T, budget_rows // Bp))


def _pick_unroll(Kc, Bp, Hp):
    """Adaptive unroll: back off when per-iteration gate temporaries get big."""
    live = Bp * 3 * Hp * 4
    if live <= (16 << 10):
        u = 8
    elif live <= (48 << 10):
        u = 4
    else:
        u = 2
    return max(1, min(u, Kc))


# ------------------------------- kernels -----------------------------------


def _gru_kernel(T, Kc, Bp, unroll, fuse_head,
                emb_ref, h0_ref, wih0_ref, whh0_ref, wih1_ref, whh1_ref,
                *refs):
    """One time chunk (Kc steps) of the 2-layer GRU (bias=False, gates r,z,n).

    Grid axis 0 walks time chunks serially ("arbitrary"); the hidden state is
    carried across chunks in the resident `hid` output block.

    emb_ref : (Kc*Bp, Ep) bf16   streamed chunk of embedded inputs
    h0_ref  : (2, Bp, Hp) f32
    w*_ref  : bf16, pre-transposed, each gate zero-padded to a 128-lane block
    out_ref : (Kc*Bp, Vp) f32 logits chunk (fused head) OR
              (Kc*Bp, Hp) bf16 layer-1 hidden-state chunk
    hid_ref : (2, Bp, Hp) f32    final hidden states (resident accumulator)
    gx_ref  : (Kc*Bp, 3Hp) f32   VMEM scratch, hoisted layer-0 projection
    """
    if fuse_head:
        w1_ref, b1_ref, w2_ref, b2_ref, out_ref, hid_ref, gx_ref = refs
    else:
        out_ref, hid_ref, gx_ref = refs

    Hp = whh0_ref.shape[0]
    c = pl.program_id(0)

    @pl.when(c == 0)
    def _():
        hid_ref[...] = h0_ref[...]

    # Hoisted layer-0 input projection for the whole chunk: one MXU matmul
    # over Kc*Bp rows instead of Kc tiny (Bp, Ep) matmuls in the recurrence.
    gx_ref[...] = jnp.dot(emb_ref[...], wih0_ref[...],
                          preferred_element_type=jnp.float32)

    # Recurrent weights stay resident in VMEM across the whole grid.
    # (Possible further micro-opt: hold them in MXU staging registers with
    # pltpu.matmul_push_rhs across the T steps; not done here.)
    whh0 = whh0_ref[...]
    wih1 = wih1_ref[...]
    whh1 = whh1_ref[...]
    if fuse_head:
        w1 = w1_ref[...]
        b1 = b1_ref[...]
        w2 = w2_ref[...]
        b2 = b2_ref[...]

    def cell(gx, gh, h):
        # Gate slices are 128-lane aligned (Hp % 128 == 0); elementwise gate
        # math stays in f32 (v5e has no bf16 VPU/EUP).
        r = jax.nn.sigmoid(gx[:, 0 * Hp:1 * Hp] + gh[:, 0 * Hp:1 * Hp])
        z = jax.nn.sigmoid(gx[:, 1 * Hp:2 * Hp] + gh[:, 1 * Hp:2 * Hp])
        n = jnp.tanh(gx[:, 2 * Hp:3 * Hp] + r * gh[:, 2 * Hp:3 * Hp])
        return (1.0 - z) * n + z * h

    # TODO(synk): nn.GRU's inter-layer dropout (p=0.2) is train-only; eval
    # semantics (no dropout) are implemented here.
    def body(i, carry):
        h1, h2 = carry
        row = pl.multiple_of(i * Bp, Bp)                        # 8-aligned
        gx_t = gx_ref[pl.ds(row, Bp), :]                        # (Bp, 3Hp) f32
        gh0 = jnp.dot(h1.astype(jnp.bfloat16), whh0,
                      preferred_element_type=jnp.float32)
        h1n = cell(gx_t, gh0, h1)
        gx1 = jnp.dot(h1n.astype(jnp.bfloat16), wih1,
                      preferred_element_type=jnp.float32)
        gh1 = jnp.dot(h2.astype(jnp.bfloat16), whh1,
                      preferred_element_type=jnp.float32)
        h2n = cell(gx1, gh1, h2)
        if T % Kc != 0:
            # Last chunk runs past T on zero-padded inputs: freeze the carry.
            valid = (c * Kc + i) < T
            h1n = jnp.where(valid, h1n, h1)
            h2n = jnp.where(valid, h2n, h2)
        if fuse_head:
            d = jnp.dot(h2n.astype(jnp.bfloat16), w1,
                        preferred_element_type=jnp.float32) + b1
            d = jnp.maximum(d, 0.0)
            out_ref[pl.ds(row, Bp), :] = jnp.dot(
                d.astype(jnp.bfloat16), w2,
                preferred_element_type=jnp.float32) + b2
        else:
            out_ref[pl.ds(row, Bp), :] = h2n.astype(out_ref.dtype)
        return h1n, h2n

    h1, h2 = lax.fori_loop(0, Kc, body, (hid_ref[0], hid_ref[1]),
                           unroll=unroll)
    hid_ref[0] = h1
    hid_ref[1] = h2


def _head_kernel(seq_ref, w1_ref, b1_ref, w2_ref, b2_ref, out_ref, d_ref):
    """dense1 -> ReLU -> decision on an (Rt rows) x (Vt vocab) tile.

    Grid is (row tiles, vocab tiles); relu(seq@w1+b1) is computed once per
    row tile (vocab is the inner "arbitrary" axis) and cached in scratch.
    Logit stores are lane-dense (Vt % 128 == 0).
    """
    @pl.when(pl.program_id(1) == 0)
    def _():
        d = jnp.dot(seq_ref[...], w1_ref[...],
                    preferred_element_type=jnp.float32) + b1_ref[...]
        d_ref[...] = jnp.maximum(d, 0.0)

    out_ref[...] = jnp.dot(d_ref[...].astype(jnp.bfloat16), w2_ref[...],
                           preferred_element_type=jnp.float32) + b2_ref[...]


# ------------------------------- wrapper ------------------------------------


def _pack_gru_weight(w, H, Hp, in_dim, in_dim_p):
    """torch (3H, in) gate-stacked [r; z; n] -> transposed bf16 (in_p, 3Hp)
    where every gate block starts at a 128-lane boundary; padding is zero."""
    wt = jnp.asarray(w, jnp.float32).T                          # (in, 3H)
    out = jnp.zeros((in_dim_p, 3 * Hp), jnp.float32)
    for g in range(3):
        out = out.at[:in_dim, g * Hp:g * Hp + H].set(wt[:, g * H:(g + 1) * H])
    return out.astype(jnp.bfloat16)


def langmod_forward(params, x, h_0=None, *, fuse_head=None, chunk_steps=None):
    """Equivalent of LangMod.forward(x, h_0) in eval mode.  x: int32 (B, T)."""
    embed = params["embed"]
    B, T = x.shape
    E = embed.shape[1]
    H = params["w_hh_l0"].shape[1]
    D = params["w_d1"].shape[0]
    V = params["w_dec"].shape[0]

    Bp = _round_up(B, 8)            # sublane alignment for per-step rows
    Hp = _round_up(H, 128)          # lane alignment for gates / hidden
    Dp = _round_up(D, 128)
    Vp = _round_up(V, 128)          # lane-dense logit stores
    Ep = _round_up(E, 8)            # full-sublane rows for the (Ep, 3Hp) RHS

    if fuse_head is None:
        # Small head: fuse into the recurrence (drops the seq HBM round trip;
        # the head FLOPs are free filler under the latency-bound recurrence).
        fuse_head = (Vp <= 512 and Dp <= 512)

    Kc = (_pick_chunk_steps(T, Bp, Hp) if chunk_steps is None
          else max(1, min(T, int(chunk_steps))))
    NC = _cdiv(T, Kc)
    Tp = NC * Kc
    rows_c = Kc * Bp
    unroll = _pick_unroll(Kc, Bp, Hp)

    # ---- glue: embedding lookup + time-major, padded, bf16 row layout ----
    emb = jnp.take(embed, x, axis=0).astype(jnp.float32)        # (B, T, E)
    emb = jnp.transpose(emb, (1, 0, 2))                         # (T, B, E)
    emb = jnp.pad(emb, ((0, Tp - T), (0, Bp - B), (0, Ep - E)))
    emb = emb.reshape(Tp * Bp, Ep).astype(jnp.bfloat16)

    if h_0 is None:
        h0 = jnp.zeros((2, Bp, Hp), jnp.float32)
    else:
        h0 = jnp.pad(jnp.asarray(h_0, jnp.float32),
                     ((0, 0), (0, Bp - B), (0, Hp - H)))

    # ---- layout plumbing (done once): pre-transposed, padded bf16 weights ----
    wih0 = _pack_gru_weight(params["w_ih_l0"], H, Hp, E, Ep)
    whh0 = _pack_gru_weight(params["w_hh_l0"], H, Hp, H, Hp)
    wih1 = _pack_gru_weight(params["w_ih_l1"], H, Hp, H, Hp)
    whh1 = _pack_gru_weight(params["w_hh_l1"], H, Hp, H, Hp)

    w1 = jnp.zeros((Hp, Dp), jnp.float32).at[:H, :D].set(
        jnp.asarray(params["w_d1"], jnp.float32).T).astype(jnp.bfloat16)
    b1 = jnp.zeros((1, Dp), jnp.float32).at[:, :D].set(
        jnp.asarray(params["b_d1"], jnp.float32).reshape(1, D))
    w2 = jnp.zeros((Dp, Vp), jnp.float32).at[:D, :V].set(
        jnp.asarray(params["w_dec"], jnp.float32).T).astype(jnp.bfloat16)
    b2 = jnp.zeros((1, Vp), jnp.float32).at[:, :V].set(
        jnp.asarray(params["b_dec"], jnp.float32).reshape(1, V))

    # ---- kernel 1: GRU recurrence, gridded & pipelined over time chunks ----
    in_specs = [
        pl.BlockSpec((rows_c, Ep), lambda c: (c, 0)),           # emb chunk
        pl.BlockSpec((2, Bp, Hp), lambda c: (0, 0, 0)),         # h0
        pl.BlockSpec((Ep, 3 * Hp), lambda c: (0, 0)),           # wih0
        pl.BlockSpec((Hp, 3 * Hp), lambda c: (0, 0)),           # whh0
        pl.BlockSpec((Hp, 3 * Hp), lambda c: (0, 0)),           # wih1
        pl.BlockSpec((Hp, 3 * Hp), lambda c: (0, 0)),           # whh1
    ]
    args = [emb, h0, wih0, whh0, wih1, whh1]
    if fuse_head:
        in_specs += [
            pl.BlockSpec((Hp, Dp), lambda c: (0, 0)),
            pl.BlockSpec((1, Dp), lambda c: (0, 0)),
            pl.BlockSpec((Dp, Vp), lambda c: (0, 0)),
            pl.BlockSpec((1, Vp), lambda c: (0, 0)),
        ]
        args += [w1, b1, w2, b2]
        out_w, out_dt, out_b = Vp, jnp.float32, 4
    else:
        out_w, out_dt, out_b = Hp, jnp.bfloat16, 2

    gru_need = (
        2 * rows_c * Ep * 2 +                        # emb chunk (x2 buffers)
        2 * 2 * Bp * Hp * 4 +                        # h0
        2 * (Ep + 3 * Hp) * 3 * Hp * 2 +             # bf16 GRU weights
        (2 * (Hp * Dp + Dp * Vp) * 2 + 2 * (Dp + Vp) * 4 if fuse_head else 0) +
        2 * rows_c * out_w * out_b +                 # out chunk (x2 buffers)
        2 * 2 * Bp * Hp * 4 +                        # hid (resident)
        rows_c * 3 * Hp * 4)                         # gx scratch

    seq_or_logits, hid = pl.pallas_call(
        functools.partial(_gru_kernel, T, Kc, Bp, unroll, fuse_head),
        out_shape=(jax.ShapeDtypeStruct((Tp * Bp, out_w), out_dt),
                   jax.ShapeDtypeStruct((2, Bp, Hp), jnp.float32)),
        grid=(NC,),
        in_specs=in_specs,
        out_specs=(pl.BlockSpec((rows_c, out_w), lambda c: (c, 0)),
                   pl.BlockSpec((2, Bp, Hp), lambda c: (0, 0, 0))),
        scratch_shapes=[pltpu.VMEM((rows_c, 3 * Hp), jnp.float32)],
        compiler_params=pltpu.CompilerParams(
            dimension_semantics=("arbitrary",),      # serial recurrence
            vmem_limit_bytes=_vmem_limit(gru_need)),
    )(*args)

    if fuse_head:
        logits = seq_or_logits
    else:
        # ---- kernel 2: dense head, gridded over (row tiles, vocab tiles) ----
        R = Tp * Bp
        row_cap = 1024 if _vmem_capacity_bytes() > (64 << 20) else 512
        Rt = min(row_cap, R)
        Vt = min(Vp, 1024)
        head_need = (2 * Rt * Hp * 2 + 2 * Hp * Dp * 2 + 2 * Dp * 4 +
                     2 * Dp * Vt * 2 + 2 * Vt * 4 + 2 * Rt * Vt * 4 +
                     Rt * Dp * 4)
        logits = pl.pallas_call(
            _head_kernel,
            out_shape=jax.ShapeDtypeStruct((R, Vp), jnp.float32),
            grid=(_cdiv(R, Rt), _cdiv(Vp, Vt)),
            in_specs=[pl.BlockSpec((Rt, Hp), lambda i, j: (i, 0)),
                      pl.BlockSpec((Hp, Dp), lambda i, j: (0, 0)),
                      pl.BlockSpec((1, Dp), lambda i, j: (0, 0)),
                      pl.BlockSpec((Dp, Vt), lambda i, j: (0, j)),
                      pl.BlockSpec((1, Vt), lambda i, j: (0, j))],
            out_specs=pl.BlockSpec((Rt, Vt), lambda i, j: (i, j)),
            scratch_shapes=[pltpu.VMEM((Rt, Dp), jnp.float32)],
            compiler_params=pltpu.CompilerParams(
                dimension_semantics=("parallel", "arbitrary"),
                vmem_limit_bytes=_vmem_limit(head_need)),
        )(seq_or_logits, w1, b1, w2, b2)

    # ---- glue: drop padding, back to batch_first ----
    out = logits.reshape(Tp, Bp, Vp)[:T, :B, :V]
    output = jnp.transpose(out, (1, 0, 2))                      # (B, T, V)
    hidden = hid[:, :B, :H]                                     # (2, B, H)
    return output, hidden


# --------------------------- params & reference -----------------------------


def init_params(key, nalpha, hidn_size):
    """Deterministic synthetic parameters with the shapes LangMod.__init__ implies."""
    mbed = 3 * nalpha
    dense = hidn_size // 2
    V = nalpha + 2
    keys = jax.random.split(key, 9)

    def u(k, shape, bound):
        return jax.random.uniform(k, shape, jnp.float32, -bound, bound)

    s_h = 1.0 / float(hidn_size) ** 0.5
    s_d = 1.0 / float(dense) ** 0.5

    embed = jax.random.normal(keys[0], (V, mbed), jnp.float32)
    embed = embed.at[0].set(0.0)                        # padding_idx=0

    return dict(
        embed=embed,
        w_ih_l0=u(keys[1], (3 * hidn_size, mbed), s_h),
        w_hh_l0=u(keys[2], (3 * hidn_size, hidn_size), s_h),
        w_ih_l1=u(keys[3], (3 * hidn_size, hidn_size), s_h),
        w_hh_l1=u(keys[4], (3 * hidn_size, hidn_size), s_h),
        w_d1=u(keys[5], (dense, hidn_size), s_h),
        b_d1=u(keys[6], (1, dense), s_h),
        w_dec=u(keys[7], (V, dense), s_d),
        b_dec=u(keys[8], (1, V), s_d),
    )


def _reference_forward(params, x, h_0=None):
    """Pure-JAX reference of LangMod.forward (eval mode) for validation."""
    embed = params["embed"]
    B, T = x.shape
    H = params["w_hh_l0"].shape[1]
    emb = jnp.take(embed, x, axis=0).astype(jnp.float32)        # (B, T, E)
    if h_0 is None:
        h_0 = jnp.zeros((2, B, H), jnp.float32)

    def cell(xx, h, w_ih, w_hh):
        gx = xx @ w_ih.T
        gh = h @ w_hh.T
        r = jax.nn.sigmoid(gx[:, :H] + gh[:, :H])
        z = jax.nn.sigmoid(gx[:, H:2 * H] + gh[:, H:2 * H])
        n = jnp.tanh(gx[:, 2 * H:] + r * gh[:, 2 * H:])
        return (1.0 - z) * n + z * h

    def step(carry, x_t):
        h1, h2 = carry
        h1 = cell(x_t, h1, params["w_ih_l0"], params["w_hh_l0"])
        h2 = cell(h1, h2, params["w_ih_l1"], params["w_hh_l1"])
        return (h1, h2), h2

    (h1, h2), seq = lax.scan(step, (h_0[0], h_0[1]),
                             jnp.transpose(emb, (1, 0, 2)))
    d = jnp.maximum(seq @ params["w_d1"].T + params["b_d1"], 0.0)
    out = jnp.transpose(d @ params["w_dec"].T + params["b_dec"], (1, 0, 2))
    return out, jnp.stack([h1, h2])


if __name__ == "__main__":
    nalpha, hidn_size = 4, 32                  # mbed=12, dense=16, vocab=6
    B, T = 2, 8
    key = jax.random.PRNGKey(0)
    kp, kx, kh, kx2 = jax.random.split(key, 4)

    params = init_params(kp, nalpha, hidn_size)
    x = jax.random.randint(kx, (B, T), 0, nalpha + 2, dtype=jnp.int32)

    # bf16 MXU operands/weights (per review) -> loosened tolerances.
    RTOL, ATOL = 3e-2, 3e-3

    # Path 1: fused dense head (small vocab), auto time-chunking.
    fwd = jax.jit(langmod_forward)
    out, hidden = fwd(params, x)
    jax.block_until_ready((out, hidden))
    assert out.shape == (B, T, nalpha + 2)
    assert hidden.shape == (2, B, hidn_size)
    ref_out, ref_hidden = _reference_forward(params, x)
    np.testing.assert_allclose(np.asarray(out), np.asarray(ref_out),
                               rtol=RTOL, atol=ATOL)
    np.testing.assert_allclose(np.asarray(hidden), np.asarray(ref_hidden),
                               rtol=RTOL, atol=ATOL)

    # Path 2: separate (row, vocab)-tiled head kernel; forced small time
    # chunks with a partial last chunk (exercises the chunked streaming,
    # resident hidden-state carry and the time mask) plus a user h_0.
    B2, T2 = 3, 8
    x2 = jax.random.randint(kx2, (B2, T2), 0, nalpha + 2, dtype=jnp.int32)
    h02 = 0.1 * jax.random.normal(kh, (2, B2, hidn_size), jnp.float32)
    fwd2 = jax.jit(functools.partial(langmod_forward,
                                     fuse_head=False, chunk_steps=3))
    out2, hidden2 = fwd2(params, x2, h02)
    jax.block_until_ready((out2, hidden2))
    ref_out2, ref_hidden2 = _reference_forward(params, x2, h02)
    np.testing.assert_allclose(np.asarray(out2), np.asarray(ref_out2),
                               rtol=RTOL, atol=ATOL)
    np.testing.assert_allclose(np.asarray(hidden2), np.asarray(ref_hidden2),
                               rtol=RTOL, atol=ATOL)

    print("KERNEL_OK")
</pallas_src>

<mosaic_0001>
module attributes {stable_mosaic.version = 11 : i64} {
  func.func @_gru_kernel(%arg0: i32, %arg1: memref<64x16xbf16, #tpu.memory_space<vmem>>, %arg2: memref<2x8x128xf32, #tpu.memory_space<vmem>>, %arg3: memref<16x384xbf16, #tpu.memory_space<vmem>>, %arg4: memref<128x384xbf16, #tpu.memory_space<vmem>>, %arg5: memref<128x384xbf16, #tpu.memory_space<vmem>>, %arg6: memref<128x384xbf16, #tpu.memory_space<vmem>>, %arg7: memref<128x128xbf16, #tpu.memory_space<vmem>>, %arg8: memref<1x128xf32, #tpu.memory_space<vmem>>, %arg9: memref<128x128xbf16, #tpu.memory_space<vmem>>, %arg10: memref<1x128xf32, #tpu.memory_space<vmem>>, %arg11: memref<64x128xf32, #tpu.memory_space<vmem>>, %arg12: memref<2x8x128xf32, #tpu.memory_space<vmem>>, %arg13: memref<64x384xf32, #tpu.memory_space<vmem>>) attributes {dimension_semantics = [#tpu.dimension_semantics<arbitrary>], iteration_bounds = array<i64: 1>, scalar_prefetch = 0 : i64, scratch_operands = 1 : i64, tpu.core_type = #tpu.core_type<tc>, window_params = [{transform_indices = @transform_0, window_bounds = array<i64: 64, 16>}, {pipeline_mode = #tpu.pipeline_mode<synchronous>, transform_indices = @transform_1, window_bounds = array<i64: 2, 8, 128>}, {pipeline_mode = #tpu.pipeline_mode<synchronous>, transform_indices = @transform_2, window_bounds = array<i64: 16, 384>}, {pipeline_mode = #tpu.pipeline_mode<synchronous>, transform_indices = @transform_3, window_bounds = array<i64: 128, 384>}, {pipeline_mode = #tpu.pipeline_mode<synchronous>, transform_indices = @transform_4, window_bounds = array<i64: 128, 384>}, {pipeline_mode = #tpu.pipeline_mode<synchronous>, transform_indices = @transform_5, window_bounds = array<i64: 128, 384>}, {pipeline_mode = #tpu.pipeline_mode<synchronous>, transform_indices = @transform_6, window_bounds = array<i64: 128, 128>}, {pipeline_mode = #tpu.pipeline_mode<synchronous>, transform_indices = @transform_7, window_bounds = array<i64: 1, 128>}, {pipeline_mode = #tpu.pipeline_mode<synchronous>, transform_indices = @transform_8, window_bounds = array<i64: 128, 128>}, {pipeline_mode = #tpu.pipeline_mode<synchronous>, transform_indices = @transform_9, window_bounds = array<i64: 1, 128>}, {transform_indices = @transform_10, window_bounds = array<i64: 64, 128>}, {pipeline_mode = #tpu.pipeline_mode<synchronous>, transform_indices = @transform_11, window_bounds = array<i64: 2, 8, 128>}]} {
    %c0_i32 = arith.constant 0 : i32
    %0 = arith.cmpi eq, %arg0, %c0_i32 : i32
    %1 = arith.extui %0 : i1 to i32
    %c0_i32_0 = arith.constant 0 : i32
    %2 = arith.cmpi ne, %1, %c0_i32_0 : i32
    scf.if %2 {
      %c0_152 = arith.constant 0 : index
      %c0_153 = arith.constant 0 : index
      %c0_154 = arith.constant 0 : index
      %616 = vector.load %arg2[%c0_152, %c0_153, %c0_154] : memref<2x8x128xf32, #tpu.memory_space<vmem>>, vector<2x8x128xf32>
      %c0_155 = arith.constant 0 : index
      %c0_156 = arith.constant 0 : index
      %c0_157 = arith.constant 0 : index
      %617 = vector.load %arg12[%c0_155, %c0_156, %c0_157] : memref<2x8x128xf32, #tpu.memory_space<vmem>>, vector<2x8x128xf32>
      tpu.vector_store %arg12[%c0_155, %c0_156, %c0_157], %616 {strides = array<i32>} : memref<2x8x128xf32, #tpu.memory_space<vmem>>, vector<2x8x128xf32>,
    } else {
    }
    %c0 = arith.constant 0 : index
    %c0_1 = arith.constant 0 : index
    %3 = vector.load %arg1[%c0, %c0_1] : memref<64x16xbf16, #tpu.memory_space<vmem>>, vector<64x16xbf16>
    %c0_2 = arith.constant 0 : index
    %c0_3 = arith.constant 0 : index
    %4 = vector.load %arg3[%c0_2, %c0_3] : memref<16x384xbf16, #tpu.memory_space<vmem>>, vector<16x384xbf16>
    %cst = arith.constant dense<0.000000e+00> : vector<64x384xf32>
    %5 = tpu.matmul %3, %4, %cst {dimension_numbers = #tpu.dot_dimension_numbers<[1], [0], [0], [1], [0, 0, 1, 1], [], []>} : vector<64x16xbf16>, vector<16x384xbf16>, vector<64x384xf32> -> vector<64x384xf32>
    %c0_4 = arith.constant 0 : index
    %c0_5 = arith.constant 0 : index
    %6 = vector.load %arg13[%c0_4, %c0_5] : memref<64x384xf32, #tpu.memory_space<vmem>>, vector<64x384xf32>
    tpu.vector_store %arg13[%c0_4, %c0_5], %5 {strides = array<i32>} : memref<64x384xf32, #tpu.memory_space<vmem>>, vector<64x384xf32>,
    %c0_6 = arith.constant 0 : index
    %c0_7 = arith.constant 0 : index
    %7 = vector.load %arg4[%c0_6, %c0_7] : memref<128x384xbf16, #tpu.memory_space<vmem>>, vector<128x384xbf16>
    %c0_8 = arith.constant 0 : index
    %c0_9 = arith.constant 0 : index
    %8 = vector.load %arg5[%c0_8, %c0_9] : memref<128x384xbf16, #tpu.memory_space<vmem>>, vector<128x384xbf16>
    %c0_10 = arith.constant 0 : index
    %c0_11 = arith.constant 0 : index
    %9 = vector.load %arg6[%c0_10, %c0_11] : memref<128x384xbf16, #tpu.memory_space<vmem>>, vector<128x384xbf16>
    %c0_12 = arith.constant 0 : index
    %c0_13 = arith.constant 0 : index
    %10 = vector.load %arg7[%c0_12, %c0_13] : memref<128x128xbf16, #tpu.memory_space<vmem>>, vector<128x128xbf16>
    %c0_14 = arith.constant 0 : index
    %c0_15 = arith.constant 0 : index
    %11 = vector.load %arg8[%c0_14, %c0_15] : memref<1x128xf32, #tpu.memory_space<vmem>>, vector<1x128xf32>
    %c0_16 = arith.constant 0 : index
    %c0_17 = arith.constant 0 : index
    %12 = vector.load %arg9[%c0_16, %c0_17] : memref<128x128xbf16, #tpu.memory_space<vmem>>, vector<128x128xbf16>
    %c0_18 = arith.constant 0 : index
    %c0_19 = arith.constant 0 : index
    %13 = vector.load %arg10[%c0_18, %c0_19] : memref<1x128xf32, #tpu.memory_space<vmem>>, vector<1x128xf32>
    %c0_20 = arith.constant 0 : index
    %c0_21 = arith.constant 0 : index
    %c0_22 = arith.constant 0 : index
    %14 = vector.load %arg12[%c0_20, %c0_21, %c0_22] : memref<2x8x128xf32, #tpu.memory_space<vmem>>, vector<1x8x128xf32>
    %15 = vector.shape_cast %14 : vector<1x8x128xf32> to vector<8x128xf32>
    %c1 = arith.constant 1 : index
    %c0_23 = arith.constant 0 : index
    %c0_24 = arith.constant 0 : index
    %16 = vector.load %arg12[%c1, %c0_23, %c0_24] : memref<2x8x128xf32, #tpu.memory_space<vmem>>, vector<1x8x128xf32>
    %17 = vector.shape_cast %16 : vector<1x8x128xf32> to vector<8x128xf32>
    %c0_i32_25 = arith.constant 0 : i32
    %c8_i32 = arith.constant 8 : i32
    %18 = arith.muli %c0_i32_25, %c8_i32 : i32
    %19 = tpu.assume_multiple %18, 8 : i32
    %20 = arith.index_cast %19 : i32 to index
    %c0_26 = arith.constant 0 : index
    %21 = vector.load %arg13[%20, %c0_26] : memref<64x384xf32, #tpu.memory_space<vmem>>, vector<8x384xf32>
    %22 = arith.truncf %15 : vector<8x128xf32> to vector<8x128xbf16>
    %cst_27 = arith.constant dense<0.000000e+00> : vector<8x384xf32>
    %23 = tpu.matmul %22, %7, %cst_27 {dimension_numbers = #tpu.dot_dimension_numbers<[1], [0], [0], [1], [0, 0, 1, 1], [], []>} : vector<8x128xbf16>, vector<128x384xbf16>, vector<8x384xf32> -> vector<8x384xf32>
    %24 = vector.extract_strided_slice %21 {offsets = [0, 0], sizes = [8, 128], strides = [1, 1]} : vector<8x384xf32> to vector<8x128xf32>
    %25 = vector.extract_strided_slice %23 {offsets = [0, 0], sizes = [8, 128], strides = [1, 1]} : vector<8x384xf32> to vector<8x128xf32>
    %26 = arith.addf %24, %25 : vector<8x128xf32>
    %27 = arith.negf %26 : vector<8x128xf32>
    %28 = math.exp %27 : vector<8x128xf32>
    %cst_28 = arith.constant 1.000000e+00 : f32
    %29 = vector.broadcast %cst_28 : f32 to vector<8x128xf32>
    %30 = arith.addf %29, %28 : vector<8x128xf32>
    %31 = arith.divf %29, %30 : vector<8x128xf32>
    %32 = vector.extract_strided_slice %21 {offsets = [0, 128], sizes = [8, 128], strides = [1, 1]} : vector<8x384xf32> to vector<8x128xf32>
    %33 = vector.extract_strided_slice %23 {offsets = [0, 128], sizes = [8, 128], strides = [1, 1]} : vector<8x384xf32> to vector<8x128xf32>
    %34 = arith.addf %32, %33 : vector<8x128xf32>
    %35 = arith.negf %34 : vector<8x128xf32>
    %36 = math.exp %35 : vector<8x128xf32>
    %cst_29 = arith.constant 1.000000e+00 : f32
    %37 = vector.broadcast %cst_29 : f32 to vector<8x128xf32>
    %38 = arith.addf %37, %36 : vector<8x128xf32>
    %39 = arith.divf %37, %38 : vector<8x128xf32>
    %40 = vector.extract_strided_slice %21 {offsets = [0, 256], sizes = [8, 128], strides = [1, 1]} : vector<8x384xf32> to vector<8x128xf32>
    %41 = vector.extract_strided_slice %23 {offsets = [0, 256], sizes = [8, 128], strides = [1, 1]} : vector<8x384xf32> to vector<8x128xf32>
    %42 = arith.mulf %31, %41 : vector<8x128xf32>
    %43 = arith.addf %40, %42 : vector<8x128xf32>
    %44 = math.tanh %43 : vector<8x128xf32>
    %cst_30 = arith.constant 1.000000e+00 : f32
    %45 = vector.broadcast %cst_30 : f32 to vector<8x128xf32>
    %46 = arith.subf %45, %39 : vector<8x128xf32>
    %47 = arith.mulf %46, %44 : vector<8x128xf32>
    %48 = arith.mulf %39, %15 : vector<8x128xf32>
    %49 = arith.addf %47, %48 : vector<8x128xf32>
    %50 = arith.truncf %49 : vector<8x128xf32> to vector<8x128xbf16>
    %cst_31 = arith.constant dense<0.000000e+00> : vector<8x384xf32>
    %51 = tpu.matmul %50, %8, %cst_31 {dimension_numbers = #tpu.dot_dimension_numbers<[1], [0], [0], [1], [0, 0, 1, 1], [], []>} : vector<8x128xbf16>, vector<128x384xbf16>, vector<8x384xf32> -> vector<8x384xf32>
    %52 = arith.truncf %17 : vector<8x128xf32> to vector<8x128xbf16>
    %cst_32 = arith.constant dense<0.000000e+00> : vector<8x384xf32>
    %53 = tpu.matmul %52, %9, %cst_32 {dimension_numbers = #tpu.dot_dimension_numbers<[1], [0], [0], [1], [0, 0, 1, 1], [], []>} : vector<8x128xbf16>, vector<128x384xbf16>, vector<8x384xf32> -> vector<8x384xf32>
    %54 = vector.extract_strided_slice %51 {offsets = [0, 0], sizes = [8, 128], strides = [1, 1]} : vector<8x384xf32> to vector<8x128xf32>
    %55 = vector.extract_strided_slice %53 {offsets = [0, 0], sizes = [8, 128], strides = [1, 1]} : vector<8x384xf32> to vector<8x128xf32>
    %56 = arith.addf %54, %55 : vector<8x128xf32>
    %57 = arith.negf %56 : vector<8x128xf32>
    %58 = math.exp %57 : vector<8x128xf32>
    %cst_33 = arith.constant 1.000000e+00 : f32
    %59 = vector.broadcast %cst_33 : f32 to vector<8x128xf32>
    %60 = arith.addf %59, %58 : vector<8x128xf32>
    %61 = arith.divf %59, %60 : vector<8x128xf32>
    %62 = vector.extract_strided_slice %51 {offsets = [0, 128], sizes = [8, 128], strides = [1, 1]} : vector<8x384xf32> to vector<8x128xf32>
    %63 = vector.extract_strided_slice %53 {offsets = [0, 128], sizes = [8, 128], strides = [1, 1]} : vector<8x384xf32> to vector<8x128xf32>
    %64 = arith.addf %62, %63 : vector<8x128xf32>
    %65 = arith.negf %64 : vector<8x128xf32>
    %66 = math.exp %65 : vector<8x128xf32>
    %cst_34 = arith.constant 1.000000e+00 : f32
    %67 = vector.broadcast %cst_34 : f32 to vector<8x128xf32>
    %68 = arith.addf %67, %66 : vector<8x128xf32>
    %69 = arith.divf %67, %68 : vector<8x128xf32>
    %70 = vector.extract_strided_slice %51 {offsets = [0, 256], sizes = [8, 128], strides = [1, 1]} : vector<8x384xf32> to vector<8x128xf32>
    %71 = vector.extract_strided_slice %53 {offsets = [0, 256], sizes = [8, 128], strides = [1, 1]} : vector<8x384xf32> to vector<8x128xf32>
    %72 = arith.mulf %61, %71 : vector<8x128xf32>
    %73 = arith.addf %70, %72 : vector<8x128xf32>
    %74 = math.tanh %73 : vector<8x128xf32>
    %cst_35 = arith.constant 1.000000e+00 : f32
    %75 = vector.broadcast %cst_35 : f32 to vector<8x128xf32>
    %76 = arith.subf %75, %69 : vector<8x128xf32>
    %77 = arith.mulf %76, %74 : vector<8x128xf32>
    %78 = arith.mulf %69, %17 : vector<8x128xf32>
    %79 = arith.addf %77, %78 : vector<8x128xf32>
    %80 = arith.truncf %79 : vector<8x128xf32> to vector<8x128xbf16>
    %cst_36 = arith.constant dense<0.000000e+00> : vector<8x128xf32>
    %81 = tpu.matmul %80, %10, %cst_36 {dimension_numbers = #tpu.dot_dimension_numbers<[1], [0], [0], [1], [0, 0, 1, 1], [], []>} : vector<8x128xbf16>, vector<128x128xbf16>, vector<8x128xf32> -> vector<8x128xf32>
    %82 = vector.broadcast %11 : vector<1x128xf32> to vector<8x128xf32>
    %83 = arith.addf %81, %82 : vector<8x128xf32>
    %cst_37 = arith.constant 0.000000e+00 : f32
    %84 = vector.broadcast %cst_37 : f32 to vector<8x128xf32>
    %85 = arith.maximumf %83, %84 : vector<8x128xf32>
    %86 = arith.truncf %85 : vector<8x128xf32> to vector<8x128xbf16>
    %cst_38 = arith.constant dense<0.000000e+00> : vector<8x128xf32>
    %87 = tpu.matmul %86, %12, %cst_38 {dimension_numbers = #tpu.dot_dimension_numbers<[1], [0], [0], [1], [0, 0, 1, 1], [], []>} : vector<8x128xbf16>, vector<128x128xbf16>, vector<8x128xf32> -> vector<8x128xf32>
    %88 = vector.broadcast %13 : vector<1x128xf32> to vector<8x128xf32>
    %89 = arith.addf %87, %88 : vector<8x128xf32>
    %90 = arith.index_cast %19 : i32 to index
    %c0_39 = arith.constant 0 : index
    %91 = vector.load %arg11[%90, %c0_39] : memref<64x128xf32, #tpu.memory_space<vmem>>, vector<8x128xf32>
    tpu.vector_store %arg11[%90, %c0_39], %89 {strides = array<i32>} : memref<64x128xf32, #tpu.memory_space<vmem>>, vector<8x128xf32>,
    %c1_i32 = arith.constant 1 : i32
    %c8_i32_40 = arith.constant 8 : i32
    %92 = arith.muli %c1_i32, %c8_i32_40 : i32
    %93 = tpu.assume_multiple %92, 8 : i32
    %94 = arith.index_cast %93 : i32 to index
    %c0_41 = arith.constant 0 : index
    %95 = vector.load %arg13[%94, %c0_41] : memref<64x384xf32, #tpu.memory_space<vmem>>, vector<8x384xf32>
    %96 = arith.truncf %49 : vector<8x128xf32> to vector<8x128xbf16>
    %cst_42 = arith.constant dense<0.000000e+00> : vector<8x384xf32>
    %97 = tpu.matmul %96, %7, %cst_42 {dimension_numbers = #tpu.dot_dimension_numbers<[1], [0], [0], [1], [0, 0, 1, 1], [], []>} : vector<8x128xbf16>, vector<128x384xbf16>, vector<8x384xf32> -> vector<8x384xf32>
    %98 = vector.extract_strided_slice %95 {offsets = [0, 0], sizes = [8, 128], strides = [1, 1]} : vector<8x384xf32> to vector<8x128xf32>
    %99 = vector.extract_strided_slice %97 {offsets = [0, 0], sizes = [8, 128], strides = [1, 1]} : vector<8x384xf32> to vector<8x128xf32>
    %100 = arith.addf %98, %99 : vector<8x128xf32>
    %101 = arith.negf %100 : vector<8x128xf32>
    %102 = math.exp %101 : vector<8x128xf32>
    %cst_43 = arith.constant 1.000000e+00 : f32
    %103 = vector.broadcast %cst_43 : f32 to vector<8x128xf32>
    %104 = arith.addf %103, %102 : vector<8x128xf32>
    %105 = arith.divf %103, %104 : vector<8x128xf32>
    %106 = vector.extract_strided_slice %95 {offsets = [0, 128], sizes = [8, 128], strides = [1, 1]} : vector<8x384xf32> to vector<8x128xf32>
    %107 = vector.extract_strided_slice %97 {offsets = [0, 128], sizes = [8, 128], strides = [1, 1]} : vector<8x384xf32> to vector<8x128xf32>
    %108 = arith.addf %106, %107 : vector<8x128xf32>
    %109 = arith.negf %108 : vector<8x128xf32>
    %110 = math.exp %109 : vector<8x128xf32>
    %cst_44 = arith.constant 1.000000e+00 : f32
    %111 = vector.broadcast %cst_44 : f32 to vector<8x128xf32>
    %112 = arith.addf %111, %110 : vector<8x128xf32>
    %113 = arith.divf %111, %112 : vector<8x128xf32>
    %114 = vector.extract_strided_slice %95 {offsets = [0, 256], sizes = [8, 128], strides = [1, 1]} : vector<8x384xf32> to vector<8x128xf32>
    %115 = vector.extract_strided_slice %97 {offsets = [0, 256], sizes = [8, 128], strides = [1, 1]} : vector<8x384xf32> to vector<8x128xf32>
    %116 = arith.mulf %105, %115 : vector<8x128xf32>
    %117 = arith.addf %114, %116 : vector<8x128xf32>
    %118 = math.tanh %117 : vector<8x128xf32>
    %cst_45 = arith.constant 1.000000e+00 : f32
    %119 = vector.broadcast %cst_45 : f32 to vector<8x128xf32>
    %120 = arith.subf %119, %113 : vector<8x128xf32>
    %121 = arith.mulf %120, %118 : vector<8x128xf32>
    %122 = arith.mulf %113, %49 : vector<8x128xf32>
    %123 = arith.addf %121, %122 : vector<8x128xf32>
    %124 = arith.truncf %123 : vector<8x128xf32> to vector<8x128xbf16>
    %cst_46 = arith.constant dense<0.000000e+00> : vector<8x384xf32>
    %125 = tpu.matmul %124, %8, %cst_46 {dimension_numbers = #tpu.dot_dimension_numbers<[1], [0], [0], [1], [0, 0, 1, 1], [], []>} : vector<8x128xbf16>, vector<128x384xbf16>, vector<8x384xf32> -> vector<8x384xf32>
    %126 = arith.truncf %79 : vector<8x128xf32> to vector<8x128xbf16>
    %cst_47 = arith.constant dense<0.000000e+00> : vector<8x384xf32>
    %127 = tpu.matmul %126, %9, %cst_47 {dimension_numbers = #tpu.dot_dimension_numbers<[1], [0], [0], [1], [0, 0, 1, 1], [], []>} : vector<8x128xbf16>, vector<128x384xbf16>, vector<8x384xf32> -> vector<8x384xf32>
    %128 = vector.extract_strided_slice %125 {offsets = [0, 0], sizes = [8, 128], strides = [1, 1]} : vector<8x384xf32> to vector<8x128xf32>
    %129 = vector.extract_strided_slice %127 {offsets = [0, 0], sizes = [8, 128], strides = [1, 1]} : vector<8x384xf32> to vector<8x128xf32>
    %130 = arith.addf %128, %129 : vector<8x128xf32>
    %131 = arith.negf %130 : vector<8x128xf32>
    %132 = math.exp %131 : vector<8x128xf32>
    %cst_48 = arith.constant 1.000000e+00 : f32
    %133 = vector.broadcast %cst_48 : f32 to vector<8x128xf32>
    %134 = arith.addf %133, %132 : vector<8x128xf32>
    %135 = arith.divf %133, %134 : vector<8x128xf32>
    %136 = vector.extract_strided_slice %125 {offsets = [0, 128], sizes = [8, 128], strides = [1, 1]} : vector<8x384xf32> to vector<8x128xf32>
    %137 = vector.extract_strided_slice %127 {offsets = [0, 128], sizes = [8, 128], strides = [1, 1]} : vector<8x384xf32> to vector<8x128xf32>
    %138 = arith.addf %136, %137 : vector<8x128xf32>
    %139 = arith.negf %138 : vector<8x128xf32>
    %140 = math.exp %139 : vector<8x128xf32>
    %cst_49 = arith.constant 1.000000e+00 : f32
    %141 = vector.broadcast %cst_49 : f32 to vector<8x128xf32>
    %142 = arith.addf %141, %140 : vector<8x128xf32>
    %143 = arith.divf %141, %142 : vector<8x128xf32>
    %144 = vector.extract_strided_slice %125 {offsets = [0, 256], sizes = [8, 128], strides = [1, 1]} : vector<8x384xf32> to vector<8x128xf32>
    %145 = vector.extract_strided_slice %127 {offsets = [0, 256], sizes = [8, 128], strides = [1, 1]} : vector<8x384xf32> to vector<8x128xf32>
    %146 = arith.mulf %135, %145 : vector<8x128xf32>
    %147 = arith.addf %144, %146 : vector<8x128xf32>
    %148 = math.tanh %147 : vector<8x128xf32>
    %cst_50 = arith.constant 1.000000e+00 : f32
    %149 = vector.broadcast %cst_50 : f32 to vector<8x128xf32>
    %150 = arith.subf %149, %143 : vector<8x128xf32>
    %151 = arith.mulf %150, %148 : vector<8x128xf32>
    %152 = arith.mulf %143, %79 : vector<8x128xf32>
    %153 = arith.addf %151, %152 : vector<8x128xf32>
    %154 = arith.truncf %153 : vector<8x128xf32> to vector<8x128xbf16>
    %cst_51 = arith.constant dense<0.000000e+00> : vector<8x128xf32>
    %155 = tpu.matmul %154, %10, %cst_51 {dimension_numbers = #tpu.dot_dimension_numbers<[1], [0], [0], [1], [0, 0, 1, 1], [], []>} : vector<8x128xbf16>, vector<128x128xbf16>, vector<8x128xf32> -> vector<8x128xf32>
    %156 = vector.broadcast %11 : vector<1x128xf32> to vector<8x128xf32>
    %157 = arith.addf %155, %156 : vector<8x128xf32>
    %cst_52 = arith.constant 0.000000e+00 : f32
    %158 = vector.broadcast %cst_52 : f32 to vector<8x128xf32>
    %159 = arith.maximumf %157, %158 : vector<8x128xf32>
    %160 = arith.truncf %159 : vector<8x128xf32> to vector<8x128xbf16>
    %cst_53 = arith.constant dense<0.000000e+00> : vector<8x128xf32>
    %161 = tpu.matmul %160, %12, %cst_53 {dimension_numbers = #tpu.dot_dimension_numbers<[1], [0], [0], [1], [0, 0, 1, 1], [], []>} : vector<8x128xbf16>, vector<128x128xbf16>, vector<8x128xf32> -> vector<8x128xf32>
    %162 = vector.broadcast %13 : vector<1x128xf32> to vector<8x128xf32>
    %163 = arith.addf %161, %162 : vector<8x128xf32>
    %164 = arith.index_cast %93 : i32 to index
    %c0_54 = arith.constant 0 : index
    %165 = vector.load %arg11[%164, %c0_54] : memref<64x128xf32, #tpu.memory_space<vmem>>, vector<8x128xf32>
    tpu.vector_store %arg11[%164, %c0_54], %163 {strides = array<i32>} : memref<64x128xf32, #tpu.memory_space<vmem>>, vector<8x128xf32>,
    %c2_i32 = arith.constant 2 : i32
    %c8_i32_55 = arith.constant 8 : i32
    %166 = arith.muli %c2_i32, %c8_i32_55 : i32
    %167 = tpu.assume_multiple %166, 8 : i32
    %168 = arith.index_cast %167 : i32 to index
    %c0_56 = arith.constant 0 : index
    %169 = vector.load %arg13[%168, %c0_56] : memref<64x384xf32, #tpu.memory_space<vmem>>, vector<8x384xf32>
    %170 = arith.truncf %123 : vector<8x128xf32> to vector<8x128xbf16>
    %cst_57 = arith.constant dense<0.000000e+00> : vector<8x384xf32>
    %171 = tpu.matmul %170, %7, %cst_57 {dimension_numbers = #tpu.dot_dimension_numbers<[1], [0], [0], [1], [0, 0, 1, 1], [], []>} : vector<8x128xbf16>, vector<128x384xbf16>, vector<8x384xf32> -> vector<8x384xf32>
    %172 = vector.extract_strided_slice %169 {offsets = [0, 0], sizes = [8, 128], strides = [1, 1]} : vector<8x384xf32> to vector<8x128xf32>
    %173 = vector.extract_strided_slice %171 {offsets = [0, 0], sizes = [8, 128], strides = [1, 1]} : vector<8x384xf32> to vector<8x128xf32>
    %174 = arith.addf %172, %173 : vector<8x128xf32>
    %175 = arith.negf %174 : vector<8x128xf32>
    %176 = math.exp %175 : vector<8x128xf32>
    %cst_58 = arith.constant 1.000000e+00 : f32
    %177 = vector.broadcast %cst_58 : f32 to vector<8x128xf32>
    %178 = arith.addf %177, %176 : vector<8x128xf32>
    %179 = arith.divf %177, %178 : vector<8x128xf32>
    %180 = vector.extract_strided_slice %169 {offsets = [0, 128], sizes = [8, 128], strides = [1, 1]} : vector<8x384xf32> to vector<8x128xf32>
    %181 = vector.extract_strided_slice %171 {offsets = [0, 128], sizes = [8, 128], strides = [1, 1]} : vector<8x384xf32> to vector<8x128xf32>
    %182 = arith.addf %180, %181 : vector<8x128xf32>
    %183 = arith.negf %182 : vector<8x128xf32>
    %184 = math.exp %183 : vector<8x128xf32>
    %cst_59 = arith.constant 1.000000e+00 : f32
    %185 = vector.broadcast %cst_59 : f32 to vector<8x128xf32>
    %186 = arith.addf %185, %184 : vector<8x128xf32>
    %187 = arith.divf %185, %186 : vector<8x128xf32>
    %188 = vector.extract_strided_slice %169 {offsets = [0, 256], sizes = [8, 128], strides = [1, 1]} : vector<8x384xf32> to vector<8x128xf32>
    %189 = vector.extract_strided_slice %171 {offsets = [0, 256], sizes = [8, 128], strides = [1, 1]} : vector<8x384xf32> to vector<8x128xf32>
    %190 = arith.mulf %179, %189 : vector<8x128xf32>
    %191 = arith.addf %188, %190 : vector<8x128xf32>
    %192 = math.tanh %191 : vector<8x128xf32>
    %cst_60 = arith.constant 1.000000e+00 : f32
    %193 = vector.broadcast %cst_60 : f32 to vector<8x128xf32>
    %194 = arith.subf %193, %187 : vector<8x128xf32>
    %195 = arith.mulf %194, %192 : vector<8x128xf32>
    %196 = arith.mulf %187, %123 : vector<8x128xf32>
    %197 = arith.addf %195, %196 : vector<8x128xf32>
    %198 = arith.truncf %197 : vector<8x128xf32> to vector<8x128xbf16>
    %cst_61 = arith.constant dense<0.000000e+00> : vector<8x384xf32>
    %199 = tpu.matmul %198, %8, %cst_61 {dimension_numbers = #tpu.dot_dimension_numbers<[1], [0], [0], [1], [0, 0, 1, 1], [], []>} : vector<8x128xbf16>, vector<128x384xbf16>, vector<8x384xf32> -> vector<8x384xf32>
    %200 = arith.truncf %153 : vector<8x128xf32> to vector<8x128xbf16>
    %cst_62 = arith.constant dense<0.000000e+00> : vector<8x384xf32>
    %201 = tpu.matmul %200, %9, %cst_62 {dimension_numbers = #tpu.dot_dimension_numbers<[1], [0], [0], [1], [0, 0, 1, 1], [], []>} : vector<8x128xbf16>, vector<128x384xbf16>, vector<8x384xf32> -> vector<8x384xf32>
    %202 = vector.extract_strided_slice %199 {offsets = [0, 0], sizes = [8, 128], strides = [1, 1]} : vector<8x384xf32> to vector<8x128xf32>
    %203 = vector.extract_strided_slice %201 {offsets = [0, 0], sizes = [8, 128], strides = [1, 1]} : vector<8x384xf32> to vector<8x128xf32>
    %204 = arith.addf %202, %203 : vector<8x128xf32>
    %205 = arith.negf %204 : vector<8x128xf32>
    %206 = math.exp %205 : vector<8x128xf32>
    %cst_63 = arith.constant 1.000000e+00 : f32
    %207 = vector.broadcast %cst_63 : f32 to vector<8x128xf32>
    %208 = arith.addf %207, %206 : vector<8x128xf32>
    %209 = arith.divf %207, %208 : vector<8x128xf32>
    %210 = vector.extract_strided_slice %199 {offsets = [0, 128], sizes = [8, 128], strides = [1, 1]} : vector<8x384xf32> to vector<8x128xf32>
    %211 = vector.extract_strided_slice %201 {offsets = [0, 128], sizes = [8, 128], strides = [1, 1]} : vector<8x384xf32> to vector<8x128xf32>
    %212 = arith.addf %210, %211 : vector<8x128xf32>
    %213 = arith.negf %212 : vector<8x128xf32>
    %214 = math.exp %213 : vector<8x128xf32>
    %cst_64 = arith.constant 1.000000e+00 : f32
    %215 = vector.broadcast %cst_64 : f32 to vector<8x128xf32>
    %216 = arith.addf %215, %214 : vector<8x128xf32>
    %217 = arith.divf %215, %216 : vector<8x128xf32>
    %218 = vector.extract_strided_slice %199 {offsets = [0, 256], sizes = [8, 128], strides = [1, 1]} : vector<8x384xf32> to vector<8x128xf32>
    %219 = vector.extract_strided_slice %201 {offsets = [0, 256], sizes = [8, 128], strides = [1, 1]} : vector<8x384xf32> to vector<8x128xf32>
    %220 = arith.mulf %209, %219 : vector<8x128xf32>
    %221 = arith.addf %218, %220 : vector<8x128xf32>
    %222 = math.tanh %221 : vector<8x128xf32>
    %cst_65 = arith.constant 1.000000e+00 : f32
    %223 = vector.broadcast %cst_65 : f32 to vector<8x128xf32>
    %224 = arith.subf %223, %217 : vector<8x128xf32>
    %225 = arith.mulf %224, %222 : vector<8x128xf32>
    %226 = arith.mulf %217, %153 : vector<8x128xf32>
    %227 = arith.addf %225, %226 : vector<8x128xf32>
    %228 = arith.truncf %227 : vector<8x128xf32> to vector<8x128xbf16>
    %cst_66 = arith.constant dense<0.000000e+00> : vector<8x128xf32>
    %229 = tpu.matmul %228, %10, %cst_66 {dimension_numbers = #tpu.dot_dimension_numbers<[1], [0], [0], [1], [0, 0, 1, 1], [], []>} : vector<8x128xbf16>, vector<128x128xbf16>, vector<8x128xf32> -> vector<8x128xf32>
    %230 = vector.broadcast %11 : vector<1x128xf32> to vector<8x128xf32>
    %231 = arith.addf %229, %230 : vector<8x128xf32>
    %cst_67 = arith.constant 0.000000e+00 : f32
    %232 = vector.broadcast %cst_67 : f32 to vector<8x128xf32>
    %233 = arith.maximumf %231, %232 : vector<8x128xf32>
    %234 = arith.truncf %233 : vector<8x128xf32> to vector<8x128xbf16>
    %cst_68 = arith.constant dense<0.000000e+00> : vector<8x128xf32>
    %235 = tpu.matmul %234, %12, %cst_68 {dimension_numbers = #tpu.dot_dimension_numbers<[1], [0], [0], [1], [0, 0, 1, 1], [], []>} : vector<8x128xbf16>, vector<128x128xbf16>, vector<8x128xf32> -> vector<8x128xf32>
    %236 = vector.broadcast %13 : vector<1x128xf32> to vector<8x128xf32>
    %237 = arith.addf %235, %236 : vector<8x128xf32>
    %238 = arith.index_cast %167 : i32 to index
    %c0_69 = arith.constant 0 : index
    %239 = vector.load %arg11[%238, %c0_69] : memref<64x128xf32, #tpu.memory_space<vmem>>, vector<8x128xf32>
    tpu.vector_store %arg11[%238, %c0_69], %237 {strides = array<i32>} : memref<64x128xf32, #tpu.memory_space<vmem>>, vector<8x128xf32>,
    %c3_i32 = arith.constant 3 : i32
    %c8_i32_70 = arith.constant 8 : i32
    %240 = arith.muli %c3_i32, %c8_i32_70 : i32
    %241 = tpu.assume_multiple %240, 8 : i32
    %242 = arith.index_cast %241 : i32 to index
    %c0_71 = arith.constant 0 : index
    %243 = vector.load %arg13[%242, %c0_71] : memref<64x384xf32, #tpu.memory_space<vmem>>, vector<8x384xf32>
    %244 = arith.truncf %197 : vector<8x128xf32> to vector<8x128xbf16>
    %cst_72 = arith.constant dense<0.000000e+00> : vector<8x384xf32>
    %245 = tpu.matmul %244, %7, %cst_72 {dimension_numbers = #tpu.dot_dimension_numbers<[1], [0], [0], [1], [0, 0, 1, 1], [], []>} : vector<8x128xbf16>, vector<128x384xbf16>, vector<8x384xf32> -> vector<8x384xf32>
    %246 = vector.extract_strided_slice %243 {offsets = [0, 0], sizes = [8, 128], strides = [1, 1]} : vector<8x384xf32> to vector<8x128xf32>
    %247 = vector.extract_strided_slice %245 {offsets = [0, 0], sizes = [8, 128], strides = [1, 1]} : vector<8x384xf32> to vector<8x128xf32>
    %248 = arith.addf %246, %247 : vector<8x128xf32>
    %249 = arith.negf %248 : vector<8x128xf32>
    %250 = math.exp %249 : vector<8x128xf32>
    %cst_73 = arith.constant 1.000000e+00 : f32
    %251 = vector.broadcast %cst_73 : f32 to vector<8x128xf32>
    %252 = arith.addf %251, %250 : vector<8x128xf32>
    %253 = arith.divf %251, %252 : vector<8x128xf32>
    %254 = vector.extract_strided_slice %243 {offsets = [0, 128], sizes = [8, 128], strides = [1, 1]} : vector<8x384xf32> to vector<8x128xf32>
    %255 = vector.extract_strided_slice %245 {offsets = [0, 128], sizes = [8, 128], strides = [1, 1]} : vector<8x384xf32> to vector<8x128xf32>
    %256 = arith.addf %254, %255 : vector<8x128xf32>
    %257 = arith.negf %256 : vector<8x128xf32>
    %258 = math.exp %257 : vector<8x128xf32>
    %cst_74 = arith.constant 1.000000e+00 : f32
    %259 = vector.broadcast %cst_74 : f32 to vector<8x128xf32>
    %260 = arith.addf %259, %258 : vector<8x128xf32>
    %261 = arith.divf %259, %260 : vector<8x128xf32>
    %262 = vector.extract_strided_slice %243 {offsets = [0, 256], sizes = [8, 128], strides = [1, 1]} : vector<8x384xf32> to vector<8x128xf32>
    %263 = vector.extract_strided_slice %245 {offsets = [0, 256], sizes = [8, 128], strides = [1, 1]} : vector<8x384xf32> to vector<8x128xf32>
    %264 = arith.mulf %253, %263 : vector<8x128xf32>
    %265 = arith.addf %262, %264 : vector<8x128xf32>
    %266 = math.tanh %265 : vector<8x128xf32>
    %cst_75 = arith.constant 1.000000e+00 : f32
    %267 = vector.broadcast %cst_75 : f32 to vector<8x128xf32>
    %268 = arith.subf %267, %261 : vector<8x128xf32>
    %269 = arith.mulf %268, %266 : vector<8x128xf32>
    %270 = arith.mulf %261, %197 : vector<8x128xf32>
    %271 = arith.addf %269, %270 : vector<8x128xf32>
    %272 = arith.truncf %271 : vector<8x128xf32> to vector<8x128xbf16>
    %cst_76 = arith.constant dense<0.000000e+00> : vector<8x384xf32>
    %273 = tpu.matmul %272, %8, %cst_76 {dimension_numbers = #tpu.dot_dimension_numbers<[1], [0], [0], [1], [0, 0, 1, 1], [], []>} : vector<8x128xbf16>, vector<128x384xbf16>, vector<8x384xf32> -> vector<8x384xf32>
    %274 = arith.truncf %227 : vector<8x128xf32> to vector<8x128xbf16>
    %cst_77 = arith.constant dense<0.000000e+00> : vector<8x384xf32>
    %275 = tpu.matmul %274, %9, %cst_77 {dimension_numbers = #tpu.dot_dimension_numbers<[1], [0], [0], [1], [0, 0, 1, 1], [], []>} : vector<8x128xbf16>, vector<128x384xbf16>, vector<8x384xf32> -> vector<8x384xf32>
    %276 = vector.extract_strided_slice %273 {offsets = [0, 0], sizes = [8, 128], strides = [1, 1]} : vector<8x384xf32> to vector<8x128xf32>
    %277 = vector.extract_strided_slice %275 {offsets = [0, 0], sizes = [8, 128], strides = [1, 1]} : vector<8x384xf32> to vector<8x128xf32>
    %278 = arith.addf %276, %277 : vector<8x128xf32>
    %279 = arith.negf %278 : vector<8x128xf32>
    %280 = math.exp %279 : vector<8x128xf32>
    %cst_78 = arith.constant 1.000000e+00 : f32
    %281 = vector.broadcast %cst_78 : f32 to vector<8x128xf32>
    %282 = arith.addf %281, %280 : vector<8x128xf32>
    %283 = arith.divf %281, %282 : vector<8x128xf32>
    %284 = vector.extract_strided_slice %273 {offsets = [0, 128], sizes = [8, 128], strides = [1, 1]} : vector<8x384xf32> to vector<8x128xf32>
    %285 = vector.extract_strided_slice %275 {offsets = [0, 128], sizes = [8, 128], strides = [1, 1]} : vector<8x384xf32> to vector<8x128xf32>
    %286 = arith.addf %284, %285 : vector<8x128xf32>
    %287 = arith.negf %286 : vector<8x128xf32>
    %288 = math.exp %287 : vector<8x128xf32>
    %cst_79 = arith.constant 1.000000e+00 : f32
    %289 = vector.broadcast %cst_79 : f32 to vector<8x128xf32>
    %290 = arith.addf %289, %288 : vector<8x128xf32>
    %291 = arith.divf %289, %290 : vector<8x128xf32>
    %292 = vector.extract_strided_slice %273 {offsets = [0, 256], sizes = [8, 128], strides = [1, 1]} : vector<8x384xf32> to vector<8x128xf32>
    %293 = vector.extract_strided_slice %275 {offsets = [0, 256], sizes = [8, 128], strides = [1, 1]} : vector<8x384xf32> to vector<8x128xf32>
    %294 = arith.mulf %283, %293 : vector<8x128xf32>
    %295 = arith.addf %292, %294 : vector<8x128xf32>
    %296 = math.tanh %295 : vector<8x128xf32>
    %cst_80 = arith.constant 1.000000e+00 : f32
    %297 = vector.broadcast %cst_80 : f32 to vector<8x128xf32>
    %298 = arith.subf %297, %291 : vector<8x128xf32>
    %299 = arith.mulf %298, %296 : vector<8x128xf32>
    %300 = arith.mulf %291, %227 : vector<8x128xf32>
    %301 = arith.addf %299, %300 : vector<8x128xf32>
    %302 = arith.truncf %301 : vector<8x128xf32> to vector<8x128xbf16>
    %cst_81 = arith.constant dense<0.000000e+00> : vector<8x128xf32>
    %303 = tpu.matmul %302, %10, %cst_81 {dimension_numbers = #tpu.dot_dimension_numbers<[1], [0], [0], [1], [0, 0, 1, 1], [], []>} : vector<8x128xbf16>, vector<128x128xbf16>, vector<8x128xf32> -> vector<8x128xf32>
    %304 = vector.broadcast %11 : vector<1x128xf32> to vector<8x128xf32>
    %305 = arith.addf %303, %304 : vector<8x128xf32>
    %cst_82 = arith.constant 0.000000e+00 : f32
    %306 = vector.broadcast %cst_82 : f32 to vector<8x128xf32>
    %307 = arith.maximumf %305, %306 : vector<8x128xf32>
    %308 = arith.truncf %307 : vector<8x128xf32> to vector<8x128xbf16>
    %cst_83 = arith.constant dense<0.000000e+00> : vector<8x128xf32>
    %309 = tpu.matmul %308, %12, %cst_83 {dimension_numbers = #tpu.dot_dimension_numbers<[1], [0], [0], [1], [0, 0, 1, 1], [], []>} : vector<8x128xbf16>, vector<128x128xbf16>, vector<8x128xf32> -> vector<8x128xf32>
    %310 = vector.broadcast %13 : vector<1x128xf32> to vector<8x128xf32>
    %311 = arith.addf %309, %310 : vector<8x128xf32>
    %312 = arith.index_cast %241 : i32 to index
    %c0_84 = arith.constant 0 : index
    %313 = vector.load %arg11[%312, %c0_84] : memref<64x128xf32, #tpu.memory_space<vmem>>, vector<8x128xf32>
    tpu.vector_store %arg11[%312, %c0_84], %311 {strides = array<i32>} : memref<64x128xf32, #tpu.memory_space<vmem>>, vector<8x128xf32>,
    %c4_i32 = arith.constant 4 : i32
    %c8_i32_85 = arith.constant 8 : i32
    %314 = arith.muli %c4_i32, %c8_i32_85 : i32
    %315 = tpu.assume_multiple %314, 8 : i32
    %316 = arith.index_cast %315 : i32 to index
    %c0_86 = arith.constant 0 : index
    %317 = vector.load %arg13[%316, %c0_86] : memref<64x384xf32, #tpu.memory_space<vmem>>, vector<8x384xf32>
    %318 = arith.truncf %271 : vector<8x128xf32> to vector<8x128xbf16>
    %cst_87 = arith.constant dense<0.000000e+00> : vector<8x384xf32>
    %319 = tpu.matmul %318, %7, %cst_87 {dimension_numbers = #tpu.dot_dimension_numbers<[1], [0], [0], [1], [0, 0, 1, 1], [], []>} : vector<8x128xbf16>, vector<128x384xbf16>, vector<8x384xf32> -> vector<8x384xf32>
    %320 = vector.extract_strided_slice %317 {offsets = [0, 0], sizes = [8, 128], strides = [1, 1]} : vector<8x384xf32> to vector<8x128xf32>
    %321 = vector.extract_strided_slice %319 {offsets = [0, 0], sizes = [8, 128], strides = [1, 1]} : vector<8x384xf32> to vector<8x128xf32>
    %322 = arith.addf %320, %321 : vector<8x128xf32>
    %323 = arith.negf %322 : vector<8x128xf32>
    %324 = math.exp %323 : vector<8x128xf32>
    %cst_88 = arith.constant 1.000000e+00 : f32
    %325 = vector.broadcast %cst_88 : f32 to vector<8x128xf32>
    %326 = arith.addf %325, %324 : vector<8x128xf32>
    %327 = arith.divf %325, %326 : vector<8x128xf32>
    %328 = vector.extract_strided_slice %317 {offsets = [0, 128], sizes = [8, 128], strides = [1, 1]} : vector<8x384xf32> to vector<8x128xf32>
    %329 = vector.extract_strided_slice %319 {offsets = [0, 128], sizes = [8, 128], strides = [1, 1]} : vector<8x384xf32> to vector<8x128xf32>
    %330 = arith.addf %328, %329 : vector<8x128xf32>
    %331 = arith.negf %330 : vector<8x128xf32>
    %332 = math.exp %331 : vector<8x128xf32>
    %cst_89 = arith.constant 1.000000e+00 : f32
    %333 = vector.broadcast %cst_89 : f32 to vector<8x128xf32>
    %334 = arith.addf %333, %332 : vector<8x128xf32>
    %335 = arith.divf %333, %334 : vector<8x128xf32>
    %336 = vector.extract_strided_slice %317 {offsets = [0, 256], sizes = [8, 128], strides = [1, 1]} : vector<8x384xf32> to vector<8x128xf32>
    %337 = vector.extract_strided_slice %319 {offsets = [0, 256], sizes = [8, 128], strides = [1, 1]} : vector<8x384xf32> to vector<8x128xf32>
    %338 = arith.mulf %327, %337 : vector<8x128xf32>
    %339 = arith.addf %336, %338 : vector<8x128xf32>
    %340 = math.tanh %339 : vector<8x128xf32>
    %cst_90 = arith.constant 1.000000e+00 : f32
    %341 = vector.broadcast %cst_90 : f32 to vector<8x128xf32>
    %342 = arith.subf %341, %335 : vector<8x128xf32>
    %343 = arith.mulf %342, %340 : vector<8x128xf32>
    %344 = arith.mulf %335, %271 : vector<8x128xf32>
    %345 = arith.addf %343, %344 : vector<8x128xf32>
    %346 = arith.truncf %345 : vector<8x128xf32> to vector<8x128xbf16>
    %cst_91 = arith.constant dense<0.000000e+00> : vector<8x384xf32>
    %347 = tpu.matmul %346, %8, %cst_91 {dimension_numbers = #tpu.dot_dimension_numbers<[1], [0], [0], [1], [0, 0, 1, 1], [], []>} : vector<8x128xbf16>, vector<128x384xbf16>, vector<8x384xf32> -> vector<8x384xf32>
    %348 = arith.truncf %301 : vector<8x128xf32> to vector<8x128xbf16>
    %cst_92 = arith.constant dense<0.000000e+00> : vector<8x384xf32>
    %349 = tpu.matmul %348, %9, %cst_92 {dimension_numbers = #tpu.dot_dimension_numbers<[1], [0], [0], [1], [0, 0, 1, 1], [], []>} : vector<8x128xbf16>, vector<128x384xbf16>, vector<8x384xf32> -> vector<8x384xf32>
    %350 = vector.extract_strided_slice %347 {offsets = [0, 0], sizes = [8, 128], strides = [1, 1]} : vector<8x384xf32> to vector<8x128xf32>
    %351 = vector.extract_strided_slice %349 {offsets = [0, 0], sizes = [8, 128], strides = [1, 1]} : vector<8x384xf32> to vector<8x128xf32>
    %352 = arith.addf %350, %351 : vector<8x128xf32>
    %353 = arith.negf %352 : vector<8x128xf32>
    %354 = math.exp %353 : vector<8x128xf32>
    %cst_93 = arith.constant 1.000000e+00 : f32
    %355 = vector.broadcast %cst_93 : f32 to vector<8x128xf32>
    %356 = arith.addf %355, %354 : vector<8x128xf32>
    %357 = arith.divf %355, %356 : vector<8x128xf32>
    %358 = vector.extract_strided_slice %347 {offsets = [0, 128], sizes = [8, 128], strides = [1, 1]} : vector<8x384xf32> to vector<8x128xf32>
    %359 = vector.extract_strided_slice %349 {offsets = [0, 128], sizes = [8, 128], strides = [1, 1]} : vector<8x384xf32> to vector<8x128xf32>
    %360 = arith.addf %358, %359 : vector<8x128xf32>
    %361 = arith.negf %360 : vector<8x128xf32>
    %362 = math.exp %361 : vector<8x128xf32>
    %cst_94 = arith.constant 1.000000e+00 : f32
    %363 = vector.broadcast %cst_94 : f32 to vector<8x128xf32>
    %364 = arith.addf %363, %362 : vector<8x128xf32>
    %365 = arith.divf %363, %364 : vector<8x128xf32>
    %366 = vector.extract_strided_slice %347 {offsets = [0, 256], sizes = [8, 128], strides = [1, 1]} : vector<8x384xf32> to vector<8x128xf32>
    %367 = vector.extract_strided_slice %349 {offsets = [0, 256], sizes = [8, 128], strides = [1, 1]} : vector<8x384xf32> to vector<8x128xf32>
    %368 = arith.mulf %357, %367 : vector<8x128xf32>
    %369 = arith.addf %366, %368 : vector<8x128xf32>
    %370 = math.tanh %369 : vector<8x128xf32>
    %cst_95 = arith.constant 1.000000e+00 : f32
    %371 = vector.broadcast %cst_95 : f32 to vector<8x128xf32>
    %372 = arith.subf %371, %365 : vector<8x128xf32>
    %373 = arith.mulf %372, %370 : vector<8x128xf32>
    %374 = arith.mulf %365, %301 : vector<8x128xf32>
    %375 = arith.addf %373, %374 : vector<8x128xf32>
    %376 = arith.truncf %375 : vector<8x128xf32> to vector<8x128xbf16>
    %cst_96 = arith.constant dense<0.000000e+00> : vector<8x128xf32>
    %377 = tpu.matmul %376, %10, %cst_96 {dimension_numbers = #tpu.dot_dimension_numbers<[1], [0], [0], [1], [0, 0, 1, 1], [], []>} : vector<8x128xbf16>, vector<128x128xbf16>, vector<8x128xf32> -> vector<8x128xf32>
    %378 = vector.broadcast %11 : vector<1x128xf32> to vector<8x128xf32>
    %379 = arith.addf %377, %378 : vector<8x128xf32>
    %cst_97 = arith.constant 0.000000e+00 : f32
    %380 = vector.broadcast %cst_97 : f32 to vector<8x128xf32>
    %381 = arith.maximumf %379, %380 : vector<8x128xf32>
    %382 = arith.truncf %381 : vector<8x128xf32> to vector<8x128xbf16>
    %cst_98 = arith.constant dense<0.000000e+00> : vector<8x128xf32>
    %383 = tpu.matmul %382, %12, %cst_98 {dimension_numbers = #tpu.dot_dimension_numbers<[1], [0], [0], [1], [0, 0, 1, 1], [], []>} : vector<8x128xbf16>, vector<128x128xbf16>, vector<8x128xf32> -> vector<8x128xf32>
    %384 = vector.broadcast %13 : vector<1x128xf32> to vector<8x128xf32>
    %385 = arith.addf %383, %384 : vector<8x128xf32>
    %386 = arith.index_cast %315 : i32 to index
    %c0_99 = arith.constant 0 : index
    %387 = vector.load %arg11[%386, %c0_99] : memref<64x128xf32, #tpu.memory_space<vmem>>, vector<8x128xf32>
    tpu.vector_store %arg11[%386, %c0_99], %385 {strides = array<i32>} : memref<64x128xf32, #tpu.memory_space<vmem>>, vector<8x128xf32>,
    %c5_i32 = arith.constant 5 : i32
    %c8_i32_100 = arith.constant 8 : i32
    %388 = arith.muli %c5_i32, %c8_i32_100 : i32
    %389 = tpu.assume_multiple %388, 8 : i32
    %390 = arith.index_cast %389 : i32 to index
    %c0_101 = arith.constant 0 : index
    %391 = vector.load %arg13[%390, %c0_101] : memref<64x384xf32, #tpu.memory_space<vmem>>, vector<8x384xf32>
    %392 = arith.truncf %345 : vector<8x128xf32> to vector<8x128xbf16>
    %cst_102 = arith.constant dense<0.000000e+00> : vector<8x384xf32>
    %393 = tpu.matmul %392, %7, %cst_102 {dimension_numbers = #tpu.dot_dimension_numbers<[1], [0], [0], [1], [0, 0, 1, 1], [], []>} : vector<8x128xbf16>, vector<128x384xbf16>, vector<8x384xf32> -> vector<8x384xf32>
    %394 = vector.extract_strided_slice %391 {offsets = [0, 0], sizes = [8, 128], strides = [1, 1]} : vector<8x384xf32> to vector<8x128xf32>
    %395 = vector.extract_strided_slice %393 {offsets = [0, 0], sizes = [8, 128], strides = [1, 1]} : vector<8x384xf32> to vector<8x128xf32>
    %396 = arith.addf %394, %395 : vector<8x128xf32>
    %397 = arith.negf %396 : vector<8x128xf32>
    %398 = math.exp %397 : vector<8x128xf32>
    %cst_103 = arith.constant 1.000000e+00 : f32
    %399 = vector.broadcast %cst_103 : f32 to vector<8x128xf32>
    %400 = arith.addf %399, %398 : vector<8x128xf32>
    %401 = arith.divf %399, %400 : vector<8x128xf32>
    %402 = vector.extract_strided_slice %391 {offsets = [0, 128], sizes = [8, 128], strides = [1, 1]} : vector<8x384xf32> to vector<8x128xf32>
    %403 = vector.extract_strided_slice %393 {offsets = [0, 128], sizes = [8, 128], strides = [1, 1]} : vector<8x384xf32> to vector<8x128xf32>
    %404 = arith.addf %402, %403 : vector<8x128xf32>
    %405 = arith.negf %404 : vector<8x128xf32>
    %406 = math.exp %405 : vector<8x128xf32>
    %cst_104 = arith.constant 1.000000e+00 : f32
    %407 = vector.broadcast %cst_104 : f32 to vector<8x128xf32>
    %408 = arith.addf %407, %406 : vector<8x128xf32>
    %409 = arith.divf %407, %408 : vector<8x128xf32>
    %410 = vector.extract_strided_slice %391 {offsets = [0, 256], sizes = [8, 128], strides = [1, 1]} : vector<8x384xf32> to vector<8x128xf32>
    %411 = vector.extract_strided_slice %393 {offsets = [0, 256], sizes = [8, 128], strides = [1, 1]} : vector<8x384xf32> to vector<8x128xf32>
    %412 = arith.mulf %401, %411 : vector<8x128xf32>
    %413 = arith.addf %410, %412 : vector<8x128xf32>
    %414 = math.tanh %413 : vector<8x128xf32>
    %cst_105 = arith.constant 1.000000e+00 : f32
    %415 = vector.broadcast %cst_105 : f32 to vector<8x128xf32>
    %416 = arith.subf %415, %409 : vector<8x128xf32>
    %417 = arith.mulf %416, %414 : vector<8x128xf32>
    %418 = arith.mulf %409, %345 : vector<8x128xf32>
    %419 = arith.addf %417, %418 : vector<8x128xf32>
    %420 = arith.truncf %419 : vector<8x128xf32> to vector<8x128xbf16>
    %cst_106 = arith.constant dense<0.000000e+00> : vector<8x384xf32>
    %421 = tpu.matmul %420, %8, %cst_106 {dimension_numbers = #tpu.dot_dimension_numbers<[1], [0], [0], [1], [0, 0, 1, 1], [], []>} : vector<8x128xbf16>, vector<128x384xbf16>, vector<8x384xf32> -> vector<8x384xf32>
    %422 = arith.truncf %375 : vector<8x128xf32> to vector<8x128xbf16>
    %cst_107 = arith.constant dense<0.000000e+00> : vector<8x384xf32>
    %423 = tpu.matmul %422, %9, %cst_107 {dimension_numbers = #tpu.dot_dimension_numbers<[1], [0], [0], [1], [0, 0, 1, 1], [], []>} : vector<8x128xbf16>, vector<128x384xbf16>, vector<8x384xf32> -> vector<8x384xf32>
    %424 = vector.extract_strided_slice %421 {offsets = [0, 0], sizes = [8, 128], strides = [1, 1]} : vector<8x384xf32> to vector<8x128xf32>
    %425 = vector.extract_strided_slice %423 {offsets = [0, 0], sizes = [8, 128], strides = [1, 1]} : vector<8x384xf32> to vector<8x128xf32>
    %426 = arith.addf %424, %425 : vector<8x128xf32>
    %427 = arith.negf %426 : vector<8x128xf32>
    %428 = math.exp %427 : vector<8x128xf32>
    %cst_108 = arith.constant 1.000000e+00 : f32
    %429 = vector.broadcast %cst_108 : f32 to vector<8x128xf32>
    %430 = arith.addf %429, %428 : vector<8x128xf32>
    %431 = arith.divf %429, %430 : vector<8x128xf32>
    %432 = vector.extract_strided_slice %421 {offsets = [0, 128], sizes = [8, 128], strides = [1, 1]} : vector<8x384xf32> to vector<8x128xf32>
    %433 = vector.extract_strided_slice %423 {offsets = [0, 128], sizes = [8, 128], strides = [1, 1]} : vector<8x384xf32> to vector<8x128xf32>
    %434 = arith.addf %432, %433 : vector<8x128xf32>
    %435 = arith.negf %434 : vector<8x128xf32>
    %436 = math.exp %435 : vector<8x128xf32>
    %cst_109 = arith.constant 1.000000e+00 : f32
    %437 = vector.broadcast %cst_109 : f32 to vector<8x128xf32>
    %438 = arith.addf %437, %436 : vector<8x128xf32>
    %439 = arith.divf %437, %438 : vector<8x128xf32>
    %440 = vector.extract_strided_slice %421 {offsets = [0, 256], sizes = [8, 128], strides = [1, 1]} : vector<8x384xf32> to vector<8x128xf32>
    %441 = vector.extract_strided_slice %423 {offsets = [0, 256], sizes = [8, 128], strides = [1, 1]} : vector<8x384xf32> to vector<8x128xf32>
    %442 = arith.mulf %431, %441 : vector<8x128xf32>
    %443 = arith.addf %440, %442 : vector<8x128xf32>
    %444 = math.tanh %443 : vector<8x128xf32>
    %cst_110 = arith.constant 1.000000e+00 : f32
    %445 = vector.broadcast %cst_110 : f32 to vector<8x128xf32>
    %446 = arith.subf %445, %439 : vector<8x128xf32>
    %447 = arith.mulf %446, %444 : vector<8x128xf32>
    %448 = arith.mulf %439, %375 : vector<8x128xf32>
    %449 = arith.addf %447, %448 : vector<8x128xf32>
    %450 = arith.truncf %449 : vector<8x128xf32> to vector<8x128xbf16>
    %cst_111 = arith.constant dense<0.000000e+00> : vector<8x128xf32>
    %451 = tpu.matmul %450, %10, %cst_111 {dimension_numbers = #tpu.dot_dimension_numbers<[1], [0], [0], [1], [0, 0, 1, 1], [], []>} : vector<8x128xbf16>, vector<128x128xbf16>, vector<8x128xf32> -> vector<8x128xf32>
    %452 = vector.broadcast %11 : vector<1x128xf32> to vector<8x128xf32>
    %453 = arith.addf %451, %452 : vector<8x128xf32>
    %cst_112 = arith.constant 0.000000e+00 : f32
    %454 = vector.broadcast %cst_112 : f32 to vector<8x128xf32>
    %455 = arith.maximumf %453, %454 : vector<8x128xf32>
    %456 = arith.truncf %455 : vector<8x128xf32> to vector<8x128xbf16>
    %cst_113 = arith.constant dense<0.000000e+00> : vector<8x128xf32>
    %457 = tpu.matmul %456, %12, %cst_113 {dimension_numbers = #tpu.dot_dimension_numbers<[1], [0], [0], [1], [0, 0, 1, 1], [], []>} : vector<8x128xbf16>, vector<128x128xbf16>, vector<8x128xf32> -> vector<8x128xf32>
    %458 = vector.broadcast %13 : vector<1x128xf32> to vector<8x128xf32>
    %459 = arith.addf %457, %458 : vector<8x128xf32>
    %460 = arith.index_cast %389 : i32 to index
    %c0_114 = arith.constant 0 : index
    %461 = vector.load %arg11[%460, %c0_114] : memref<64x128xf32, #tpu.memory_space<vmem>>, vector<8x128xf32>
    tpu.vector_store %arg11[%460, %c0_114], %459 {strides = array<i32>} : memref<64x128xf32, #tpu.memory_space<vmem>>, vector<8x128xf32>,
    %c6_i32 = arith.constant 6 : i32
    %c8_i32_115 = arith.constant 8 : i32
    %462 = arith.muli %c6_i32, %c8_i32_115 : i32
    %463 = tpu.assume_multiple %462, 8 : i32
    %464 = arith.index_cast %463 : i32 to index
    %c0_116 = arith.constant 0 : index
    %465 = vector.load %arg13[%464, %c0_116] : memref<64x384xf32, #tpu.memory_space<vmem>>, vector<8x384xf32>
    %466 = arith.truncf %419 : vector<8x128xf32> to vector<8x128xbf16>
    %cst_117 = arith.constant dense<0.000000e+00> : vector<8x384xf32>
    %467 = tpu.matmul %466, %7, %cst_117 {dimension_numbers = #tpu.dot_dimension_numbers<[1], [0], [0], [1], [0, 0, 1, 1], [], []>} : vector<8x128xbf16>, vector<128x384xbf16>, vector<8x384xf32> -> vector<8x384xf32>
    %468 = vector.extract_strided_slice %465 {offsets = [0, 0], sizes = [8, 128], strides = [1, 1]} : vector<8x384xf32> to vector<8x128xf32>
    %469 = vector.extract_strided_slice %467 {offsets = [0, 0], sizes = [8, 128], strides = [1, 1]} : vector<8x384xf32> to vector<8x128xf32>
    %470 = arith.addf %468, %469 : vector<8x128xf32>
    %471 = arith.negf %470 : vector<8x128xf32>
    %472 = math.exp %471 : vector<8x128xf32>
    %cst_118 = arith.constant 1.000000e+00 : f32
    %473 = vector.broadcast %cst_118 : f32 to vector<8x128xf32>
    %474 = arith.addf %473, %472 : vector<8x128xf32>
    %475 = arith.divf %473, %474 : vector<8x128xf32>
    %476 = vector.extract_strided_slice %465 {offsets = [0, 128], sizes = [8, 128], strides = [1, 1]} : vector<8x384xf32> to vector<8x128xf32>
    %477 = vector.extract_strided_slice %467 {offsets = [0, 128], sizes = [8, 128], strides = [1, 1]} : vector<8x384xf32> to vector<8x128xf32>
    %478 = arith.addf %476, %477 : vector<8x128xf32>
    %479 = arith.negf %478 : vector<8x128xf32>
    %480 = math.exp %479 : vector<8x128xf32>
    %cst_119 = arith.constant 1.000000e+00 : f32
    %481 = vector.broadcast %cst_119 : f32 to vector<8x128xf32>
    %482 = arith.addf %481, %480 : vector<8x128xf32>
    %483 = arith.divf %481, %482 : vector<8x128xf32>
    %484 = vector.extract_strided_slice %465 {offsets = [0, 256], sizes = [8, 128], strides = [1, 1]} : vector<8x384xf32> to vector<8x128xf32>
    %485 = vector.extract_strided_slice %467 {offsets = [0, 256], sizes = [8, 128], strides = [1, 1]} : vector<8x384xf32> to vector<8x128xf32>
    %486 = arith.mulf %475, %485 : vector<8x128xf32>
    %487 = arith.addf %484, %486 : vector<8x128xf32>
    %488 = math.tanh %487 : vector<8x128xf32>
    %cst_120 = arith.constant 1.000000e+00 : f32
    %489 = vector.broadcast %cst_120 : f32 to vector<8x128xf32>
    %490 = arith.subf %489, %483 : vector<8x128xf32>
    %491 = arith.mulf %490, %488 : vector<8x128xf32>
    %492 = arith.mulf %483, %419 : vector<8x128xf32>
    %493 = arith.addf %491, %492 : vector<8x128xf32>
    %494 = arith.truncf %493 : vector<8x128xf32> to vector<8x128xbf16>
    %cst_121 = arith.constant dense<0.000000e+00> : vector<8x384xf32>
    %495 = tpu.matmul %494, %8, %cst_121 {dimension_numbers = #tpu.dot_dimension_numbers<[1], [0], [0], [1], [0, 0, 1, 1], [], []>} : vector<8x128xbf16>, vector<128x384xbf16>, vector<8x384xf32> -> vector<8x384xf32>
    %496 = arith.truncf %449 : vector<8x128xf32> to vector<8x128xbf16>
    %cst_122 = arith.constant dense<0.000000e+00> : vector<8x384xf32>
    %497 = tpu.matmul %496, %9, %cst_122 {dimension_numbers = #tpu.dot_dimension_numbers<[1], [0], [0], [1], [0, 0, 1, 1], [], []>} : vector<8x128xbf16>, vector<128x384xbf16>, vector<8x384xf32> -> vector<8x384xf32>
    %498 = vector.extract_strided_slice %495 {offsets = [0, 0], sizes = [8, 128], strides = [1, 1]} : vector<8x384xf32> to vector<8x128xf32>
    %499 = vector.extract_strided_slice %497 {offsets = [0, 0], sizes = [8, 128], strides = [1, 1]} : vector<8x384xf32> to vector<8x128xf32>
    %500 = arith.addf %498, %499 : vector<8x128xf32>
    %501 = arith.negf %500 : vector<8x128xf32>
    %502 = math.exp %501 : vector<8x128xf32>
    %cst_123 = arith.constant 1.000000e+00 : f32
    %503 = vector.broadcast %cst_123 : f32 to vector<8x128xf32>
    %504 = arith.addf %503, %502 : vector<8x128xf32>
    %505 = arith.divf %503, %504 : vector<8x128xf32>
    %506 = vector.extract_strided_slice %495 {offsets = [0, 128], sizes = [8, 128], strides = [1, 1]} : vector<8x384xf32> to vector<8x128xf32>
    %507 = vector.extract_strided_slice %497 {offsets = [0, 128], sizes = [8, 128], strides = [1, 1]} : vector<8x384xf32> to vector<8x128xf32>
    %508 = arith.addf %506, %507 : vector<8x128xf32>
    %509 = arith.negf %508 : vector<8x128xf32>
    %510 = math.exp %509 : vector<8x128xf32>
    %cst_124 = arith.constant 1.000000e+00 : f32
    %511 = vector.broadcast %cst_124 : f32 to vector<8x128xf32>
    %512 = arith.addf %511, %510 : vector<8x128xf32>
    %513 = arith.divf %511, %512 : vector<8x128xf32>
    %514 = vector.extract_strided_slice %495 {offsets = [0, 256], sizes = [8, 128], strides = [1, 1]} : vector<8x384xf32> to vector<8x128xf32>
    %515 = vector.extract_strided_slice %497 {offsets = [0, 256], sizes = [8, 128], strides = [1, 1]} : vector<8x384xf32> to vector<8x128xf32>
    %516 = arith.mulf %505, %515 : vector<8x128xf32>
    %517 = arith.addf %514, %516 : vector<8x128xf32>
    %518 = math.tanh %517 : vector<8x128xf32>
    %cst_125 = arith.constant 1.000000e+00 : f32
    %519 = vector.broadcast %cst_125 : f32 to vector<8x128xf32>
    %520 = arith.subf %519, %513 : vector<8x128xf32>
    %521 = arith.mulf %520, %518 : vector<8x128xf32>
    %522 = arith.mulf %513, %449 : vector<8x128xf32>
    %523 = arith.addf %521, %522 : vector<8x128xf32>
    %524 = arith.truncf %523 : vector<8x128xf32> to vector<8x128xbf16>
    %cst_126 = arith.constant dense<0.000000e+00> : vector<8x128xf32>
    %525 = tpu.matmul %524, %10, %cst_126 {dimension_numbers = #tpu.dot_dimension_numbers<[1], [0], [0], [1], [0, 0, 1, 1], [], []>} : vector<8x128xbf16>, vector<128x128xbf16>, vector<8x128xf32> -> vector<8x128xf32>
    %526 = vector.broadcast %11 : vector<1x128xf32> to vector<8x128xf32>
    %527 = arith.addf %525, %526 : vector<8x128xf32>
    %cst_127 = arith.constant 0.000000e+00 : f32
    %528 = vector.broadcast %cst_127 : f32 to vector<8x128xf32>
    %529 = arith.maximumf %527, %528 : vector<8x128xf32>
    %530 = arith.truncf %529 : vector<8x128xf32> to vector<8x128xbf16>
    %cst_128 = arith.constant dense<0.000000e+00> : vector<8x128xf32>
    %531 = tpu.matmul %530, %12, %cst_128 {dimension_numbers = #tpu.dot_dimension_numbers<[1], [0], [0], [1], [0, 0, 1, 1], [], []>} : vector<8x128xbf16>, vector<128x128xbf16>, vector<8x128xf32> -> vector<8x128xf32>
    %532 = vector.broadcast %13 : vector<1x128xf32> to vector<8x128xf32>
    %533 = arith.addf %531, %532 : vector<8x128xf32>
    %534 = arith.index_cast %463 : i32 to index
    %c0_129 = arith.constant 0 : index
    %535 = vector.load %arg11[%534, %c0_129] : memref<64x128xf32, #tpu.memory_space<vmem>>, vector<8x128xf32>
    tpu.vector_store %arg11[%534, %c0_129], %533 {strides = array<i32>} : memref<64x128xf32, #tpu.memory_space<vmem>>, vector<8x128xf32>,
    %c7_i32 = arith.constant 7 : i32
    %c8_i32_130 = arith.constant 8 : i32
    %536 = arith.muli %c7_i32, %c8_i32_130 : i32
    %537 = tpu.assume_multiple %536, 8 : i32
    %538 = arith.index_cast %537 : i32 to index
    %c0_131 = arith.constant 0 : index
    %539 = vector.load %arg13[%538, %c0_131] : memref<64x384xf32, #tpu.memory_space<vmem>>, vector<8x384xf32>
    %540 = arith.truncf %493 : vector<8x128xf32> to vector<8x128xbf16>
    %cst_132 = arith.constant dense<0.000000e+00> : vector<8x384xf32>
    %541 = tpu.matmul %540, %7, %cst_132 {dimension_numbers = #tpu.dot_dimension_numbers<[1], [0], [0], [1], [0, 0, 1, 1], [], []>} : vector<8x128xbf16>, vector<128x384xbf16>, vector<8x384xf32> -> vector<8x384xf32>
    %542 = vector.extract_strided_slice %539 {offsets = [0, 0], sizes = [8, 128], strides = [1, 1]} : vector<8x384xf32> to vector<8x128xf32>
    %543 = vector.extract_strided_slice %541 {offsets = [0, 0], sizes = [8, 128], strides = [1, 1]} : vector<8x384xf32> to vector<8x128xf32>
    %544 = arith.addf %542, %543 : vector<8x128xf32>
    %545 = arith.negf %544 : vector<8x128xf32>
    %546 = math.exp %545 : vector<8x128xf32>
    %cst_133 = arith.constant 1.000000e+00 : f32
    %547 = vector.broadcast %cst_133 : f32 to vector<8x128xf32>
    %548 = arith.addf %547, %546 : vector<8x128xf32>
    %549 = arith.divf %547, %548 : vector<8x128xf32>
    %550 = vector.extract_strided_slice %539 {offsets = [0, 128], sizes = [8, 128], strides = [1, 1]} : vector<8x384xf32> to vector<8x128xf32>
    %551 = vector.extract_strided_slice %541 {offsets = [0, 128], sizes = [8, 128], strides = [1, 1]} : vector<8x384xf32> to vector<8x128xf32>
    %552 = arith.addf %550, %551 : vector<8x128xf32>
    %553 = arith.negf %552 : vector<8x128xf32>
    %554 = math.exp %553 : vector<8x128xf32>
    %cst_134 = arith.constant 1.000000e+00 : f32
    %555 = vector.broadcast %cst_134 : f32 to vector<8x128xf32>
    %556 = arith.addf %555, %554 : vector<8x128xf32>
    %557 = arith.divf %555, %556 : vector<8x128xf32>
    %558 = vector.extract_strided_slice %539 {offsets = [0, 256], sizes = [8, 128], strides = [1, 1]} : vector<8x384xf32> to vector<8x128xf32>
    %559 = vector.extract_strided_slice %541 {offsets = [0, 256], sizes = [8, 128], strides = [1, 1]} : vector<8x384xf32> to vector<8x128xf32>
    %560 = arith.mulf %549, %559 : vector<8x128xf32>
    %561 = arith.addf %558, %560 : vector<8x128xf32>
    %562 = math.tanh %561 : vector<8x128xf32>
    %cst_135 = arith.constant 1.000000e+00 : f32
    %563 = vector.broadcast %cst_135 : f32 to vector<8x128xf32>
    %564 = arith.subf %563, %557 : vector<8x128xf32>
    %565 = arith.mulf %564, %562 : vector<8x128xf32>
    %566 = arith.mulf %557, %493 : vector<8x128xf32>
    %567 = arith.addf %565, %566 : vector<8x128xf32>
    %568 = arith.truncf %567 : vector<8x128xf32> to vector<8x128xbf16>
    %cst_136 = arith.constant dense<0.000000e+00> : vector<8x384xf32>
    %569 = tpu.matmul %568, %8, %cst_136 {dimension_numbers = #tpu.dot_dimension_numbers<[1], [0], [0], [1], [0, 0, 1, 1], [], []>} : vector<8x128xbf16>, vector<128x384xbf16>, vector<8x384xf32> -> vector<8x384xf32>
    %570 = arith.truncf %523 : vector<8x128xf32> to vector<8x128xbf16>
    %cst_137 = arith.constant dense<0.000000e+00> : vector<8x384xf32>
    %571 = tpu.matmul %570, %9, %cst_137 {dimension_numbers = #tpu.dot_dimension_numbers<[1], [0], [0], [1], [0, 0, 1, 1], [], []>} : vector<8x128xbf16>, vector<128x384xbf16>, vector<8x384xf32> -> vector<8x384xf32>
    %572 = vector.extract_strided_slice %569 {offsets = [0, 0], sizes = [8, 128], strides = [1, 1]} : vector<8x384xf32> to vector<8x128xf32>
    %573 = vector.extract_strided_slice %571 {offsets = [0, 0], sizes = [8, 128], strides = [1, 1]} : vector<8x384xf32> to vector<8x128xf32>
    %574 = arith.addf %572, %573 : vector<8x128xf32>
    %575 = arith.negf %574 : vector<8x128xf32>
    %576 = math.exp %575 : vector<8x128xf32>
    %cst_138 = arith.constant 1.000000e+00 : f32
    %577 = vector.broadcast %cst_138 : f32 to vector<8x128xf32>
    %578 = arith.addf %577, %576 : vector<8x128xf32>
    %579 = arith.divf %577, %578 : vector<8x128xf32>
    %580 = vector.extract_strided_slice %569 {offsets = [0, 128], sizes = [8, 128], strides = [1, 1]} : vector<8x384xf32> to vector<8x128xf32>
    %581 = vector.extract_strided_slice %571 {offsets = [0, 128], sizes = [8, 128], strides = [1, 1]} : vector<8x384xf32> to vector<8x128xf32>
    %582 = arith.addf %580, %581 : vector<8x128xf32>
    %583 = arith.negf %582 : vector<8x128xf32>
    %584 = math.exp %583 : vector<8x128xf32>
    %cst_139 = arith.constant 1.000000e+00 : f32
    %585 = vector.broadcast %cst_139 : f32 to vector<8x128xf32>
    %586 = arith.addf %585, %584 : vector<8x128xf32>
    %587 = arith.divf %585, %586 : vector<8x128xf32>
    %588 = vector.extract_strided_slice %569 {offsets = [0, 256], sizes = [8, 128], strides = [1, 1]} : vector<8x384xf32> to vector<8x128xf32>
    %589 = vector.extract_strided_slice %571 {offsets = [0, 256], sizes = [8, 128], strides = [1, 1]} : vector<8x384xf32> to vector<8x128xf32>
    %590 = arith.mulf %579, %589 : vector<8x128xf32>
    %591 = arith.addf %588, %590 : vector<8x128xf32>
    %592 = math.tanh %591 : vector<8x128xf32>
    %cst_140 = arith.constant 1.000000e+00 : f32
    %593 = vector.broadcast %cst_140 : f32 to vector<8x128xf32>
    %594 = arith.subf %593, %587 : vector<8x128xf32>
    %595 = arith.mulf %594, %592 : vector<8x128xf32>
    %596 = arith.mulf %587, %523 : vector<8x128xf32>
    %597 = arith.addf %595, %596 : vector<8x128xf32>
    %598 = arith.truncf %597 : vector<8x128xf32> to vector<8x128xbf16>
    %cst_141 = arith.constant dense<0.000000e+00> : vector<8x128xf32>
    %599 = tpu.matmul %598, %10, %cst_141 {dimension_numbers = #tpu.dot_dimension_numbers<[1], [0], [0], [1], [0, 0, 1, 1], [], []>} : vector<8x128xbf16>, vector<128x128xbf16>, vector<8x128xf32> -> vector<8x128xf32>
    %600 = vector.broadcast %11 : vector<1x128xf32> to vector<8x128xf32>
    %601 = arith.addf %599, %600 : vector<8x128xf32>
    %cst_142 = arith.constant 0.000000e+00 : f32
    %602 = vector.broadcast %cst_142 : f32 to vector<8x128xf32>
    %603 = arith.maximumf %601, %602 : vector<8x128xf32>
    %604 = arith.truncf %603 : vector<8x128xf32> to vector<8x128xbf16>
    %cst_143 = arith.constant dense<0.000000e+00> : vector<8x128xf32>
    %605 = tpu.matmul %604, %12, %cst_143 {dimension_numbers = #tpu.dot_dimension_numbers<[1], [0], [0], [1], [0, 0, 1, 1], [], []>} : vector<8x128xbf16>, vector<128x128xbf16>, vector<8x128xf32> -> vector<8x128xf32>
    %606 = vector.broadcast %13 : vector<1x128xf32> to vector<8x128xf32>
    %607 = arith.addf %605, %606 : vector<8x128xf32>
    %608 = arith.index_cast %537 : i32 to index
    %c0_144 = arith.constant 0 : index
    %609 = vector.load %arg11[%608, %c0_144] : memref<64x128xf32, #tpu.memory_space<vmem>>, vector<8x128xf32>
    tpu.vector_store %arg11[%608, %c0_144], %607 {strides = array<i32>} : memref<64x128xf32, #tpu.memory_space<vmem>>, vector<8x128xf32>,
    %c8_i32_145 = arith.constant 8 : i32
    %c0_146 = arith.constant 0 : index
    %c0_147 = arith.constant 0 : index
    %c0_148 = arith.constant 0 : index
    %610 = vector.load %arg12[%c0_146, %c0_147, %c0_148] : memref<2x8x128xf32, #tpu.memory_space<vmem>>, vector<1x8x128xf32>
    %611 = vector.shape_cast %610 : vector<1x8x128xf32> to vector<8x128xf32>
    %612 = vector.shape_cast %567 : vector<8x128xf32> to vector<1x8x128xf32>
    tpu.vector_store %arg12[%c0_146, %c0_147, %c0_148], %612 {strides = array<i32>} : memref<2x8x128xf32, #tpu.memory_space<vmem>>, vector<1x8x128xf32>,
    %c1_149 = arith.constant 1 : index
    %c0_150 = arith.constant 0 : index
    %c0_151 = arith.constant 0 : index
    %613 = vector.load %arg12[%c1_149, %c0_150, %c0_151] : memref<2x8x128xf32, #tpu.memory_space<vmem>>, vector<1x8x128xf32>
    %614 = vector.shape_cast %613 : vector<1x8x128xf32> to vector<8x128xf32>
    %615 = vector.shape_cast %597 : vector<8x128xf32> to vector<1x8x128xf32>
    tpu.vector_store %arg12[%c1_149, %c0_150, %c0_151], %615 {strides = array<i32>} : memref<2x8x128xf32, #tpu.memory_space<vmem>>, vector<1x8x128xf32>,
    return
  }
  func.func @transform_0(%arg0: i32) -> (i32, i32) {
    %c0_i32 = arith.constant 0 : i32
    %c0_i32_0 = arith.constant 0 : i32
    return %arg0, %c0_i32 : i32, i32
  }
  func.func @transform_1(%arg0: i32) -> (i32, i32, i32) {
    %c0_i32 = arith.constant 0 : i32
    %c0_i32_0 = arith.constant 0 : i32
    %c0_i32_1 = arith.constant 0 : i32
    %c0_i32_2 = arith.constant 0 : i32
    return %c0_i32, %c0_i32_0, %c0_i32_1 : i32, i32, i32
  }
  func.func @transform_2(%arg0: i32) -> (i32, i32) {
    %c0_i32 = arith.constant 0 : i32
    %c0_i32_0 = arith.constant 0 : i32
    %c0_i32_1 = arith.constant 0 : i32
    return %c0_i32, %c0_i32_0 : i32, i32
  }
  func.func @transform_3(%arg0: i32) -> (i32, i32) {
    %c0_i32 = arith.constant 0 : i32
    %c0_i32_0 = arith.constant 0 : i32
    %c0_i32_1 = arith.constant 0 : i32
    return %c0_i32, %c0_i32_0 : i32, i32
  }
  func.func @transform_4(%arg0: i32) -> (i32, i32) {
    %c0_i32 = arith.constant 0 : i32
    %c0_i32_0 = arith.constant 0 : i32
    %c0_i32_1 = arith.constant 0 : i32
    return %c0_i32, %c0_i32_0 : i32, i32
  }
  func.func @transform_5(%arg0: i32) -> (i32, i32) {
    %c0_i32 = arith.constant 0 : i32
    %c0_i32_0 = arith.constant 0 : i32
    %c0_i32_1 = arith.constant 0 : i32
    return %c0_i32, %c0_i32_0 : i32, i32
  }
  func.func @transform_6(%arg0: i32) -> (i32, i32) {
    %c0_i32 = arith.constant 0 : i32
    %c0_i32_0 = arith.constant 0 : i32
    %c0_i32_1 = arith.constant 0 : i32
    return %c0_i32, %c0_i32_0 : i32, i32
  }
  func.func @transform_7(%arg0: i32) -> (i32, i32) {
    %c0_i32 = arith.constant 0 : i32
    %c0_i32_0 = arith.constant 0 : i32
    %c0_i32_1 = arith.constant 0 : i32
    return %c0_i32, %c0_i32_0 : i32, i32
  }
  func.func @transform_8(%arg0: i32) -> (i32, i32) {
    %c0_i32 = arith.constant 0 : i32
    %c0_i32_0 = arith.constant 0 : i32
    %c0_i32_1 = arith.constant 0 : i32
    return %c0_i32, %c0_i32_0 : i32, i32
  }
  func.func @transform_9(%arg0: i32) -> (i32, i32) {
    %c0_i32 = arith.constant 0 : i32
    %c0_i32_0 = arith.constant 0 : i32
    %c0_i32_1 = arith.constant 0 : i32
    return %c0_i32, %c0_i32_0 : i32, i32
  }
  func.func @transform_10(%arg0: i32) -> (i32, i32) {
    %c0_i32 = arith.constant 0 : i32
    %c0_i32_0 = arith.constant 0 : i32
    return %arg0, %c0_i32 : i32, i32
  }
  func.func @transform_11(%arg0: i32) -> (i32, i32, i32) {
    %c0_i32 = arith.constant 0 : i32
    %c0_i32_0 = arith.constant 0 : i32
    %c0_i32_1 = arith.constant 0 : i32
    %c0_i32_2 = arith.constant 0 : i32
    return %c0_i32, %c0_i32_0, %c0_i32_1 : i32, i32, i32
  }
}

</mosaic_0001>

<bundles_post_ra>
// kernel: langmod_forward.1
= control target key start
LH: loop header
LB: loop body
LE: loop exit
PB: predicated region body
PF: predicated region fallthrough
CT: control target
= control target key end

     0   :  { %v8602_v1 = vmov 0   ;;  %vm94_vm0 = vcmask 130048   ;;  %v8604_v17 = vmov 0.0   ;;  %vm5746_vm1 = vmmov 0   ;;  %s8590_s2 = inlined_call_operand.vmem [shape: bf16[16,384], index: 2, kind: input, shape index: {}]   ;;  %s8591_s0 = inlined_call_operand.vmem [shape: bf16[64,16], index: 0, kind: input, shape index: {}]   ;;  %s8592_s3 = inlined_call_operand.vmem [shape: bf16[128,384], index: 3, kind: input, shape index: {}]   ;;  %s8593_s1 = inlined_call_operand.vmem [shape: f32[2,8,128], index: 1, kind: input, shape index: {}]   ;;  %s8594_s4 = inlined_call_operand.vmem [shape: bf16[128,384], index: 4, kind: input, shape index: {}]   ;;  %s8595_s5 = inlined_call_operand.vmem [shape: bf16[128,384], index: 5, kind: input, shape index: {}]   ;;  %s8596_s6 = inlined_call_operand.vmem [shape: bf16[128,128], index: 6, kind: input, shape index: {}]   ;;  %s8597_s8 = inlined_call_operand.vmem [shape: bf16[128,128], index: 8, kind: input, shape index: {}]   ;;  %s8598_s7 = inlined_call_operand.vmem [shape: f32[1,128], index: 7, kind: input, shape index: {}]   ;;  %s8599_s9 = inlined_call_operand.vmem [shape: f32[1,128], index: 9, kind: input, shape index: {}]   ;;  %s8600_s10 = inlined_call_operand.vmem [shape: f32[64,128], index: 10, kind: output, shape index: {0}]   ;;  %s8601_s11 = inlined_call_operand.vmem [shape: f32[2,8,128], index: 11, kind: output, shape index: {1}]  }
   0x1   :  { %v5284_v0 = vld [vmem:[%s8590_s2 + $0x4] ss:$12 sps:$4 sm:$0xff]   ;;  %139 = vmatprep.mubr.bf16.mxu0 %v8602_v1  ;;  %v5286_v2 = vld [vmem:[%s8590_s2] ss:$12 sps:$4 sm:$0xff]   ;;  %v5830_v6 = vld [vmem:[%s8592_s3 + $0x1c] ss:$12 sps:$4 sm:$0xff]  }
   0x2   :  { %107 = vmatprep.subr.bf16.mxu0 %v5284_v0  ;;  %v5287_v3 = vld [vmem:[%s8591_s0] sm:$0xff]   ;;  %v5294_v9 = vld [vmem:[%s8591_s0 + $0x8] sm:$0xff]   ;;  %v5855_v10 = vld [vmem:[%s8592_s3 + $0x30] ss:$12 sps:$4 sm:$0xff]  }
   0x3   :  { %108 = vmatpush1.bf16.msra.mxu0 %v5286_v2  ;;  %v5820_v4 = vld [vmem:[%s8592_s3 + $0x4] ss:$12 sps:$4 sm:$0xff]   ;;  %v5825_v5 = vld [vmem:[%s8592_s3] ss:$12 sps:$4 sm:$0xff]   ;;  %4441 = vmatprep.mubr.msk.bf16.mxu1 %vm94_vm0, %v5287_v3  ;;  %v5308_v12 = vld [vmem:[%s8590_s2 + $0x8] ss:$12 sps:$4 sm:$0xff]  }
   0x4   :  { %537 = vmatprep.subr.bf16.mxu0 %v5820_v4  ;;  %v5839_v7 = vld [vmem:[%s8592_s3 + $0x18] ss:$12 sps:$4 sm:$0xff]   ;;  %v5846_v8 = vld [vmem:[%s8592_s3 + $0x34] ss:$12 sps:$4 sm:$0xff]   ;;  %4439 = vmatprep.subr.bf16.mxu1 %v5308_v12  ;;  %v5899_v19 = vld [vmem:[%s8592_s3 + $0x7c] ss:$12 sps:$4 sm:$0xff]  }
   0x5   :  { %v5861_v11 = vld [vmem:[%s8592_s3 + $0x4c] ss:$12 sps:$4 sm:$0xff]   ;;  %v5871_v13 = vld [vmem:[%s8592_s3 + $0x48] ss:$12 sps:$4 sm:$0xff]   ;;  %v5878_v14 = vld [vmem:[%s8592_s3 + $0x64] ss:$12 sps:$4 sm:$0xff]   ;;  %4440 = vmatpush3.bf16.msra.mxu1 %v5308_v12 }
   0x6   :  { %3935 = vmatmul.mubr.msk.bf16.vlgmr.msra.gmra.mrb[0].mxu0 %vm94_vm0, %v5287_v3  ;;  %v5883_v15 = vld [vmem:[%s8592_s3 + $0x8] ss:$12 sps:$4 sm:$0xff]   ;;  %4449 = vmatprep.subr.bf16.mxu1 %v8604_v17  ;;  %v5893_v18 = vld [vmem:[%s8592_s3 + $0x60] ss:$12 sps:$4 sm:$0xff]   ;;  %v5915_v21 = vld [vmem:[%s8592_s3 + $0x78] ss:$12 sps:$4 sm:$0xff]  }
   0x7   :  { %538 = vmatpush1.bf16.msra.mxu0 %v5825_v5  ;;  %149 = vmatprep.mubr.bf16.mxu0 %v8602_v1  ;;  %v5301_v16 = vld [vmem:[%s8591_s0 + $0x10] sm:$0xff]   ;;  %v5906_v20 = vld [vmem:[%s8592_s3 + $0x20] ss:$12 sps:$4 sm:$0xff]   ;;  %v5928_v23 = vld [vmem:[%s8592_s3 + $0x38] ss:$12 sps:$4 sm:$0xff]  }
   0x8   :  { %539 = vmatprep.subr.bf16.mxu0 %v5830_v6  ;;  %4442 = vmatmul.mubr.msk.bf16.vlgmr.msra.gmra.mrb[0].mxu1 %vm94_vm0, %v5294_v9  ;;  %v5922_v22 = vld [vmem:[%s8592_s3 + $0x94] ss:$12 sps:$4 sm:$0xff]   ;;  %v5309_v24 = vld [vmem:[%s8591_s0 + $0x18] sm:$0xff]   ;;  %v6009_v35 = vld [vmem:[%s8594_s4 + $0x4] ss:$12 sps:$4 sm:$0xff]  }
   0x9   :  { %4450 = vmatpush3.bf16.msra.mxu1 %v5883_v15  ;;  %4445 = vmatprep.mubr.msk.bf16.mxu1 %vm94_vm0, %v5301_v16  ;;  %v5938_v25 = vld [vmem:[%s8592_s3 + $0x90] ss:$12 sps:$4 sm:$0xff]   ;;  %v5944_v26 = vld [vmem:[%s8592_s3 + $0xac] ss:$12 sps:$4 sm:$0xff]   ;;  %v5961_v28 = vld [vmem:[%s8592_s3 + $0xa8] ss:$12 sps:$4 sm:$0xff]  }
   0xa   :  { %4451 = vmatprep.subr.bf16.mxu1 %v8604_v17  ;;  %v5951_v27 = vld [vmem:[%s8592_s3 + $0x50] ss:$12 sps:$4 sm:$0xff]   ;;  %v5967_v29 = vld [vmem:[%s8593_s1] sm:$0xff]  ;;  %v5974_v30 = vld [vmem:[%s8592_s3 + $0x68] ss:$12 sps:$4 sm:$0xff]  }
   0xb   :  { %540 = vmatpush1.bf16.msra.mxu0 %v5839_v7  ;;  %v408_v31 = vpack.c.bf16 %v5967_v29, %v5967_v29  ;;  %v5984_v32 = vld [vmem:[%s8592_s3 + $0x80] ss:$12 sps:$4 sm:$0xff]   ;;  %v5992_v33 = vld [vmem:[%s8592_s3 + $0x98] ss:$12 sps:$4 sm:$0xff]   ;;  %v5999_v34 = vld [vmem:[%s8592_s3 + $0xb0] ss:$12 sps:$4 sm:$0xff]  }
   0xc   :  { %541 = vmatprep.subr.bf16.mxu0 %v5846_v8  ;;  %8887 = vst [vmem:[#allocation3_spill] sm:$0xff] %v5999_v34  ;;  %v6014_v36 = vld [vmem:[%s8594_s4] ss:$12 sps:$4 sm:$0xff]   ;;  %v6020_v37 = vld [vmem:[%s8594_s4 + $0x8] ss:$12 sps:$4 sm:$0xff]  }
   0xd   :  { %4452 = vmatpush3.bf16.msra.mxu1 %v5906_v20  ;;  %8888 = vst [vmem:[#allocation4_spill] sm:$0xff] %v6020_v37  ;;  %v6027_v38 = vld [vmem:[%s8594_s4 + $0x1c] ss:$12 sps:$4 sm:$0xff]   ;;  %v6032_v39 = vld [vmem:[%s8594_s4 + $0x18] ss:$12 sps:$4 sm:$0xff]  }
   0xe   :  { %3936 = vmatmul.mubr.msk.bf16.gmra.mrb[4].mxu0 %vm94_vm0, %v5294_v9  ;;  %4453 = vmatprep.subr.bf16.mxu1 %v8604_v17  ;;  %v6037_v40 = vld [vmem:[%s8594_s4 + $0x20] ss:$12 sps:$4 sm:$0xff]   ;;  %v6052_v42 = vld [vmem:[%s8594_s4 + $0x30] ss:$12 sps:$4 sm:$0xff]   ;;  %v6058_v43 = vld [vmem:[%s8594_s4 + $0x38] ss:$12 sps:$4 sm:$0xff]  }
   0xf   :  { %542 = vmatpush1.bf16.msra.mxu0 %v5855_v10  ;;  %159 = vmatprep.mubr.bf16.mxu0 %v8602_v1  ;;  %8889 = vst [vmem:[#allocation5_spill] sm:$0xff] %v6037_v40  ;;  %v6043_v41 = vld [vmem:[%s8594_s4 + $0x34] ss:$12 sps:$4 sm:$0xff]   ;;  %8890 = vst [vmem:[#allocation6_spill] sm:$0xff] %v6058_v43  ;;  %v6065_v44 = vld [vmem:[%s8594_s4 + $0x4c] ss:$12 sps:$4 sm:$0xff]  }
  0x10   :  { %543 = vmatprep.subr.bf16.mxu0 %v5861_v11  ;;  %4446 = vmatmul.mubr.msk.bf16.gmra.mrb[4].mxu1 %vm94_vm0, %v5309_v24  ;;  %v6070_v45 = vld [vmem:[%s8594_s4 + $0x48] ss:$12 sps:$4 sm:$0xff]   ;;  %v6077_v46 = vld [vmem:[%s8594_s4 + $0x50] ss:$12 sps:$4 sm:$0xff]   ;;  %v6089_v48 = vld [vmem:[%s8594_s4 + $0x60] ss:$12 sps:$4 sm:$0xff]  }
  0x11   :  { %4454 = vmatpush3.bf16.msra.mxu1 %v5928_v23  ;;  %4465 = vmatprep.mubr.msk.bf16.mxu1 %vm5746_vm1, %v8604_v17  ;;  %8891 = vst [vmem:[#allocation7_spill] sm:$0xff] %v6077_v46  ;;  %v6084_v47 = vld [vmem:[%s8594_s4 + $0x64] ss:$12 sps:$4 sm:$0xff]   ;;  %v6096_v49 = vld [vmem:[%s8594_s4 + $0x68] ss:$12 sps:$4 sm:$0xff]  }
  0x12   :  { %4455 = vmatprep.subr.bf16.mxu1 %v8604_v17  ;;  %8892 = vst [vmem:[#allocation8_spill] sm:$0xff] %v6096_v49  ;;  %v6101_v50 = vld [vmem:[%s8594_s4 + $0x7c] ss:$12 sps:$4 sm:$0xff]   ;;  %v6107_v51 = vld [vmem:[%s8594_s4 + $0x78] ss:$12 sps:$4 sm:$0xff]  }
  0x13   :  { %544 = vmatpush1.bf16.msra.mxu0 %v5871_v13  ;;  %v6114_v52 = vld [vmem:[%s8594_s4 + $0x80] ss:$12 sps:$4 sm:$0xff]   ;;  %v6125_v54 = vld [vmem:[%s8594_s4 + $0x90] ss:$12 sps:$4 sm:$0xff]   ;;  %v6130_v55 = vld [vmem:[%s8594_s4 + $0x98] ss:$12 sps:$4 sm:$0xff]  }
  0x14   :  { %545 = vmatprep.subr.bf16.mxu0 %v5878_v14  ;;  %8893 = vst [vmem:[#allocation9_spill] sm:$0xff] %v6114_v52  ;;  %v6119_v53 = vld [vmem:[%s8594_s4 + $0x94] ss:$12 sps:$4 sm:$0xff]   ;;  %8894 = vst [vmem:[#allocation10_spill] sm:$0xff] %v6130_v55  ;;  %v6135_v56 = vld [vmem:[%s8594_s4 + $0xac] ss:$12 sps:$4 sm:$0xff]  }
  0x15   :  { %4456 = vmatpush3.bf16.msra.mxu1 %v5951_v27  ;;  %v6144_v57 = vld [vmem:[%s8594_s4 + $0xa8] ss:$12 sps:$4 sm:$0xff]   ;;  %v6149_v58 = vld [vmem:[%s8594_s4 + $0xb0] ss:$12 sps:$4 sm:$0xff]  }
  0x16   :  { %3937 = vmatmul.mubr.msk.bf16.gmra.mrb[8].mxu0 %vm94_vm0, %v5301_v16  ;;  %4457 = vmatprep.subr.bf16.mxu1 %v8604_v17  ;;  %8895 = vst [vmem:[#allocation11_spill] sm:$0xff] %v6149_v58  ;;  %v6154_v59 = vld [vmem:[%s8595_s5 + $0x4] ss:$12 sps:$4 sm:$0xff]  }
  0x17   :  { %546 = vmatpush1.bf16.msra.mxu0 %v5893_v18  ;;  %169 = vmatprep.mubr.bf16.mxu0 %v8602_v1 }
  0x18   :  { %547 = vmatprep.subr.bf16.mxu0 %v5899_v19 }
  0x19   :  { %4458 = vmatpush3.bf16.msra.mxu1 %v5974_v30 }
  0x1a   :  { %4459 = vmatprep.subr.bf16.mxu1 %v8604_v17 }
  0x1b   :  { %548 = vmatpush1.bf16.msra.mxu0 %v5915_v21 }
  0x1c   :  { %549 = vmatprep.subr.bf16.mxu0 %v5922_v22 }
  0x1d   :  { %4460 = vmatpush3.bf16.msra.mxu1 %v5984_v32 }
  0x1e   :  { %3938 = vmatmul.mubr.msk.bf16.gmra.mrb[12].mxu0 %vm94_vm0, %v5309_v24  ;;  %4461 = vmatprep.subr.bf16.mxu1 %v8604_v17 }
  0x1f   :  { %550 = vmatpush1.bf16.msra.mxu0 %v5938_v25  ;;  %569 = vmatprep.mubr.bf16.mxu0 %v8602_v1 }
  0x20   :  { %551 = vmatprep.subr.bf16.mxu0 %v5944_v26 }
  0x21   :  { %4462 = vmatpush3.bf16.msra.mxu1 %v5992_v33 }
  0x22   :  { %4463 = vmatprep.subr.bf16.mxu1 %v8604_v17 }
  0x23   :  { %552 = vmatpush1.bf16.msra.mxu0 %v5961_v28 }
  0x24   :  { %768 = vmatprep.subr.bf16.mxu0 %v6009_v35 }
  0x25   :  { %4464 = vmatpush3.bf16.msra.mxu1 %v5999_v34 }
  0x26   :  { %570 = vmatmul.mubr.bf16.vlgmr.msra.gmra.mrb[16].mxu0 %v408_v31  ;;  %4469 = vmatprep.subr.bf16.mxu1 %v8604_v17 }
  0x27   :  { %800 = vmatprep.mubr.bf16.mxu0 %v8602_v1  ;;  %769 = vmatpush1.bf16.msra.mxu0 %v6014_v36 }
  0x28   :  { %4466 = vmatmul.mubr.bf16.vlgmr.msra.gmra.mrb[8].mxu1 %v408_v31  ;;  %770 = vmatprep.subr.bf16.mxu0 %v6027_v38 }
  0x29   :  { %4485 = vmatprep.mubr.msk.bf16.mxu1 %vm5746_vm1, %v8604_v17  ;;  %4470 = vmatpush3.bf16.msra.mxu1 %v6020_v37 }
  0x2a   :  { %4471 = vmatprep.subr.bf16.mxu1 %v8604_v17 }
  0x2b   :  { %771 = vmatpush1.bf16.msra.mxu0 %v6032_v39 }
  0x2c   :  { %772 = vmatprep.subr.bf16.mxu0 %v6043_v41 }
  0x2d   :  { %4472 = vmatpush3.bf16.msra.mxu1 %v6037_v40 }
  0x2e   :  { %4473 = vmatprep.subr.bf16.mxu1 %v8604_v17 }
  0x2f   :  { %773 = vmatpush1.bf16.msra.mxu0 %v6052_v42 }
  0x30   :  { %774 = vmatprep.subr.bf16.mxu0 %v6065_v44 }
  0x31   :  { %4474 = vmatpush3.bf16.msra.mxu1 %v6058_v43 }
  0x32   :  { %4475 = vmatprep.subr.bf16.mxu1 %v8604_v17 }
  0x33   :  { %775 = vmatpush1.bf16.msra.mxu0 %v6070_v45 }
  0x34   :  { %776 = vmatprep.subr.bf16.mxu0 %v6084_v47 }
  0x35   :  { %4476 = vmatpush3.bf16.msra.mxu1 %v6077_v46 }
  0x36   :  { %4477 = vmatprep.subr.bf16.mxu1 %v8604_v17 }
  0x37   :  { %777 = vmatpush1.bf16.msra.mxu0 %v6089_v48 }
  0x38   :  { %778 = vmatprep.subr.bf16.mxu0 %v6101_v50 }
  0x39   :  { %4478 = vmatpush3.bf16.msra.mxu1 %v6096_v49 }
  0x3a   :  { %4479 = vmatprep.subr.bf16.mxu1 %v8604_v17 }
  0x3b   :  { %779 = vmatpush1.bf16.msra.mxu0 %v6107_v51 }
  0x3c   :  { %780 = vmatprep.subr.bf16.mxu0 %v6119_v53 }
  0x3d   :  { %4480 = vmatpush3.bf16.msra.mxu1 %v6114_v52 }
  0x3e   :  { %4481 = vmatprep.subr.bf16.mxu1 %v8604_v17 }
  0x3f   :  { %781 = vmatpush1.bf16.msra.mxu0 %v6125_v54 }
  0x40   :  { %782 = vmatprep.subr.bf16.mxu0 %v6135_v56 }
  0x41   :  { %4482 = vmatpush3.bf16.msra.mxu1 %v6130_v55 }
  0x42   :  { %4483 = vmatprep.subr.bf16.mxu1 %v8604_v17 }
  0x43   :  { %783 = vmatpush1.bf16.msra.mxu0 %v6144_v57 }
  0x44   :  { %978 = vmatprep.subr.bf16.mxu0 %v6154_v59 }
  0x45   :  { %4484 = vmatpush3.bf16.msra.mxu1 %v6149_v58 }
  0x46   :  { %4489 = vmatprep.subr.bf16.mxu1 %v8604_v17 }
  0xd9   :  { %v141_v60 = vpop.f32.mrb[0].mxu0 }
  0xda   :  { %v143_v61 = vpop.f32.mrb[1].mxu0 }
  0xdb   :  { %v6164_v62 = vpop.f32.mrb[2].mxu0  ;;  %v6176_v12 = vpop.f32.mrb[0].mxu1 }
  0xdc   :  { %v6166_v63 = vpop.f32.mrb[3].mxu0  ;;  %8900 = vst [vmem:[#allocation16_spill] sm:$0xff] %v6176_v12  ;;  %v214_v16 = vpop.f32.mrb[1].mxu1 }
  0xdd   :  { %v6180_v31 = vpop.f32.mrb[2].mxu1 }
  0xde   :  { %8902 = vst [vmem:[#allocation18_spill] sm:$0xff] %v6180_v31  ;;  %v6184_v17 = vpop.f32.mrb[3].mxu1 }
  0xdf   :  { %8904 = vst [vmem:[#allocation20_spill] sm:$0xff] %v6184_v17 }
  0xe1   :  { %v6168_v0 = vpop.f32.mrb[4].mxu0 }
  0xe2   :  { %8896 = vst [vmem:[#allocation12_spill] sm:$0xff] %v6168_v0  ;;  %v6170_v2 = vpop.f32.mrb[5].mxu0 }
  0xe3   :  { %8897 = vst [vmem:[#allocation13_spill] sm:$0xff] %v6170_v2  ;;  %v6172_v3 = vpop.f32.mrb[6].mxu0  ;;  %v6190_v2 = vpop.f32.mrb[4].mxu1 }
  0xe4   :  { %8898 = vst [vmem:[#allocation14_spill] sm:$0xff] %v6172_v3  ;;  %v6174_v9 = vpop.f32.mrb[7].mxu0  ;;  %8907 = vst [vmem:[#allocation23_spill] sm:$0xff] %v6190_v2  ;;  %v6192_v3 = vpop.f32.mrb[5].mxu1 }
  0xe5   :  { %8899 = vst [vmem:[#allocation15_spill] sm:$0xff] %v6174_v9  ;;  %8908 = vst [vmem:[#allocation24_spill] sm:$0xff] %v6192_v3  ;;  %v6196_v12 = vpop.f32.mrb[6].mxu1 }
  0xe6   :  { %8910 = vst [vmem:[#allocation26_spill] sm:$0xff] %v6196_v12 }
  0xe9   :  { %v6178_v24 = vpop.f32.mrb[8].mxu0 }
  0xea   :  { %8901 = vst [vmem:[#allocation17_spill] sm:$0xff] %v6178_v24  ;;  %v6182_v1 = vpop.f32.mrb[9].mxu0  ;;  %v6200_v24 = vpop.f32.mrb[7].mxu1 }
  0xeb   :  { %8903 = vst [vmem:[#allocation19_spill] sm:$0xff] %v6182_v1  ;;  %v6186_v58 = vpop.f32.mrb[10].mxu0  ;;  %8912 = vst [vmem:[#allocation28_spill] sm:$0xff] %v6200_v24 }
  0xec   :  { %8905 = vst [vmem:[#allocation21_spill] sm:$0xff] %v6186_v58  ;;  %v6188_v0 = vpop.f32.mrb[11].mxu0 }
  0xed   :  { %8906 = vst [vmem:[#allocation22_spill] sm:$0xff] %v6188_v0 }
  0xf1   :  { %v6194_v9 = vpop.f32.mrb[12].mxu0 }
  0xf2   :  { %8909 = vst [vmem:[#allocation25_spill] sm:$0xff] %v6194_v9  ;;  %v6198_v55 = vpop.f32.mrb[13].mxu0 }
  0xf3   :  { %8911 = vst [vmem:[#allocation27_spill] sm:$0xff] %v6198_v55  ;;  %v6202_v31 = vpop.f32.mrb[14].mxu0 }
  0xf4   :  { %8913 = vst [vmem:[#allocation29_spill] sm:$0xff] %v6202_v31  ;;  %v6204_v1 = vpop.f32.mrb[15].mxu0 }
  0xf5   :  { %8914 = vst [vmem:[#allocation30_spill] sm:$0xff] %v6204_v1 }
  0xf9   :  { %v571_v17 = vpop.f32.mrb[16].mxu0 }
  0xfa   :  { %v618_v58 = vadd.f32 %v571_v17, %v141_v60  ;;  %v573_v52 = vpop.f32.mrb[17].mxu0 }
  0xfb   :  { %v625_v0 = vadd.f32 %v573_v52, %v143_v61  ;;  %v575_v49 = vpop.f32.mrb[18].mxu0  ;;  %v612_v9 = vpop.f32.mrb[8].mxu1 }
  0xfc   :  { %v3968_v2 = vmul.f32 -1.442695, %v618_v58  ;;  %v576_v46 = vpop.f32.mrb[19].mxu0  ;;  %v4467_v43 = vpop.f32.mrb[9].mxu1 }
  0xfd   :  { %v3969_v3 = vmul.f32 -1.442695, %v625_v0  ;;  %v615_v40 = vpop.f32.mrb[10].mxu1  ;;  %v6234_v43 = vld [vmem:[%s8595_s5 + $0x18] ss:$12 sps:$4 sm:$0xff]  }
  0xfe   :  { %5404 = vpow2.f32 %v3968_v2  ;;  %v4468_v24 = vpop.f32.mrb[11].mxu1  ;;  %v6212_v40 = vld [vmem:[%s8595_s5] ss:$12 sps:$4 sm:$0xff]   ;;  %8919 = vst [vmem:[#allocation35_spill] sm:$0xff] %v6234_v43 }
  0xff   :  { %5406 = vpow2.f32 %v3969_v3  ;;  %8916 = vst [vmem:[#allocation32_spill] sm:$0xff] %v6212_v40  ;;  %v6246_v2 = vld [vmem:[%s8595_s5 + $0x34] ss:$12 sps:$4 sm:$0xff]   ;;  %v8922_v3 = vmov 0.0   ;;  %v6268_v24 = vld [vmem:[%s8595_s5 + $0x4c] ss:$12 sps:$4 sm:$0xff]  }
 0x100   :  { %8921 = vst [vmem:[#allocation37_spill] sm:$0xff] %v6246_v2  ;;  %8926 = vst [vmem:[#allocation40_spill] sm:$0xff] %v6268_v24 }
 0x108   :  { %v5405_v12 = vpop.eup %5404 }
 0x109   :  { %v622_v55 = vadd.f32 1.0, %v5405_v12  ;;  %v5407_v31 = vpop.eup %5406  ;;  %v6256_v12 = vld [vmem:[%s8595_s5 + $0x30] ss:$12 sps:$4 sm:$0xff]  }
 0x10a   :  { %v629_v37 = vadd.f32 1.0, %v5407_v31  ;;  %8924 = vst [vmem:[#allocation38_spill] sm:$0xff] %v6256_v12  ;;  %v6275_v31 = vld [vmem:[%s8595_s5 + $0x48] ss:$12 sps:$4 sm:$0xff]  }
 0x10b   :  { %5408 = vrcp.f32 %v622_v55  ;;  %v6240_v55 = vld [vmem:[%s8595_s5 + $0x20] ss:$12 sps:$4 sm:$0xff]   ;;  %8927 = vst [vmem:[#allocation41_spill] sm:$0xff] %v6275_v31 }
 0x10c   :  { %5410 = vrcp.f32 %v629_v37  ;;  %v6217_v37 = vld [vmem:[%s8595_s5 + $0x8] ss:$12 sps:$4 sm:$0xff]   ;;  %8920 = vst [vmem:[#allocation36_spill] sm:$0xff] %v6240_v55 }
 0x10d   :  { %8917 = vst [vmem:[#allocation33_spill] sm:$0xff] %v6217_v37 }
 0x115   :  { %v5409_v1 = vpop.eup %5408 }
 0x116   :  { %v632_v17 = vmul.f32 %v5409_v1, %v612_v9  ;;  %v5411_v49 = vpop.eup %5410  ;;  %v8923_v9 = vmov 0  }
 0x117   :  { %v635_v52 = vsub.f32 1.0, %v5411_v49  ;;  %v637_v61 = vmul.f32 %v5411_v49, %v5967_v29  ;;  %v6226_v29 = vld [vmem:[%s8595_s5 + $0x1c] ss:$12 sps:$4 sm:$0xff]   ;;  %v6294_v49 = vld [vmem:[%s8595_s5 + $0x60] ss:$12 sps:$4 sm:$0xff]  }
 0x118   :  { %v633_v60 = vadd.f32 %v632_v17, %v214_v16  ;;  %8918 = vst [vmem:[#allocation34_spill] sm:$0xff] %v6226_v29  ;;  %v6262_v16 = vld [vmem:[%s8595_s5 + $0x38] ss:$12 sps:$4 sm:$0xff]   ;;  %v6281_v17 = vld [vmem:[%s8595_s5 + $0x50] ss:$12 sps:$4 sm:$0xff]   ;;  %8930 = vst [vmem:[#allocation44_spill] sm:$0xff] %v6294_v49 }
 0x119   :  { %8925 = vst [vmem:[#allocation39_spill] sm:$0xff] %v6262_v16  ;;  %8928 = vst [vmem:[#allocation42_spill] sm:$0xff] %v6281_v17 }
 0x11a   :  { %5412 = vtanh.f32 %v633_v60  ;;  %v6287_v60 = vld [vmem:[%s8595_s5 + $0x64] ss:$12 sps:$4 sm:$0xff]  }
 0x11b   :  { %8929 = vst [vmem:[#allocation43_spill] sm:$0xff] %v6287_v60 }
 0x124   :  { %v5413_v46 = vpop.eup %5412 }
 0x125   :  { %v636_v58 = vmul.f32 %v5413_v46, %v635_v52  ;;  %v6300_v52 = vld [vmem:[%s8595_s5 + $0x68] ss:$12 sps:$4 sm:$0xff]  }
 0x126   :  { %8931 = vst [vmem:[#allocation45_spill] sm:$0xff] %v6300_v52  ;;  %v6306_v46 = vld [vmem:[%s8595_s5 + $0x7c] ss:$12 sps:$4 sm:$0xff]  }
 0x127   :  { %v6207_v0 = vadd.f32 %v637_v61, %v636_v58  ;;  %8932 = vst [vmem:[#allocation46_spill] sm:$0xff] %v6306_v46  ;;  %v6313_v58 = vld [vmem:[%s8595_s5 + $0x78] ss:$12 sps:$4 sm:$0xff]   ;;  %v6319_v61 = vld [vmem:[%s8595_s5 + $0x80] ss:$12 sps:$4 sm:$0xff]  }
 0x128   :  { %8933 = vst [vmem:[#allocation47_spill] sm:$0xff] %v6313_v58  ;;  %8934 = vst [vmem:[#allocation48_spill] sm:$0xff] %v6319_v61 }
 0x129   :  { %8915 = vst [vmem:[#allocation31_spill] sm:$0xff] %v6207_v0  ;;  %v6221_v1 = vpack.c.bf16 %v6207_v0, %v6207_v0 }
 0x12b   :  { %801 = vmatmul.mubr.bf16.vlgmr.msra.gmra.mrb[20].mxu0 %v6221_v1  ;;  %4486 = vmatmul.mubr.bf16.vlgmr.msra.gmra.mrb[12].mxu1 %v6221_v1 }
 0x12c   :  { %979 = vmatpush1.bf16.msra.mxu0 %v6212_v40  ;;  %4490 = vmatpush3.bf16.msra.mxu1 %v6217_v37 }
 0x12d   :  { %980 = vmatprep.subr.bf16.mxu0 %v6226_v29  ;;  %4491 = vmatprep.subr.bf16.mxu1 %v8922_v3 }
 0x12e   :  { %1010 = vmatprep.mubr.bf16.mxu0 %v8923_v9  ;;  %4505 = vmatprep.mubr.msk.bf16.mxu1 %vm5746_vm1, %v8922_v3 }
 0x130   :  { %981 = vmatpush1.bf16.msra.mxu0 %v6234_v43  ;;  %4492 = vmatpush3.bf16.msra.mxu1 %v6240_v55 }
 0x131   :  { %982 = vmatprep.subr.bf16.mxu0 %v6246_v2  ;;  %4493 = vmatprep.subr.bf16.mxu1 %v8922_v3 }
 0x134   :  { %983 = vmatpush1.bf16.msra.mxu0 %v6256_v12  ;;  %4494 = vmatpush3.bf16.msra.mxu1 %v6262_v16 }
 0x135   :  { %984 = vmatprep.subr.bf16.mxu0 %v6268_v24  ;;  %4495 = vmatprep.subr.bf16.mxu1 %v8922_v3 }
 0x138   :  { %985 = vmatpush1.bf16.msra.mxu0 %v6275_v31  ;;  %4496 = vmatpush3.bf16.msra.mxu1 %v6281_v17 }
 0x139   :  { %986 = vmatprep.subr.bf16.mxu0 %v6287_v60  ;;  %4497 = vmatprep.subr.bf16.mxu1 %v8922_v3  ;;  %v6325_v60 = vld [vmem:[%s8595_s5 + $0x94] ss:$12 sps:$4 sm:$0xff]  }
 0x13a   :  { %8935 = vst [vmem:[#allocation49_spill] sm:$0xff] %v6325_v60 }
 0x13c   :  { %987 = vmatpush1.bf16.msra.mxu0 %v6294_v49  ;;  %4498 = vmatpush3.bf16.msra.mxu1 %v6300_v52  ;;  %v6332_v52 = vld [vmem:[%s8595_s5 + $0x90] ss:$12 sps:$4 sm:$0xff]   ;;  %v6344_v49 = vld [vmem:[%s8595_s5 + $0xac] ss:$12 sps:$4 sm:$0xff]  }
 0x13d   :  { %988 = vmatprep.subr.bf16.mxu0 %v6306_v46  ;;  %4499 = vmatprep.subr.bf16.mxu1 %v8922_v3  ;;  %8936 = vst [vmem:[#allocation50_spill] sm:$0xff] %v6332_v52  ;;  %v6338_v46 = vld [vmem:[%s8595_s5 + $0x98] ss:$12 sps:$4 sm:$0xff]   ;;  %8938 = vst [vmem:[#allocation52_spill] sm:$0xff] %v6344_v49 }
 0x13e   :  { %8937 = vst [vmem:[#allocation51_spill] sm:$0xff] %v6338_v46 }
 0x140   :  { %989 = vmatpush1.bf16.msra.mxu0 %v6313_v58  ;;  %4500 = vmatpush3.bf16.msra.mxu1 %v6319_v61  ;;  %v6350_v58 = vld [vmem:[%s8593_s1 + $0x8] sm:$0xff] }
 0x141   :  { %990 = vmatprep.subr.bf16.mxu0 %v6325_v60  ;;  %4501 = vmatprep.subr.bf16.mxu1 %v8922_v3  ;;  %v6356_v61 = vld [vmem:[%s8595_s5 + $0xa8] ss:$12 sps:$4 sm:$0xff]   ;;  %v6362_v60 = vld [vmem:[%s8595_s5 + $0xb0] ss:$12 sps:$4 sm:$0xff]   ;;  %v849_v17 = vpack.c.bf16 %v6350_v58, %v6350_v58 }
 0x142   :  { %8939 = vst [vmem:[#allocation53_spill] sm:$0xff] %v6356_v61  ;;  %8940 = vst [vmem:[#allocation54_spill] sm:$0xff] %v6362_v60 }
 0x144   :  { %991 = vmatpush1.bf16.msra.mxu0 %v6332_v52  ;;  %4502 = vmatpush3.bf16.msra.mxu1 %v6338_v46  ;;  %v6469_v52 = vld [vmem:[%s8597_s8 + $0x28] sm:$0xff]  }
 0x145   :  { %992 = vmatprep.subr.bf16.mxu0 %v6344_v49  ;;  %4503 = vmatprep.subr.bf16.mxu1 %v8922_v3  ;;  %v6379_v49 = vld [vmem:[%s8596_s6] sm:$0xff]   ;;  %8954 = vst [vmem:[#allocation68_spill] sm:$0xff] %v6469_v52 }
 0x146   :  { %8941 = vst [vmem:[#allocation55_spill] sm:$0xff] %v6379_v49 }
 0x148   :  { %993 = vmatpush1.bf16.msra.mxu0 %v6356_v61  ;;  %4504 = vmatpush3.bf16.msra.mxu1 %v6362_v60  ;;  %v6386_v60 = vld [vmem:[%s8596_s6 + $0x8] sm:$0xff]  }
 0x149   :  { %4509 = vmatprep.subr.bf16.mxu0 %v8922_v3  ;;  %4529 = vmatprep.subr.bf16.mxu1 %v8922_v3  ;;  %8942 = vst [vmem:[#allocation56_spill] sm:$0xff] %v6386_v60 }
 0x14b   :  { %1011 = vmatmul.mubr.bf16.vlgmr.msra.gmra.mrb[20].mxu0 %v849_v17  ;;  %4506 = vmatmul.mubr.bf16.vlgmr.msra.gmra.mrb[16].mxu1 %v849_v17  ;;  %v6393_v17 = vld [vmem:[%s8596_s6 + $0x10] sm:$0xff]  }
 0x14c   :  { %4525 = vmatprep.mubr.msk.bf16.mxu0 %vm5746_vm1, %v8922_v3  ;;  %4545 = vmatprep.mubr.msk.bf16.mxu1 %vm5746_vm1, %v8922_v3  ;;  %8943 = vst [vmem:[#allocation57_spill] sm:$0xff] %v6393_v17 }
 0x14d   :  { %4510 = vmatpush3.bf16.msra.mxu0 %v6379_v49  ;;  %v6400_v49 = vld [vmem:[%s8596_s6 + $0x18] sm:$0xff]  }
 0x14e   :  { %4511 = vmatprep.subr.bf16.mxu0 %v8922_v3  ;;  %8944 = vst [vmem:[#allocation58_spill] sm:$0xff] %v6400_v49 }
 0x151   :  { %4512 = vmatpush3.bf16.msra.mxu0 %v6386_v60  ;;  %v6407_v60 = vld [vmem:[%s8596_s6 + $0x20] sm:$0xff]  }
 0x152   :  { %4513 = vmatprep.subr.bf16.mxu0 %v8922_v3  ;;  %8945 = vst [vmem:[#allocation59_spill] sm:$0xff] %v6407_v60 }
 0x155   :  { %4514 = vmatpush3.bf16.msra.mxu0 %v6393_v17  ;;  %v6413_v17 = vld [vmem:[%s8596_s6 + $0x28] sm:$0xff]  }
 0x156   :  { %4515 = vmatprep.subr.bf16.mxu0 %v8922_v3  ;;  %8946 = vst [vmem:[#allocation60_spill] sm:$0xff] %v6413_v17 }
 0x159   :  { %4516 = vmatpush3.bf16.msra.mxu0 %v6400_v49  ;;  %v6420_v49 = vld [vmem:[%s8596_s6 + $0x30] sm:$0xff]  }
 0x15a   :  { %4517 = vmatprep.subr.bf16.mxu0 %v8922_v3  ;;  %8947 = vst [vmem:[#allocation61_spill] sm:$0xff] %v6420_v49 }
 0x15d   :  { %4518 = vmatpush3.bf16.msra.mxu0 %v6407_v60  ;;  %v6427_v60 = vld [vmem:[%s8596_s6 + $0x38] sm:$0xff]  }
 0x15e   :  { %4519 = vmatprep.subr.bf16.mxu0 %v8922_v3  ;;  %8948 = vst [vmem:[#allocation62_spill] sm:$0xff] %v6427_v60 }
 0x161   :  { %4520 = vmatpush3.bf16.msra.mxu0 %v6413_v17  ;;  %v6435_v17 = vld [vmem:[%s8597_s8] sm:$0xff]  }
 0x162   :  { %4521 = vmatprep.subr.bf16.mxu0 %v8922_v3  ;;  %8949 = vst [vmem:[#allocation63_spill] sm:$0xff] %v6435_v17  ;;  %4530 = vmatpush3.bf16.msra.mxu1 %v6435_v17 }
 0x163   :  { %4531 = vmatprep.subr.bf16.mxu1 %v8922_v3 }
 0x165   :  { %4522 = vmatpush3.bf16.msra.mxu0 %v6420_v49  ;;  %v6441_v49 = vld [vmem:[%s8597_s8 + $0x8] sm:$0xff]  }
 0x166   :  { %4523 = vmatprep.subr.bf16.mxu0 %v8922_v3  ;;  %8950 = vst [vmem:[#allocation64_spill] sm:$0xff] %v6441_v49  ;;  %4532 = vmatpush3.bf16.msra.mxu1 %v6441_v49  ;;  %v6462_v49 = vld [vmem:[%s8597_s8 + $0x20] sm:$0xff]  }
 0x167   :  { %4533 = vmatprep.subr.bf16.mxu1 %v8922_v3  ;;  %8953 = vst [vmem:[#allocation67_spill] sm:$0xff] %v6462_v49 }
 0x169   :  { %4524 = vmatpush3.bf16.msra.mxu0 %v6427_v60  ;;  %v6455_v60 = vld [vmem:[%s8597_s8 + $0x18] sm:$0xff]  }
 0x16a   :  { %1278 = vmatprep.subr.bf16.mxu0 %v5820_v4  ;;  %v6448_v4 = vld [vmem:[%s8597_s8 + $0x10] sm:$0xff]   ;;  %8952 = vst [vmem:[#allocation66_spill] sm:$0xff] %v6455_v60 }
 0x16b   :  { %8951 = vst [vmem:[#allocation65_spill] sm:$0xff] %v6448_v4  ;;  %4534 = vmatpush3.bf16.msra.mxu1 %v6448_v4 }
 0x16c   :  { %4535 = vmatprep.subr.bf16.mxu1 %v8922_v3 }
 0x16f   :  { %4536 = vmatpush3.bf16.msra.mxu1 %v6455_v60  ;;  %v6476_v60 = vld [vmem:[%s8597_s8 + $0x30] sm:$0xff]  }
 0x170   :  { %4537 = vmatprep.subr.bf16.mxu1 %v8922_v3  ;;  %8955 = vst [vmem:[#allocation69_spill] sm:$0xff] %v6476_v60 }
 0x173   :  { %4538 = vmatpush3.bf16.msra.mxu1 %v6462_v49 }
 0x174   :  { %4539 = vmatprep.subr.bf16.mxu1 %v8922_v3 }
 0x177   :  { %4540 = vmatpush3.bf16.msra.mxu1 %v6469_v52 }
 0x178   :  { %4541 = vmatprep.subr.bf16.mxu1 %v8922_v3 }
 0x17b   :  { %4542 = vmatpush3.bf16.msra.mxu1 %v6476_v60 }
 0x17c   :  { %4543 = vmatprep.subr.bf16.mxu1 %v8922_v3 }
 0x1fe   :  { %v843_v17 = vpop.f32.mrb[12].mxu1 }
 0x1ff   :  { %v4487_v61 = vpop.f32.mrb[13].mxu1 }
 0x200   :  { %v846_v46 = vpop.f32.mrb[14].mxu1 }
 0x201   :  { %v4488_v4 = vpop.f32.mrb[15].mxu1 }
 0x21e   :  { %v1012_v46 = vpop.f32.mrb[20].mxu0  ;;  %v1053_v61 = vpop.f32.mrb[16].mxu1 }
 0x21f   :  { %v4018_v4 = vmul.f32 -1.442695, %v1012_v46  ;;  %v1014_v49 = vpop.f32.mrb[21].mxu0  ;;  %v4507_v31 = vpop.f32.mrb[17].mxu1 }
 0x220   :  { %v1016_v24 = vpop.f32.mrb[22].mxu0  ;;  %v1056_v16 = vpop.f32.mrb[18].mxu1  ;;  %v4019_v2 = vmul.f32 -1.442695, %v1014_v49 }
 0x221   :  { %5414 = vpow2.f32 %v4018_v4  ;;  %v1017_v52 = vpop.f32.mrb[23].mxu0  ;;  %v4508_v12 = vpop.f32.mrb[19].mxu1  ;;  %v8972_v4 = vld [vmem:[#allocation35_spill] sm:$0xff] }
 0x222   :  { %5416 = vpow2.f32 %v4019_v2 }
 0x22b   :  { %v5415_v55 = vpop.eup %5414 }
 0x22c   :  { %v1063_v43 = vadd.f32 1.0, %v5415_v55  ;;  %v5417_v29 = vpop.eup %5416  ;;  %v8968_v55 = vld [vmem:[#allocation31_spill] sm:$0xff] }
 0x22d   :  { %v1070_v37 = vadd.f32 1.0, %v5417_v29 }
 0x22e   :  { %5418 = vrcp.f32 %v1063_v43 }
 0x22f   :  { %5420 = vrcp.f32 %v1070_v37 }
 0x238   :  { %v5419_v60 = vpop.eup %5418 }
 0x239   :  { %v1073_v40 = vmul.f32 %v5419_v60, %v1053_v61  ;;  %v5421_v46 = vpop.eup %5420  ;;  %v8971_v61 = vld [vmem:[#allocation34_spill] sm:$0xff] }
 0x23a   :  { %v1076_v34 = vsub.f32 1.0, %v5421_v46  ;;  %v1078_v16 = vmul.f32 %v5421_v46, %v6350_v58  ;;  %v8969_v58 = vld [vmem:[#allocation32_spill] sm:$0xff] }
 0x23b   :  { %v1074_v0 = vadd.f32 %v1073_v40, %v843_v17  ;;  %v8970_v17 = vld [vmem:[#allocation33_spill] sm:$0xff]  ;;  %v8973_v46 = vld [vmem:[#allocation36_spill] sm:$0xff] }
 0x23d   :  { %5422 = vtanh.f32 %v1074_v0 }
 0x247   :  { %v5423_v31 = vpop.eup %5422 }
 0x248   :  { %v1077_v24 = vmul.f32 %v5423_v31, %v1076_v34  ;;  %v8964_v34 = vld [vmem:[#allocation10_spill] sm:$0xff]  ;;  %v8974_v31 = vld [vmem:[#allocation37_spill] sm:$0xff] }
 0x24a   :  { %v6482_v52 = vadd.f32 %v1078_v16, %v1077_v24  ;;  %v8975_v24 = vld [vmem:[#allocation38_spill] sm:$0xff]  ;;  %v8976_v16 = vld [vmem:[#allocation39_spill] sm:$0xff] }
 0x24c   :  { %v6486_v2 = vpack.c.bf16 %v6482_v52, %v6482_v52 }
 0x24e   :  { %4526 = vmatmul.mubr.bf16.vlgmr.msra.gmra.mrb[24].mxu0 %v6486_v2 }
 0x24f   :  { %1279 = vmatpush1.bf16.msra.mxu0 %v5825_v5  ;;  %1310 = vmatprep.mubr.bf16.mxu0 %v8923_v9  ;;  %v6527_v5 = vld [vmem:[%s8597_s8 + $0x38] sm:$0xff]  }
 0x250   :  { %1280 = vmatprep.subr.bf16.mxu0 %v5830_v6  ;;  %4544 = vmatpush3.bf16.msra.mxu1 %v6527_v5  ;;  %v6534_v6 = vld [vmem:[%s8598_s7] ss:$0 sm:$0xff] }
 0x251   :  { %4549 = vmatprep.subr.bf16.mxu1 %v8922_v3  ;;  %8956 = vst [vmem:[#allocation70_spill] sm:$0xff] %v6534_v6 }
 0x253   :  { %1281 = vmatpush1.bf16.msra.mxu0 %v5839_v7 }
 0x254   :  { %1282 = vmatprep.subr.bf16.mxu0 %v5846_v8 }
 0x257   :  { %1283 = vmatpush1.bf16.msra.mxu0 %v5855_v10 }
 0x258   :  { %1284 = vmatprep.subr.bf16.mxu0 %v5861_v11 }
 0x25b   :  { %1285 = vmatpush1.bf16.msra.mxu0 %v5871_v13 }
 0x25c   :  { %1286 = vmatprep.subr.bf16.mxu0 %v5878_v14 }
 0x25f   :  { %1287 = vmatpush1.bf16.msra.mxu0 %v5893_v18 }
 0x260   :  { %1288 = vmatprep.subr.bf16.mxu0 %v5899_v19 }
 0x263   :  { %1289 = vmatpush1.bf16.msra.mxu0 %v5915_v21 }
 0x264   :  { %1290 = vmatprep.subr.bf16.mxu0 %v5922_v22 }
 0x267   :  { %1291 = vmatpush1.bf16.msra.mxu0 %v5938_v25  ;;  %v8957_v25 = vld [vmem:[#allocation3_spill] sm:$0xff] }
 0x268   :  { %1292 = vmatprep.subr.bf16.mxu0 %v5944_v26  ;;  %v8958_v26 = vld [vmem:[#allocation4_spill] sm:$0xff] }
 0x26b   :  { %1293 = vmatpush1.bf16.msra.mxu0 %v5961_v28  ;;  %v8960_v28 = vld [vmem:[#allocation6_spill] sm:$0xff] }
 0x26c   :  { %1381 = vmatprep.subr.bf16.mxu0 %v6009_v35  ;;  %v8965_v35 = vld [vmem:[#allocation11_spill] sm:$0xff] }
 0x26e   :  { %1311 = vmatmul.mubr.bf16.vlgmr.msra.gmra.mrb[28].mxu0 %v6221_v1 }
 0x26f   :  { %1382 = vmatpush1.bf16.msra.mxu0 %v6014_v36  ;;  %1413 = vmatprep.mubr.bf16.mxu0 %v8923_v9  ;;  %v6579_v36 = vld [vmem:[%s8599_s9] ss:$0 sm:$0xff] }
 0x270   :  { %1383 = vmatprep.subr.bf16.mxu0 %v6027_v38  ;;  %8966 = vst [vmem:[#allocation3_spill] sm:$0xff] %v6579_v36 }
 0x273   :  { %1384 = vmatpush1.bf16.msra.mxu0 %v6032_v39 }
 0x274   :  { %1385 = vmatprep.subr.bf16.mxu0 %v6043_v41 }
 0x277   :  { %1386 = vmatpush1.bf16.msra.mxu0 %v6052_v42 }
 0x278   :  { %1387 = vmatprep.subr.bf16.mxu0 %v6065_v44 }
 0x27b   :  { %1388 = vmatpush1.bf16.msra.mxu0 %v6070_v45 }
 0x27c   :  { %1389 = vmatprep.subr.bf16.mxu0 %v6084_v47 }
 0x27f   :  { %1390 = vmatpush1.bf16.msra.mxu0 %v6089_v48 }
 0x280   :  { %1391 = vmatprep.subr.bf16.mxu0 %v6101_v50 }
 0x283   :  { %1392 = vmatpush1.bf16.msra.mxu0 %v6107_v51 }
 0x284   :  { %1393 = vmatprep.subr.bf16.mxu0 %v6119_v53 }
 0x287   :  { %1394 = vmatpush1.bf16.msra.mxu0 %v6125_v54 }
 0x288   :  { %1395 = vmatprep.subr.bf16.mxu0 %v6135_v56 }
 0x28b   :  { %1396 = vmatpush1.bf16.msra.mxu0 %v6144_v57 }
 0x28c   :  { %1462 = vmatprep.subr.bf16.mxu0 %v6154_v59 }
 0x321   :  { %v1169_v7 = vpop.f32.mrb[24].mxu0 }
 0x322   :  { %v1170_v8 = vadd.f32 %v6534_v6, %v1169_v7  ;;  %v4527_v10 = vpop.f32.mrb[25].mxu0  ;;  %v8977_v7 = vld [vmem:[#allocation40_spill] sm:$0xff] }
 0x323   :  { %v1172_v11 = vpop.f32.mrb[26].mxu0  ;;  %v8979_v10 = vld [vmem:[#allocation42_spill] sm:$0xff] }
 0x324   :  { %v1175_v13 = vmax.f32 %v1170_v8, 0.0  ;;  %v4528_v14 = vpop.f32.mrb[27].mxu0  ;;  %v8978_v8 = vld [vmem:[#allocation41_spill] sm:$0xff]  ;;  %v8980_v11 = vld [vmem:[#allocation43_spill] sm:$0xff] }
 0x325   :  { %v8982_v14 = vld [vmem:[#allocation45_spill] sm:$0xff] }
 0x326   :  { %v1176_v18 = vpack.c.bf16 %v1175_v13, %v1175_v13  ;;  %v8981_v13 = vld [vmem:[#allocation44_spill] sm:$0xff] }
 0x328   :  { %4546 = vmatmul.mubr.bf16.vlgmr.msra.gmra.mrb[20].mxu1 %v1176_v18  ;;  %v8983_v18 = vld [vmem:[#allocation46_spill] sm:$0xff] }
 0x329   :  { %4550 = vmatpush3.bf16.msra.mxu1 %v5883_v15  ;;  %4565 = vmatprep.mubr.msk.bf16.mxu1 %vm5746_vm1, %v8922_v3 }
 0x32a   :  { %4551 = vmatprep.subr.bf16.mxu1 %v8922_v3 }
 0x32d   :  { %4552 = vmatpush3.bf16.msra.mxu1 %v5906_v20 }
 0x32e   :  { %4553 = vmatprep.subr.bf16.mxu1 %v8922_v3 }
 0x331   :  { %4554 = vmatpush3.bf16.msra.mxu1 %v5928_v23 }
 0x332   :  { %4555 = vmatprep.subr.bf16.mxu1 %v8922_v3 }
 0x335   :  { %4556 = vmatpush3.bf16.msra.mxu1 %v5951_v27  ;;  %v8959_v27 = vld [vmem:[#allocation5_spill] sm:$0xff] }
 0x336   :  { %4557 = vmatprep.subr.bf16.mxu1 %v8922_v3 }
 0x339   :  { %4558 = vmatpush3.bf16.msra.mxu1 %v5974_v30  ;;  %v8961_v30 = vld [vmem:[#allocation7_spill] sm:$0xff] }
 0x33a   :  { %4559 = vmatprep.subr.bf16.mxu1 %v8922_v3 }
 0x33d   :  { %4560 = vmatpush3.bf16.msra.mxu1 %v5984_v32  ;;  %v8962_v32 = vld [vmem:[#allocation8_spill] sm:$0xff] }
 0x33e   :  { %4561 = vmatprep.subr.bf16.mxu1 %v8922_v3 }
 0x341   :  { %v1312_v15 = vpop.f32.mrb[28].mxu0  ;;  %4562 = vmatpush3.bf16.msra.mxu1 %v5992_v33  ;;  %v8963_v33 = vld [vmem:[#allocation9_spill] sm:$0xff] }
 0x342   :  { %v1359_v19 = vadd.f32 %v1312_v15, %v6164_v62  ;;  %v1314_v20 = vpop.f32.mrb[29].mxu0  ;;  %4563 = vmatprep.subr.bf16.mxu1 %v8922_v3  ;;  %v8984_v15 = vld [vmem:[#allocation47_spill] sm:$0xff] }
 0x343   :  { %v1366_v21 = vadd.f32 %v1314_v20, %v6166_v63  ;;  %v1316_v22 = vpop.f32.mrb[30].mxu0  ;;  %v8967_v63 = vld [vmem:[#allocation20_spill] sm:$0xff]  ;;  %v8986_v20 = vld [vmem:[#allocation49_spill] sm:$0xff] }
 0x344   :  { %v1317_v23 = vpop.f32.mrb[31].mxu0  ;;  %v4038_v39 = vmul.f32 -1.442695, %v1359_v19  ;;  %v8985_v19 = vld [vmem:[#allocation48_spill] sm:$0xff]  ;;  %v8988_v22 = vld [vmem:[#allocation51_spill] sm:$0xff] }
 0x345   :  { %4564 = vmatpush3.bf16.msra.mxu1 %v8957_v25  ;;  %v4039_v47 = vmul.f32 -1.442695, %v1366_v21  ;;  %v8987_v21 = vld [vmem:[#allocation50_spill] sm:$0xff]  ;;  %v8989_v23 = vld [vmem:[#allocation52_spill] sm:$0xff]  ;;  %v8990_v25 = vld [vmem:[#allocation53_spill] sm:$0xff] }
 0x346   :  { %4569 = vmatprep.subr.bf16.mxu1 %v8922_v3  ;;  %5424 = vpow2.f32 %v4038_v39  ;;  %v9001_v39 = vld [vmem:[#allocation67_spill] sm:$0xff] }
 0x347   :  { %5426 = vpow2.f32 %v4039_v47  ;;  %v9006_v47 = vld [vmem:[#allocation62_spill] sm:$0xff] }
 0x348   :  { %4566 = vmatmul.mubr.bf16.vlgmr.msra.gmra.mrb[24].mxu1 %v6221_v1 }
 0x349   :  { %4570 = vmatpush3.bf16.msra.mxu1 %v8958_v26  ;;  %4585 = vmatprep.mubr.msk.bf16.mxu1 %vm5746_vm1, %v8922_v3  ;;  %v8991_v26 = vld [vmem:[#allocation54_spill] sm:$0xff] }
 0x34a   :  { %4571 = vmatprep.subr.bf16.mxu1 %v8922_v3 }
 0x34d   :  { %4572 = vmatpush3.bf16.msra.mxu1 %v8959_v27  ;;  %v8992_v27 = vld [vmem:[#allocation55_spill] sm:$0xff] }
 0x34e   :  { %4573 = vmatprep.subr.bf16.mxu1 %v8922_v3 }
 0x350   :  { %v5425_v48 = vpop.eup %5424 }
 0x351   :  { %4574 = vmatpush3.bf16.msra.mxu1 %v8960_v28  ;;  %v1363_v50 = vadd.f32 1.0, %v5425_v48  ;;  %v5427_v51 = vpop.eup %5426  ;;  %v8993_v28 = vld [vmem:[#allocation63_spill] sm:$0xff] }
 0x352   :  { %4575 = vmatprep.subr.bf16.mxu1 %v8922_v3  ;;  %v1370_v53 = vadd.f32 1.0, %v5427_v51  ;;  %v6668_v48 = vld [vmem:[%s8592_s3 + $0x4] ss:$12 sps:$4 sm:$0xff]  }
 0x353   :  { %5428 = vrcp.f32 %v1363_v50 }
 0x354   :  { %5430 = vrcp.f32 %v1370_v53 }
 0x355   :  { %4576 = vmatpush3.bf16.msra.mxu1 %v8961_v30  ;;  %v8994_v30 = vld [vmem:[#allocation56_spill] sm:$0xff] }
 0x356   :  { %4577 = vmatprep.subr.bf16.mxu1 %v8922_v3 }
 0x359   :  { %4578 = vmatpush3.bf16.msra.mxu1 %v8962_v32  ;;  %v8995_v32 = vld [vmem:[#allocation64_spill] sm:$0xff] }
 0x35a   :  { %4579 = vmatprep.subr.bf16.mxu1 %v8922_v3 }
 0x35d   :  { %4580 = vmatpush3.bf16.msra.mxu1 %v8963_v33  ;;  %v5429_v54 = vpop.eup %5428  ;;  %v8997_v33 = vld [vmem:[#allocation65_spill] sm:$0xff] }
 0x35e   :  { %4581 = vmatprep.subr.bf16.mxu1 %v8922_v3  ;;  %v5431_v37 = vpop.eup %5430 }
 0x35f   :  { %v1376_v1 = vsub.f32 1.0, %v5431_v37  ;;  %v1378_v12 = vmul.f32 %v5431_v37, %v8968_v55 }
 0x361   :  { %4582 = vmatpush3.bf16.msra.mxu1 %v8964_v34  ;;  %v8998_v34 = vld [vmem:[#allocation58_spill] sm:$0xff] }
 0x362   :  { %4583 = vmatprep.subr.bf16.mxu1 %v8922_v3 }
 0x365   :  { %4584 = vmatpush3.bf16.msra.mxu1 %v8965_v35  ;;  %v8999_v35 = vld [vmem:[#allocation66_spill] sm:$0xff] }
 0x366   :  { %4589 = vmatprep.subr.bf16.mxu1 %v8922_v3 }
 0x3fb   :  { %v1265_v38 = vpop.f32.mrb[20].mxu1 }
 0x3fc   :  { %v1266_v41 = vadd.f32 %v6579_v36, %v1265_v38  ;;  %v4547_v42 = vpop.f32.mrb[21].mxu1  ;;  %v9000_v38 = vld [vmem:[#allocation59_spill] sm:$0xff] }
 0x3fd   :  { %v1268_v44 = vpop.f32.mrb[22].mxu1  ;;  %v9003_v42 = vld [vmem:[#allocation68_spill] sm:$0xff] }
 0x3fe   :  { %1271 = vst [vmem:[%s8600_s10] sm:$0xff] %v1266_v41  ;;  %v4548_v45 = vpop.f32.mrb[23].mxu1  ;;  %v9002_v41 = vld [vmem:[#allocation60_spill] sm:$0xff]  ;;  %v9004_v44 = vld [vmem:[#allocation61_spill] sm:$0xff] }
 0x3ff   :  { %v9005_v45 = vld [vmem:[#allocation69_spill] sm:$0xff] }
 0x41b   :  { %v1353_v56 = vpop.f32.mrb[24].mxu1 }
 0x41c   :  { %v1373_v57 = vmul.f32 %v5429_v54, %v1353_v56  ;;  %v4567_v59 = vpop.f32.mrb[25].mxu1 }
 0x41d   :  { %v1356_v62 = vpop.f32.mrb[26].mxu1 }
 0x41e   :  { %v1374_v0 = vadd.f32 %v1373_v57, %v8967_v63  ;;  %v4568_v40 = vpop.f32.mrb[27].mxu1 }
 0x420   :  { %5432 = vtanh.f32 %v1374_v0 }
 0x42a   :  { %v5433_v29 = vpop.eup %5432 }
 0x42b   :  { %v1377_v43 = vmul.f32 %v5433_v29, %v1376_v1 }
 0x42d   :  { %v6587_v60 = vadd.f32 %v1378_v12, %v1377_v43 }
 0x42f   :  { %v6591_v49 = vpack.c.bf16 %v6587_v60, %v6587_v60 }
 0x431   :  { %1414 = vmatmul.mubr.bf16.vlgmr.msra.gmra.mrb[32].mxu0 %v6591_v49  ;;  %4586 = vmatmul.mubr.bf16.vlgmr.msra.gmra.mrb[28].mxu1 %v6591_v49 }
 0x432   :  { %1463 = vmatpush1.bf16.msra.mxu0 %v8969_v58  ;;  %4590 = vmatpush3.bf16.msra.mxu1 %v8970_v17 }
 0x433   :  { %1464 = vmatprep.subr.bf16.mxu0 %v8971_v61  ;;  %4591 = vmatprep.subr.bf16.mxu1 %v8922_v3 }
 0x434   :  { %1494 = vmatprep.mubr.bf16.mxu0 %v8923_v9  ;;  %4605 = vmatprep.mubr.msk.bf16.mxu1 %vm5746_vm1, %v8922_v3 }
 0x436   :  { %1465 = vmatpush1.bf16.msra.mxu0 %v8972_v4  ;;  %4592 = vmatpush3.bf16.msra.mxu1 %v8973_v46 }
 0x437   :  { %1466 = vmatprep.subr.bf16.mxu0 %v8974_v31  ;;  %4593 = vmatprep.subr.bf16.mxu1 %v8922_v3 }
 0x43a   :  { %1467 = vmatpush1.bf16.msra.mxu0 %v8975_v24  ;;  %4594 = vmatpush3.bf16.msra.mxu1 %v8976_v16 }
 0x43b   :  { %1468 = vmatprep.subr.bf16.mxu0 %v8977_v7  ;;  %4595 = vmatprep.subr.bf16.mxu1 %v8922_v3 }
 0x43e   :  { %1469 = vmatpush1.bf16.msra.mxu0 %v8978_v8  ;;  %4596 = vmatpush3.bf16.msra.mxu1 %v8979_v10 }
 0x43f   :  { %1470 = vmatprep.subr.bf16.mxu0 %v8980_v11  ;;  %4597 = vmatprep.subr.bf16.mxu1 %v8922_v3  ;;  %v6684_v11 = vld [vmem:[%s8592_s3] ss:$12 sps:$4 sm:$0xff]  }
 0x442   :  { %1471 = vmatpush1.bf16.msra.mxu0 %v8981_v13  ;;  %4598 = vmatpush3.bf16.msra.mxu1 %v8982_v14  ;;  %v6697_v13 = vld [vmem:[%s8592_s3 + $0x18] ss:$12 sps:$4 sm:$0xff]   ;;  %v6703_v14 = vld [vmem:[%s8592_s3 + $0x34] ss:$12 sps:$4 sm:$0xff]  }
 0x443   :  { %1472 = vmatprep.subr.bf16.mxu0 %v8983_v18  ;;  %4599 = vmatprep.subr.bf16.mxu1 %v8922_v3 }
 0x446   :  { %1473 = vmatpush1.bf16.msra.mxu0 %v8984_v15  ;;  %4600 = vmatpush3.bf16.msra.mxu1 %v8985_v19 }
 0x447   :  { %1474 = vmatprep.subr.bf16.mxu0 %v8986_v20  ;;  %4601 = vmatprep.subr.bf16.mxu1 %v8922_v3 }
 0x44a   :  { %1475 = vmatpush1.bf16.msra.mxu0 %v8987_v21  ;;  %4602 = vmatpush3.bf16.msra.mxu1 %v8988_v22 }
 0x44b   :  { %1476 = vmatprep.subr.bf16.mxu0 %v8989_v23  ;;  %4603 = vmatprep.subr.bf16.mxu1 %v8922_v3 }
 0x44e   :  { %1477 = vmatpush1.bf16.msra.mxu0 %v8990_v25  ;;  %4604 = vmatpush3.bf16.msra.mxu1 %v8991_v26 }
 0x44f   :  { %4609 = vmatprep.subr.bf16.mxu0 %v8922_v3  ;;  %4629 = vmatprep.subr.bf16.mxu1 %v8922_v3 }
 0x451   :  { %1495 = vmatmul.mubr.bf16.vlgmr.msra.gmra.mrb[32].mxu0 %v6486_v2  ;;  %4606 = vmatmul.mubr.bf16.vlgmr.msra.gmra.mrb[32].mxu1 %v6486_v2  ;;  %v8996_v2 = vld [vmem:[#allocation57_spill] sm:$0xff] }
 0x452   :  { %4610 = vmatpush3.bf16.msra.mxu0 %v8992_v27  ;;  %4625 = vmatprep.mubr.msk.bf16.mxu0 %vm5746_vm1, %v8922_v3 }
 0x453   :  { %4611 = vmatprep.subr.bf16.mxu0 %v8922_v3  ;;  %4630 = vmatpush3.bf16.msra.mxu1 %v8993_v28 }
 0x454   :  { %4631 = vmatprep.subr.bf16.mxu1 %v8922_v3  ;;  %4645 = vmatprep.mubr.msk.bf16.mxu1 %vm5746_vm1, %v8922_v3 }
 0x456   :  { %4612 = vmatpush3.bf16.msra.mxu0 %v8994_v30 }
 0x457   :  { %4613 = vmatprep.subr.bf16.mxu0 %v8922_v3  ;;  %4632 = vmatpush3.bf16.msra.mxu1 %v8995_v32 }
 0x458   :  { %4633 = vmatprep.subr.bf16.mxu1 %v8922_v3 }
 0x45a   :  { %4614 = vmatpush3.bf16.msra.mxu0 %v8996_v2 }
 0x45b   :  { %4615 = vmatprep.subr.bf16.mxu0 %v8922_v3  ;;  %4634 = vmatpush3.bf16.msra.mxu1 %v8997_v33 }
 0x45c   :  { %4635 = vmatprep.subr.bf16.mxu1 %v8922_v3 }
 0x45e   :  { %4616 = vmatpush3.bf16.msra.mxu0 %v8998_v34 }
 0x45f   :  { %4617 = vmatprep.subr.bf16.mxu0 %v8922_v3  ;;  %4636 = vmatpush3.bf16.msra.mxu1 %v8999_v35 }
 0x460   :  { %4637 = vmatprep.subr.bf16.mxu1 %v8922_v3 }
 0x462   :  { %4618 = vmatpush3.bf16.msra.mxu0 %v9000_v38 }
 0x463   :  { %4619 = vmatprep.subr.bf16.mxu0 %v8922_v3  ;;  %4638 = vmatpush3.bf16.msra.mxu1 %v9001_v39 }
 0x464   :  { %4639 = vmatprep.subr.bf16.mxu1 %v8922_v3 }
 0x466   :  { %4620 = vmatpush3.bf16.msra.mxu0 %v9002_v41 }
 0x467   :  { %4621 = vmatprep.subr.bf16.mxu0 %v8922_v3  ;;  %4640 = vmatpush3.bf16.msra.mxu1 %v9003_v42 }
 0x468   :  { %4641 = vmatprep.subr.bf16.mxu1 %v8922_v3 }
 0x46a   :  { %4622 = vmatpush3.bf16.msra.mxu0 %v9004_v44 }
 0x46b   :  { %4623 = vmatprep.subr.bf16.mxu0 %v8922_v3  ;;  %4642 = vmatpush3.bf16.msra.mxu1 %v9005_v45 }
 0x46c   :  { %4643 = vmatprep.subr.bf16.mxu1 %v8922_v3 }
 0x46e   :  { %4624 = vmatpush3.bf16.msra.mxu0 %v9006_v47 }
 0x46f   :  { %1655 = vmatprep.subr.bf16.mxu0 %v6668_v48  ;;  %4644 = vmatpush3.bf16.msra.mxu1 %v6527_v5 }
 0x470   :  { %4649 = vmatprep.subr.bf16.mxu1 %v8922_v3 }
 0x504   :  { %v1456_v50 = vpop.f32.mrb[28].mxu1 }
 0x505   :  { %v4587_v51 = vpop.f32.mrb[29].mxu1 }
 0x506   :  { %v1459_v53 = vpop.f32.mrb[30].mxu1  ;;  %v6715_v51 = vld [vmem:[%s8592_s3 + $0x4c] ss:$12 sps:$4 sm:$0xff]  }
 0x507   :  { %v4588_v54 = vpop.f32.mrb[31].mxu1  ;;  %v6721_v53 = vld [vmem:[%s8592_s3 + $0x48] ss:$12 sps:$4 sm:$0xff]  }
 0x508   :  { %v6727_v54 = vld [vmem:[%s8592_s3 + $0x64] ss:$12 sps:$4 sm:$0xff]  }
 0x524   :  { %v1496_v56 = vpop.f32.mrb[32].mxu0  ;;  %v1537_v57 = vpop.f32.mrb[32].mxu1 }
 0x525   :  { %v4040_v59 = vmul.f32 -1.442695, %v1496_v56  ;;  %v1498_v62 = vpop.f32.mrb[33].mxu0  ;;  %v4607_v63 = vpop.f32.mrb[33].mxu1  ;;  %v6733_v56 = vld [vmem:[%s8592_s3 + $0x60] ss:$12 sps:$4 sm:$0xff]  }
 0x526   :  { %v1500_v0 = vpop.f32.mrb[34].mxu0  ;;  %v1540_v40 = vpop.f32.mrb[34].mxu1  ;;  %v4041_v29 = vmul.f32 -1.442695, %v1498_v62  ;;  %v6751_v62 = vld [vmem:[%s8592_s3 + $0x94] ss:$12 sps:$4 sm:$0xff]  }
 0x527   :  { %5434 = vpow2.f32 %v4040_v59  ;;  %v1501_v37 = vpop.f32.mrb[35].mxu0  ;;  %v4608_v1 = vpop.f32.mrb[35].mxu1  ;;  %v6745_v59 = vld [vmem:[%s8592_s3 + $0x78] ss:$12 sps:$4 sm:$0xff]   ;;  %v6757_v63 = vld [vmem:[%s8592_s3 + $0x90] ss:$12 sps:$4 sm:$0xff]  }
 0x528   :  { %5436 = vpow2.f32 %v4041_v29  ;;  %v6763_v0 = vld [vmem:[%s8592_s3 + $0xac] ss:$12 sps:$4 sm:$0xff]   ;;  %v6769_v40 = vld [vmem:[%s8592_s3 + $0xa8] ss:$12 sps:$4 sm:$0xff]   ;;  %v6775_v37 = vld [vmem:[%s8594_s4 + $0x4] ss:$12 sps:$4 sm:$0xff]  }
 0x529   :  { %v6782_v1 = vld [vmem:[%s8594_s4] ss:$12 sps:$4 sm:$0xff]   ;;  %v6789_v29 = vld [vmem:[%s8594_s4 + $0x1c] ss:$12 sps:$4 sm:$0xff]  }
 0x52a   :  { %9007 = vst [vmem:[#allocation4_spill] sm:$0xff] %v6782_v1  ;;  %9008 = vst [vmem:[#allocation5_spill] sm:$0xff] %v6789_v29 }
 0x531   :  { %v5435_v43 = vpop.eup %5434 }
 0x532   :  { %v1547_v55 = vadd.f32 1.0, %v5435_v43  ;;  %v5437_v12 = vpop.eup %5436  ;;  %v6795_v43 = vld [vmem:[%s8594_s4 + $0x18] ss:$12 sps:$4 sm:$0xff]  }
 0x533   :  { %v1554_v58 = vadd.f32 1.0, %v5437_v12  ;;  %9009 = vst [vmem:[#allocation6_spill] sm:$0xff] %v6795_v43  ;;  %v6807_v12 = vld [vmem:[%s8594_s4 + $0x30] ss:$12 sps:$4 sm:$0xff]  }
 0x534   :  { %5438 = vrcp.f32 %v1547_v55  ;;  %v6801_v55 = vld [vmem:[%s8594_s4 + $0x34] ss:$12 sps:$4 sm:$0xff]   ;;  %9011 = vst [vmem:[#allocation8_spill] sm:$0xff] %v6807_v12 }
 0x535   :  { %5440 = vrcp.f32 %v1554_v58  ;;  %9010 = vst [vmem:[#allocation7_spill] sm:$0xff] %v6801_v55  ;;  %v6813_v58 = vld [vmem:[%s8594_s4 + $0x4c] ss:$12 sps:$4 sm:$0xff]  }
 0x536   :  { %9012 = vst [vmem:[#allocation9_spill] sm:$0xff] %v6813_v58 }
 0x53e   :  { %v5439_v17 = vpop.eup %5438 }
 0x53f   :  { %v1557_v61 = vmul.f32 %v5439_v17, %v1537_v57  ;;  %v5441_v46 = vpop.eup %5440  ;;  %v6739_v57 = vld [vmem:[%s8592_s3 + $0x7c] ss:$12 sps:$4 sm:$0xff]  }
 0x540   :  { %v1560_v31 = vsub.f32 1.0, %v5441_v46  ;;  %v1562_v7 = vmul.f32 %v5441_v46, %v6482_v52  ;;  %v6691_v52 = vld [vmem:[%s8592_s3 + $0x1c] ss:$12 sps:$4 sm:$0xff]  }
 0x541   :  { %v1558_v4 = vadd.f32 %v1557_v61, %v1456_v50  ;;  %v6709_v50 = vld [vmem:[%s8592_s3 + $0x30] ss:$12 sps:$4 sm:$0xff]   ;;  %v6819_v17 = vld [vmem:[%s8594_s4 + $0x48] ss:$12 sps:$4 sm:$0xff]  }
 0x542   :  { %9013 = vst [vmem:[#allocation10_spill] sm:$0xff] %v6819_v17  ;;  %v6825_v61 = vld [vmem:[%s8594_s4 + $0x64] ss:$12 sps:$4 sm:$0xff]   ;;  %v6837_v46 = vld [vmem:[%s8594_s4 + $0x7c] ss:$12 sps:$4 sm:$0xff]  }
 0x543   :  { %5442 = vtanh.f32 %v1558_v4  ;;  %9014 = vst [vmem:[#allocation11_spill] sm:$0xff] %v6825_v61  ;;  %v6831_v4 = vld [vmem:[%s8594_s4 + $0x60] ss:$12 sps:$4 sm:$0xff]   ;;  %9016 = vst [vmem:[#allocation31_spill] sm:$0xff] %v6837_v46 }
 0x544   :  { %9015 = vst [vmem:[#allocation20_spill] sm:$0xff] %v6831_v4 }
 0x54d   :  { %v5443_v24 = vpop.eup %5442 }
 0x54e   :  { %v1561_v16 = vmul.f32 %v5443_v24, %v1560_v31  ;;  %v6843_v31 = vld [vmem:[%s8594_s4 + $0x78] ss:$12 sps:$4 sm:$0xff]   ;;  %v6849_v24 = vld [vmem:[%s8594_s4 + $0x94] ss:$12 sps:$4 sm:$0xff]  }
 0x54f   :  { %9017 = vst [vmem:[#allocation32_spill] sm:$0xff] %v6843_v31  ;;  %9018 = vst [vmem:[#allocation33_spill] sm:$0xff] %v6849_v24 }
 0x550   :  { %v6674_v8 = vadd.f32 %v1562_v7, %v1561_v16  ;;  %v6855_v16 = vld [vmem:[%s8594_s4 + $0x90] ss:$12 sps:$4 sm:$0xff]   ;;  %v6861_v7 = vld [vmem:[%s8594_s4 + $0xac] ss:$12 sps:$4 sm:$0xff]  }
 0x551   :  { %9019 = vst [vmem:[#allocation34_spill] sm:$0xff] %v6855_v16  ;;  %9020 = vst [vmem:[#allocation35_spill] sm:$0xff] %v6861_v7 }
 0x552   :  { %v6678_v10 = vpack.c.bf16 %v6674_v8, %v6674_v8 }
 0x554   :  { %4626 = vmatmul.mubr.bf16.vlgmr.msra.gmra.mrb[36].mxu0 %v6678_v10 }
 0x555   :  { %1656 = vmatpush1.bf16.msra.mxu0 %v6684_v11  ;;  %1687 = vmatprep.mubr.bf16.mxu0 %v8923_v9 }
 0x556   :  { %1657 = vmatprep.subr.bf16.mxu0 %v6691_v52 }
 0x559   :  { %1658 = vmatpush1.bf16.msra.mxu0 %v6697_v13 }
 0x55a   :  { %1659 = vmatprep.subr.bf16.mxu0 %v6703_v14 }
 0x55d   :  { %1660 = vmatpush1.bf16.msra.mxu0 %v6709_v50 }
 0x55e   :  { %1661 = vmatprep.subr.bf16.mxu0 %v6715_v51 }
 0x561   :  { %1662 = vmatpush1.bf16.msra.mxu0 %v6721_v53 }
 0x562   :  { %1663 = vmatprep.subr.bf16.mxu0 %v6727_v54 }
 0x565   :  { %1664 = vmatpush1.bf16.msra.mxu0 %v6733_v56 }
 0x566   :  { %1665 = vmatprep.subr.bf16.mxu0 %v6739_v57 }
 0x569   :  { %1666 = vmatpush1.bf16.msra.mxu0 %v6745_v59 }
 0x56a   :  { %1667 = vmatprep.subr.bf16.mxu0 %v6751_v62 }
 0x56d   :  { %1668 = vmatpush1.bf16.msra.mxu0 %v6757_v63 }
 0x56e   :  { %1669 = vmatprep.subr.bf16.mxu0 %v6763_v0 }
 0x571   :  { %1670 = vmatpush1.bf16.msra.mxu0 %v6769_v40 }
 0x572   :  { %1758 = vmatprep.subr.bf16.mxu0 %v6775_v37 }
 0x574   :  { %1688 = vmatmul.mubr.bf16.vlgmr.msra.gmra.mrb[40].mxu0 %v6591_v49 }
 0x575   :  { %1759 = vmatpush1.bf16.msra.mxu0 %v6782_v1  ;;  %1790 = vmatprep.mubr.bf16.mxu0 %v8923_v9 }
 0x576   :  { %1760 = vmatprep.subr.bf16.mxu0 %v6789_v29 }
 0x579   :  { %1761 = vmatpush1.bf16.msra.mxu0 %v6795_v43 }
 0x57a   :  { %1762 = vmatprep.subr.bf16.mxu0 %v6801_v55 }
 0x57d   :  { %1763 = vmatpush1.bf16.msra.mxu0 %v6807_v12 }
 0x57e   :  { %1764 = vmatprep.subr.bf16.mxu0 %v6813_v58 }
 0x581   :  { %1765 = vmatpush1.bf16.msra.mxu0 %v6819_v17 }
 0x582   :  { %1766 = vmatprep.subr.bf16.mxu0 %v6825_v61 }
 0x585   :  { %1767 = vmatpush1.bf16.msra.mxu0 %v6831_v4 }
 0x586   :  { %1768 = vmatprep.subr.bf16.mxu0 %v6837_v46 }
 0x589   :  { %1769 = vmatpush1.bf16.msra.mxu0 %v6843_v31  ;;  %v6867_v31 = vld [vmem:[%s8594_s4 + $0xa8] ss:$12 sps:$4 sm:$0xff]  }
 0x58a   :  { %1770 = vmatprep.subr.bf16.mxu0 %v6849_v24  ;;  %9021 = vst [vmem:[#allocation36_spill] sm:$0xff] %v6867_v31  ;;  %v6873_v24 = vld [vmem:[%s8595_s5 + $0x4] ss:$12 sps:$4 sm:$0xff]  }
 0x58b   :  { %9022 = vst [vmem:[#allocation37_spill] sm:$0xff] %v6873_v24 }
 0x58d   :  { %1771 = vmatpush1.bf16.msra.mxu0 %v6855_v16 }
 0x58e   :  { %1772 = vmatprep.subr.bf16.mxu0 %v6861_v7 }
 0x591   :  { %1773 = vmatpush1.bf16.msra.mxu0 %v6867_v31  ;;  %v6880_v31 = vld [vmem:[%s8592_s3 + $0x8] ss:$12 sps:$4 sm:$0xff]  }
 0x592   :  { %1839 = vmatprep.subr.bf16.mxu0 %v6873_v24  ;;  %9023 = vst [vmem:[#allocation38_spill] sm:$0xff] %v6880_v31 }
 0x627   :  { %v1599_v16 = vpop.f32.mrb[36].mxu0 }
 0x628   :  { %v1600_v46 = vadd.f32 %v6534_v6, %v1599_v16  ;;  %v4627_v4 = vpop.f32.mrb[37].mxu0 }
 0x629   :  { %v1602_v61 = vpop.f32.mrb[38].mxu0  ;;  %v6910_v4 = vld [vmem:[%s8592_s3 + $0x68] ss:$12 sps:$4 sm:$0xff]  }
 0x62a   :  { %v1605_v7 = vmax.f32 %v1600_v46, 0.0  ;;  %v4628_v17 = vpop.f32.mrb[39].mxu0  ;;  %v6889_v61 = vld [vmem:[%s8592_s3 + $0x20] ss:$12 sps:$4 sm:$0xff]   ;;  %9027 = vst [vmem:[#allocation42_spill] sm:$0xff] %v6910_v4 }
 0x62b   :  { %9024 = vst [vmem:[#allocation39_spill] sm:$0xff] %v6889_v61  ;;  %v6903_v17 = vld [vmem:[%s8592_s3 + $0x50] ss:$12 sps:$4 sm:$0xff]   ;;  %v6917_v46 = vld [vmem:[%s8592_s3 + $0x80] ss:$12 sps:$4 sm:$0xff]  }
 0x62c   :  { %v1606_v58 = vpack.c.bf16 %v1605_v7, %v1605_v7  ;;  %9026 = vst [vmem:[#allocation41_spill] sm:$0xff] %v6903_v17  ;;  %9028 = vst [vmem:[#allocation43_spill] sm:$0xff] %v6917_v46  ;;  %v6924_v7 = vld [vmem:[%s8592_s3 + $0x98] ss:$12 sps:$4 sm:$0xff]  }
 0x62d   :  { %9029 = vst [vmem:[#allocation44_spill] sm:$0xff] %v6924_v7 }
 0x62e   :  { %4646 = vmatmul.mubr.bf16.vlgmr.msra.gmra.mrb[36].mxu1 %v1606_v58  ;;  %v6896_v58 = vld [vmem:[%s8592_s3 + $0x38] ss:$12 sps:$4 sm:$0xff]  }
 0x62f   :  { %4650 = vmatpush3.bf16.msra.mxu1 %v6880_v31  ;;  %4665 = vmatprep.mubr.msk.bf16.mxu1 %vm5746_vm1, %v8922_v3  ;;  %9025 = vst [vmem:[#allocation40_spill] sm:$0xff] %v6896_v58 }
 0x630   :  { %4651 = vmatprep.subr.bf16.mxu1 %v8922_v3 }
 0x633   :  { %4652 = vmatpush3.bf16.msra.mxu1 %v6889_v61  ;;  %v9031_v61 = vld [vmem:[#allocation13_spill] sm:$0xff] }
 0x634   :  { %4653 = vmatprep.subr.bf16.mxu1 %v8922_v3 }
 0x637   :  { %4654 = vmatpush3.bf16.msra.mxu1 %v6896_v58 }
 0x638   :  { %4655 = vmatprep.subr.bf16.mxu1 %v8922_v3 }
 0x63b   :  { %4656 = vmatpush3.bf16.msra.mxu1 %v6903_v17 }
 0x63c   :  { %4657 = vmatprep.subr.bf16.mxu1 %v8922_v3 }
 0x63f   :  { %4658 = vmatpush3.bf16.msra.mxu1 %v6910_v4  ;;  %v9030_v4 = vld [vmem:[#allocation12_spill] sm:$0xff] }
 0x640   :  { %4659 = vmatprep.subr.bf16.mxu1 %v8922_v3 }
 0x643   :  { %4660 = vmatpush3.bf16.msra.mxu1 %v6917_v46  ;;  %v6933_v46 = vld [vmem:[%s8592_s3 + $0xb0] ss:$12 sps:$4 sm:$0xff]  }
 0x644   :  { %4661 = vmatprep.subr.bf16.mxu1 %v8922_v3  ;;  %9032 = vst [vmem:[#allocation45_spill] sm:$0xff] %v6933_v46 }
 0x647   :  { %v1689_v16 = vpop.f32.mrb[40].mxu0  ;;  %4662 = vmatpush3.bf16.msra.mxu1 %v6924_v7 }
 0x648   :  { %v1736_v17 = vadd.f32 %v1689_v16, %v9030_v4  ;;  %v1691_v58 = vpop.f32.mrb[41].mxu0  ;;  %4663 = vmatprep.subr.bf16.mxu1 %v8922_v3  ;;  %v6941_v4 = vld [vmem:[%s8594_s4 + $0x8] ss:$12 sps:$4 sm:$0xff]   ;;  %v6985_v16 = vld [vmem:[%s8594_s4 + $0x98] ss:$12 sps:$4 sm:$0xff]  }
 0x649   :  { %v1743_v31 = vadd.f32 %v1691_v58, %v9031_v61  ;;  %v1693_v6 = vpop.f32.mrb[42].mxu0  ;;  %9033 = vst [vmem:[#allocation46_spill] sm:$0xff] %v6941_v4  ;;  %v6971_v61 = vld [vmem:[%s8594_s4 + $0x68] ss:$12 sps:$4 sm:$0xff]   ;;  %v6978_v58 = vld [vmem:[%s8594_s4 + $0x80] ss:$12 sps:$4 sm:$0xff]  }
 0x64a   :  { %v1694_v24 = vpop.f32.mrb[43].mxu0  ;;  %v6950_v6 = vld [vmem:[%s8594_s4 + $0x20] ss:$12 sps:$4 sm:$0xff]   ;;  %9037 = vst [vmem:[#allocation50_spill] sm:$0xff] %v6971_v61  ;;  %9038 = vst [vmem:[#allocation51_spill] sm:$0xff] %v6978_v58 }
 0x64b   :  { %4664 = vmatpush3.bf16.msra.mxu1 %v6933_v46  ;;  %9034 = vst [vmem:[#allocation47_spill] sm:$0xff] %v6950_v6  ;;  %v6964_v24 = vld [vmem:[%s8594_s4 + $0x50] ss:$12 sps:$4 sm:$0xff]   ;;  %9039 = vst [vmem:[#allocation52_spill] sm:$0xff] %v6985_v16  ;;  %v4044_v46 = vmul.f32 -1.442695, %v1743_v31 }
 0x64c   :  { %4669 = vmatprep.subr.bf16.mxu1 %v8922_v3  ;;  %9036 = vst [vmem:[#allocation49_spill] sm:$0xff] %v6964_v24 }
 0x64e   :  { %4666 = vmatmul.mubr.bf16.vlgmr.msra.gmra.mrb[40].mxu1 %v6591_v49  ;;  %v6957_v49 = vld [vmem:[%s8594_s4 + $0x38] ss:$12 sps:$4 sm:$0xff]  }
 0x64f   :  { %4670 = vmatpush3.bf16.msra.mxu1 %v6941_v4  ;;  %4685 = vmatprep.mubr.msk.bf16.mxu1 %vm5746_vm1, %v8922_v3  ;;  %9035 = vst [vmem:[#allocation48_spill] sm:$0xff] %v6957_v49 }
 0x650   :  { %4671 = vmatprep.subr.bf16.mxu1 %v8922_v3 }
 0x653   :  { %4672 = vmatpush3.bf16.msra.mxu1 %v6950_v6 }
 0x654   :  { %4673 = vmatprep.subr.bf16.mxu1 %v8922_v3 }
 0x657   :  { %4674 = vmatpush3.bf16.msra.mxu1 %v6957_v49 }
 0x658   :  { %4675 = vmatprep.subr.bf16.mxu1 %v8922_v3 }
 0x65b   :  { %4676 = vmatpush3.bf16.msra.mxu1 %v6964_v24  ;;  %v4043_v24 = vmul.f32 -1.442695, %v1736_v17 }
 0x65c   :  { %4677 = vmatprep.subr.bf16.mxu1 %v8922_v3 }
 0x65d   :  { %5444 = vpow2.f32 %v4043_v24 }
 0x65e   :  { %5446 = vpow2.f32 %v4044_v46 }
 0x65f   :  { %4678 = vmatpush3.bf16.msra.mxu1 %v6971_v61  ;;  %v6992_v61 = vld [vmem:[%s8594_s4 + $0xb0] ss:$12 sps:$4 sm:$0xff]  }
 0x660   :  { %4679 = vmatprep.subr.bf16.mxu1 %v8922_v3  ;;  %9040 = vst [vmem:[#allocation53_spill] sm:$0xff] %v6992_v61 }
 0x663   :  { %4680 = vmatpush3.bf16.msra.mxu1 %v6978_v58 }
 0x664   :  { %4681 = vmatprep.subr.bf16.mxu1 %v8922_v3 }
 0x667   :  { %4682 = vmatpush3.bf16.msra.mxu1 %v6985_v16  ;;  %v5445_v7 = vpop.eup %5444 }
 0x668   :  { %4683 = vmatprep.subr.bf16.mxu1 %v8922_v3  ;;  %v1740_v12 = vadd.f32 1.0, %v5445_v7 }
 0x66a   :  { %5448 = vrcp.f32 %v1740_v12 }
 0x66b   :  { %4684 = vmatpush3.bf16.msra.mxu1 %v6992_v61  ;;  %v5447_v61 = vpop.eup %5446 }
 0x66c   :  { %4689 = vmatprep.subr.bf16.mxu1 %v8922_v3  ;;  %v1747_v55 = vadd.f32 1.0, %v5447_v61  ;;  %v7054_v61 = vld [vmem:[%s8595_s5 + $0x30] ss:$12 sps:$4 sm:$0xff]  }
 0x66e   :  { %5450 = vrcp.f32 %v1747_v55  ;;  %v7047_v55 = vld [vmem:[%s8595_s5 + $0x34] ss:$12 sps:$4 sm:$0xff]  }
 0x674   :  { %v5449_v43 = vpop.eup %5448 }
 0x701   :  { %v1641_v58 = vpop.f32.mrb[36].mxu1 }
 0x702   :  { %v1642_v49 = vadd.f32 %v6579_v36, %v1641_v58  ;;  %v4647_v6 = vpop.f32.mrb[37].mxu1 }
 0x703   :  { %v1644_v4 = vpop.f32.mrb[38].mxu1 }
 0x704   :  { %4042 = vst [vmem:[%s8600_s10 + $0x8] sm:$0xff] %v1642_v49  ;;  %v4648_v16 = vpop.f32.mrb[39].mxu1  ;;  %v9041_v4 = vld [vmem:[#allocation16_spill] sm:$0xff]  ;;  %v5451_v49 = vpop.eup %5450 }
 0x705   :  { %v1753_v16 = vsub.f32 1.0, %v5451_v49  ;;  %v1755_v46 = vmul.f32 %v5451_v49, %v6587_v60  ;;  %v7019_v60 = vld [vmem:[%s8595_s5 + $0x8] ss:$12 sps:$4 sm:$0xff]   ;;  %v7085_v49 = vld [vmem:[%s8595_s5 + $0x64] ss:$12 sps:$4 sm:$0xff]  }
 0x721   :  { %v1730_v29 = vpop.f32.mrb[40].mxu1 }
 0x722   :  { %v1750_v17 = vmul.f32 %v5449_v43, %v1730_v29  ;;  %v4667_v58 = vpop.f32.mrb[41].mxu1  ;;  %v7035_v29 = vld [vmem:[%s8595_s5 + $0x18] ss:$12 sps:$4 sm:$0xff]   ;;  %v7041_v43 = vld [vmem:[%s8595_s5 + $0x20] ss:$12 sps:$4 sm:$0xff]  }
 0x723   :  { %v1733_v6 = vpop.f32.mrb[42].mxu1  ;;  %v7066_v58 = vld [vmem:[%s8595_s5 + $0x4c] ss:$12 sps:$4 sm:$0xff]  }
 0x724   :  { %v1751_v36 = vadd.f32 %v9041_v4, %v1750_v17  ;;  %v4668_v1 = vpop.f32.mrb[43].mxu1  ;;  %v7060_v17 = vld [vmem:[%s8595_s5 + $0x38] ss:$12 sps:$4 sm:$0xff]   ;;  %v7073_v6 = vld [vmem:[%s8595_s5 + $0x48] ss:$12 sps:$4 sm:$0xff]  }
 0x725   :  { %v7025_v1 = vld [vmem:[%s8595_s5 + $0x1c] ss:$12 sps:$4 sm:$0xff]  }
 0x726   :  { %5452 = vtanh.f32 %v1751_v36  ;;  %v7013_v36 = vld [vmem:[%s8595_s5] ss:$12 sps:$4 sm:$0xff]   ;;  %v7079_v4 = vld [vmem:[%s8595_s5 + $0x50] ss:$12 sps:$4 sm:$0xff]  }
 0x730   :  { %v5453_v24 = vpop.eup %5452 }
 0x731   :  { %v1754_v31 = vmul.f32 %v5453_v24, %v1753_v16  ;;  %v7092_v16 = vld [vmem:[%s8595_s5 + $0x60] ss:$12 sps:$4 sm:$0xff]   ;;  %v7098_v24 = vld [vmem:[%s8595_s5 + $0x68] ss:$12 sps:$4 sm:$0xff]  }
 0x732   :  { %9042 = vst [vmem:[#allocation54_spill] sm:$0xff] %v7098_v24 }
 0x733   :  { %v7002_v7 = vadd.f32 %v1755_v46, %v1754_v31 }
 0x735   :  { %v7006_v12 = vpack.c.bf16 %v7002_v7, %v7002_v7 }
 0x737   :  { %1791 = vmatmul.mubr.bf16.vlgmr.msra.gmra.mrb[44].mxu0 %v7006_v12  ;;  %4686 = vmatmul.mubr.bf16.vlgmr.msra.gmra.mrb[44].mxu1 %v7006_v12 }
 0x738   :  { %1840 = vmatpush1.bf16.msra.mxu0 %v7013_v36  ;;  %4690 = vmatpush3.bf16.msra.mxu1 %v7019_v60 }
 0x739   :  { %1841 = vmatprep.subr.bf16.mxu0 %v7025_v1  ;;  %4691 = vmatprep.subr.bf16.mxu1 %v8922_v3 }
 0x73a   :  { %1871 = vmatprep.mubr.bf16.mxu0 %v8923_v9  ;;  %4705 = vmatprep.mubr.msk.bf16.mxu1 %vm5746_vm1, %v8922_v3 }
 0x73c   :  { %1842 = vmatpush1.bf16.msra.mxu0 %v7035_v29  ;;  %4692 = vmatpush3.bf16.msra.mxu1 %v7041_v43 }
 0x73d   :  { %1843 = vmatprep.subr.bf16.mxu0 %v7047_v55  ;;  %4693 = vmatprep.subr.bf16.mxu1 %v8922_v3 }
 0x740   :  { %1844 = vmatpush1.bf16.msra.mxu0 %v7054_v61  ;;  %4694 = vmatpush3.bf16.msra.mxu1 %v7060_v17 }
 0x741   :  { %1845 = vmatprep.subr.bf16.mxu0 %v7066_v58  ;;  %4695 = vmatprep.subr.bf16.mxu1 %v8922_v3 }
 0x744   :  { %1846 = vmatpush1.bf16.msra.mxu0 %v7073_v6  ;;  %4696 = vmatpush3.bf16.msra.mxu1 %v7079_v4 }
 0x745   :  { %1847 = vmatprep.subr.bf16.mxu0 %v7085_v49  ;;  %4697 = vmatprep.subr.bf16.mxu1 %v8922_v3 }
 0x748   :  { %1848 = vmatpush1.bf16.msra.mxu0 %v7092_v16  ;;  %4698 = vmatpush3.bf16.msra.mxu1 %v7098_v24 }
 0x749   :  { %1849 = vmatprep.subr.bf16.mxu0 %v8983_v18  ;;  %4699 = vmatprep.subr.bf16.mxu1 %v8922_v3 }
 0x74c   :  { %1850 = vmatpush1.bf16.msra.mxu0 %v8984_v15  ;;  %4700 = vmatpush3.bf16.msra.mxu1 %v8985_v19 }
 0x74d   :  { %1851 = vmatprep.subr.bf16.mxu0 %v8986_v20  ;;  %4701 = vmatprep.subr.bf16.mxu1 %v8922_v3 }
 0x750   :  { %1852 = vmatpush1.bf16.msra.mxu0 %v8987_v21  ;;  %4702 = vmatpush3.bf16.msra.mxu1 %v8988_v22 }
 0x751   :  { %1853 = vmatprep.subr.bf16.mxu0 %v8989_v23  ;;  %4703 = vmatprep.subr.bf16.mxu1 %v8922_v3 }
 0x754   :  { %1854 = vmatpush1.bf16.msra.mxu0 %v8990_v25  ;;  %4704 = vmatpush3.bf16.msra.mxu1 %v8991_v26 }
 0x755   :  { %4709 = vmatprep.subr.bf16.mxu0 %v8922_v3  ;;  %4729 = vmatprep.subr.bf16.mxu1 %v8922_v3 }
 0x757   :  { %1872 = vmatmul.mubr.bf16.vlgmr.msra.gmra.mrb[44].mxu0 %v6678_v10  ;;  %4706 = vmatmul.mubr.bf16.vlgmr.msra.gmra.mrb[48].mxu1 %v6678_v10 }
 0x758   :  { %4710 = vmatpush3.bf16.msra.mxu0 %v8992_v27  ;;  %4725 = vmatprep.mubr.msk.bf16.mxu0 %vm5746_vm1, %v8922_v3 }
 0x759   :  { %4711 = vmatprep.subr.bf16.mxu0 %v8922_v3  ;;  %4730 = vmatpush3.bf16.msra.mxu1 %v8993_v28 }
 0x75a   :  { %4731 = vmatprep.subr.bf16.mxu1 %v8922_v3  ;;  %4745 = vmatprep.mubr.msk.bf16.mxu1 %vm5746_vm1, %v8922_v3 }
 0x75c   :  { %4712 = vmatpush3.bf16.msra.mxu0 %v8994_v30 }
 0x75d   :  { %4713 = vmatprep.subr.bf16.mxu0 %v8922_v3  ;;  %4732 = vmatpush3.bf16.msra.mxu1 %v8995_v32 }
 0x75e   :  { %4733 = vmatprep.subr.bf16.mxu1 %v8922_v3 }
 0x760   :  { %4714 = vmatpush3.bf16.msra.mxu0 %v8996_v2 }
 0x761   :  { %4715 = vmatprep.subr.bf16.mxu0 %v8922_v3  ;;  %4734 = vmatpush3.bf16.msra.mxu1 %v8997_v33 }
 0x762   :  { %4735 = vmatprep.subr.bf16.mxu1 %v8922_v3 }
 0x764   :  { %4716 = vmatpush3.bf16.msra.mxu0 %v8998_v34 }
 0x765   :  { %4717 = vmatprep.subr.bf16.mxu0 %v8922_v3  ;;  %4736 = vmatpush3.bf16.msra.mxu1 %v8999_v35 }
 0x766   :  { %4737 = vmatprep.subr.bf16.mxu1 %v8922_v3 }
 0x768   :  { %4718 = vmatpush3.bf16.msra.mxu0 %v9000_v38 }
 0x769   :  { %4719 = vmatprep.subr.bf16.mxu0 %v8922_v3  ;;  %4738 = vmatpush3.bf16.msra.mxu1 %v9001_v39 }
 0x76a   :  { %4739 = vmatprep.subr.bf16.mxu1 %v8922_v3 }
 0x76c   :  { %4720 = vmatpush3.bf16.msra.mxu0 %v9002_v41 }
 0x76d   :  { %4721 = vmatprep.subr.bf16.mxu0 %v8922_v3  ;;  %4740 = vmatpush3.bf16.msra.mxu1 %v9003_v42 }
 0x76e   :  { %4741 = vmatprep.subr.bf16.mxu1 %v8922_v3 }
 0x770   :  { %4722 = vmatpush3.bf16.msra.mxu0 %v9004_v44 }
 0x771   :  { %4723 = vmatprep.subr.bf16.mxu0 %v8922_v3  ;;  %4742 = vmatpush3.bf16.msra.mxu1 %v9005_v45 }
 0x772   :  { %4743 = vmatprep.subr.bf16.mxu1 %v8922_v3 }
 0x774   :  { %4724 = vmatpush3.bf16.msra.mxu0 %v9006_v47 }
 0x775   :  { %2032 = vmatprep.subr.bf16.mxu0 %v6668_v48  ;;  %4744 = vmatpush3.bf16.msra.mxu1 %v6527_v5 }
 0x776   :  { %4749 = vmatprep.subr.bf16.mxu1 %v8922_v3 }
 0x80a   :  { %v1833_v18 = vpop.f32.mrb[44].mxu1 }
 0x80b   :  { %v4687_v15 = vpop.f32.mrb[45].mxu1 }
 0x80c   :  { %v1836_v19 = vpop.f32.mrb[46].mxu1  ;;  %v9045_v15 = vld [vmem:[#allocation6_spill] sm:$0xff] }
 0x80d   :  { %v4688_v20 = vpop.f32.mrb[47].mxu1  ;;  %v9046_v19 = vld [vmem:[#allocation7_spill] sm:$0xff] }
 0x80e   :  { %v9047_v20 = vld [vmem:[#allocation8_spill] sm:$0xff] }
 0x82a   :  { %v1873_v21 = vpop.f32.mrb[44].mxu0  ;;  %v1914_v22 = vpop.f32.mrb[48].mxu1 }
 0x82b   :  { %v4045_v23 = vmul.f32 -1.442695, %v1873_v21  ;;  %v1875_v25 = vpop.f32.mrb[45].mxu0  ;;  %v4707_v26 = vpop.f32.mrb[49].mxu1  ;;  %v9048_v21 = vld [vmem:[#allocation9_spill] sm:$0xff] }
 0x82c   :  { %v1877_v27 = vpop.f32.mrb[46].mxu0  ;;  %v1917_v28 = vpop.f32.mrb[50].mxu1  ;;  %v4046_v2 = vmul.f32 -1.442695, %v1875_v25  ;;  %v9051_v25 = vld [vmem:[#allocation20_spill] sm:$0xff]  ;;  %v9052_v26 = vld [vmem:[#allocation31_spill] sm:$0xff] }
 0x82d   :  { %5454 = vpow2.f32 %v4045_v23  ;;  %v1878_v30 = vpop.f32.mrb[47].mxu0  ;;  %v4708_v32 = vpop.f32.mrb[51].mxu1  ;;  %v9050_v23 = vld [vmem:[#allocation11_spill] sm:$0xff]  ;;  %v9053_v27 = vld [vmem:[#allocation32_spill] sm:$0xff]  ;;  %v9054_v28 = vld [vmem:[#allocation33_spill] sm:$0xff] }
 0x82e   :  { %5456 = vpow2.f32 %v4046_v2  ;;  %v9055_v30 = vld [vmem:[#allocation34_spill] sm:$0xff]  ;;  %v9056_v32 = vld [vmem:[#allocation35_spill] sm:$0xff]  ;;  %v9057_v2 = vld [vmem:[#allocation36_spill] sm:$0xff] }
 0x837   :  { %v5455_v33 = vpop.eup %5454 }
 0x838   :  { %v1924_v5 = vadd.f32 1.0, %v5455_v33  ;;  %v5457_v34 = vpop.eup %5456  ;;  %v9058_v33 = vld [vmem:[#allocation37_spill] sm:$0xff] }
 0x839   :  { %v1931_v35 = vadd.f32 1.0, %v5457_v34  ;;  %v9059_v34 = vld [vmem:[#allocation70_spill] sm:$0xff] }
 0x83a   :  { %5458 = vrcp.f32 %v1924_v5 }
 0x83b   :  { %5460 = vrcp.f32 %v1931_v35 }
 0x844   :  { %v5459_v38 = vpop.eup %5458 }
 0x845   :  { %v1934_v39 = vmul.f32 %v5459_v38, %v1914_v22  ;;  %v5461_v42 = vpop.eup %5460  ;;  %v9049_v22 = vld [vmem:[#allocation10_spill] sm:$0xff] }
 0x846   :  { %v1937_v44 = vsub.f32 1.0, %v5461_v42  ;;  %v1939_v10 = vmul.f32 %v5461_v42, %v6674_v8  ;;  %v9043_v8 = vld [vmem:[#allocation4_spill] sm:$0xff] }
 0x847   :  { %v1935_v41 = vadd.f32 %v1934_v39, %v1833_v18  ;;  %v9044_v18 = vld [vmem:[#allocation5_spill] sm:$0xff] }
 0x849   :  { %5462 = vtanh.f32 %v1935_v41 }
 0x853   :  { %v5463_v45 = vpop.eup %5462 }
 0x854   :  { %v1938_v47 = vmul.f32 %v5463_v45, %v1937_v44  ;;  %v9060_v45 = vld [vmem:[#allocation38_spill] sm:$0xff] }
 0x856   :  { %v7154_v31 = vadd.f32 %v1939_v10, %v1938_v47  ;;  %v9061_v47 = vld [vmem:[#allocation39_spill] sm:$0xff]  ;;  %v9062_v10 = vld [vmem:[#allocation40_spill] sm:$0xff] }
 0x858   :  { %v7158_v46 = vpack.c.bf16 %v7154_v31, %v7154_v31 }
 0x85a   :  { %4726 = vmatmul.mubr.bf16.vlgmr.msra.gmra.mrb[48].mxu0 %v7158_v46 }
 0x85b   :  { %2033 = vmatpush1.bf16.msra.mxu0 %v6684_v11  ;;  %2064 = vmatprep.mubr.bf16.mxu0 %v8923_v9 }
 0x85c   :  { %2034 = vmatprep.subr.bf16.mxu0 %v6691_v52 }
 0x85f   :  { %2035 = vmatpush1.bf16.msra.mxu0 %v6697_v13 }
 0x860   :  { %2036 = vmatprep.subr.bf16.mxu0 %v6703_v14 }
 0x863   :  { %2037 = vmatpush1.bf16.msra.mxu0 %v6709_v50 }
 0x864   :  { %2038 = vmatprep.subr.bf16.mxu0 %v6715_v51 }
 0x867   :  { %2039 = vmatpush1.bf16.msra.mxu0 %v6721_v53 }
 0x868   :  { %2040 = vmatprep.subr.bf16.mxu0 %v6727_v54 }
 0x86b   :  { %2041 = vmatpush1.bf16.msra.mxu0 %v6733_v56 }
 0x86c   :  { %2042 = vmatprep.subr.bf16.mxu0 %v6739_v57 }
 0x86f   :  { %2043 = vmatpush1.bf16.msra.mxu0 %v6745_v59 }
 0x870   :  { %2044 = vmatprep.subr.bf16.mxu0 %v6751_v62 }
 0x873   :  { %2045 = vmatpush1.bf16.msra.mxu0 %v6757_v63 }
 0x874   :  { %2046 = vmatprep.subr.bf16.mxu0 %v6763_v0 }
 0x877   :  { %2047 = vmatpush1.bf16.msra.mxu0 %v6769_v40 }
 0x878   :  { %2135 = vmatprep.subr.bf16.mxu0 %v6775_v37 }
 0x87a   :  { %2065 = vmatmul.mubr.bf16.vlgmr.msra.gmra.mrb[52].mxu0 %v7006_v12 }
 0x87b   :  { %2136 = vmatpush1.bf16.msra.mxu0 %v9043_v8  ;;  %2167 = vmatprep.mubr.bf16.mxu0 %v8923_v9 }
 0x87c   :  { %2137 = vmatprep.subr.bf16.mxu0 %v9044_v18 }
 0x87f   :  { %2138 = vmatpush1.bf16.msra.mxu0 %v9045_v15 }
 0x880   :  { %2139 = vmatprep.subr.bf16.mxu0 %v9046_v19 }
 0x883   :  { %2140 = vmatpush1.bf16.msra.mxu0 %v9047_v20 }
 0x884   :  { %2141 = vmatprep.subr.bf16.mxu0 %v9048_v21 }
 0x887   :  { %2142 = vmatpush1.bf16.msra.mxu0 %v9049_v22 }
 0x888   :  { %2143 = vmatprep.subr.bf16.mxu0 %v9050_v23 }
 0x88b   :  { %2144 = vmatpush1.bf16.msra.mxu0 %v9051_v25 }
 0x88c   :  { %2145 = vmatprep.subr.bf16.mxu0 %v9052_v26 }
 0x88f   :  { %2146 = vmatpush1.bf16.msra.mxu0 %v9053_v27 }
 0x890   :  { %2147 = vmatprep.subr.bf16.mxu0 %v9054_v28 }
 0x893   :  { %2148 = vmatpush1.bf16.msra.mxu0 %v9055_v30 }
 0x894   :  { %2149 = vmatprep.subr.bf16.mxu0 %v9056_v32 }
 0x897   :  { %2150 = vmatpush1.bf16.msra.mxu0 %v9057_v2 }
 0x898   :  { %2216 = vmatprep.subr.bf16.mxu0 %v9058_v33  ;;  %v9069_v33 = vld [vmem:[#allocation45_spill] sm:$0xff] }
 0x92d   :  { %v1976_v5 = vpop.f32.mrb[48].mxu0 }
 0x92e   :  { %v1977_v35 = vadd.f32 %v9059_v34, %v1976_v5  ;;  %v4727_v38 = vpop.f32.mrb[49].mxu0  ;;  %v9063_v5 = vld [vmem:[#allocation41_spill] sm:$0xff]  ;;  %v9064_v34 = vld [vmem:[#allocation42_spill] sm:$0xff] }
 0x92f   :  { %v1979_v39 = vpop.f32.mrb[50].mxu0 }
 0x930   :  { %v1982_v41 = vmax.f32 %v1977_v35, 0.0  ;;  %v4728_v42 = vpop.f32.mrb[51].mxu0  ;;  %v9065_v35 = vld [vmem:[#allocation43_spill] sm:$0xff]  ;;  %v9066_v39 = vld [vmem:[#allocation44_spill] sm:$0xff] }
 0x932   :  { %v1983_v44 = vpack.c.bf16 %v1982_v41, %v1982_v41  ;;  %v9067_v41 = vld [vmem:[#allocation14_spill] sm:$0xff] }
 0x934   :  { %4746 = vmatmul.mubr.bf16.vlgmr.msra.gmra.mrb[52].mxu1 %v1983_v44 }
 0x935   :  { %4750 = vmatpush3.bf16.msra.mxu1 %v9060_v45  ;;  %4765 = vmatprep.mubr.msk.bf16.mxu1 %vm5746_vm1, %v8922_v3 }
 0x936   :  { %4751 = vmatprep.subr.bf16.mxu1 %v8922_v3 }
 0x939   :  { %4752 = vmatpush3.bf16.msra.mxu1 %v9061_v47 }
 0x93a   :  { %4753 = vmatprep.subr.bf16.mxu1 %v8922_v3 }
 0x93d   :  { %4754 = vmatpush3.bf16.msra.mxu1 %v9062_v10  ;;  %v9068_v10 = vld [vmem:[#allocation15_spill] sm:$0xff] }
 0x93e   :  { %4755 = vmatprep.subr.bf16.mxu1 %v8922_v3 }
 0x941   :  { %4756 = vmatpush3.bf16.msra.mxu1 %v9063_v5 }
 0x942   :  { %4757 = vmatprep.subr.bf16.mxu1 %v8922_v3 }
 0x945   :  { %4758 = vmatpush3.bf16.msra.mxu1 %v9064_v34 }
 0x946   :  { %4759 = vmatprep.subr.bf16.mxu1 %v8922_v3 }
 0x949   :  { %4760 = vmatpush3.bf16.msra.mxu1 %v9065_v35  ;;  %v9070_v35 = vld [vmem:[#allocation46_spill] sm:$0xff] }
 0x94a   :  { %4761 = vmatprep.subr.bf16.mxu1 %v8922_v3 }
 0x94d   :  { %v2066_v38 = vpop.f32.mrb[52].mxu0  ;;  %4762 = vmatpush3.bf16.msra.mxu1 %v9066_v39 }
 0x94e   :  { %v2113_v42 = vadd.f32 %v2066_v38, %v9067_v41  ;;  %v2068_v44 = vpop.f32.mrb[53].mxu0  ;;  %4763 = vmatprep.subr.bf16.mxu1 %v8922_v3  ;;  %v9071_v38 = vld [vmem:[#allocation47_spill] sm:$0xff]  ;;  %v9076_v41 = vld [vmem:[#allocation52_spill] sm:$0xff] }
 0x94f   :  { %v2120_v5 = vadd.f32 %v2068_v44, %v9068_v10  ;;  %v2070_v47 = vpop.f32.mrb[54].mxu0  ;;  %v9072_v10 = vld [vmem:[#allocation48_spill] sm:$0xff]  ;;  %v9077_v44 = vld [vmem:[#allocation53_spill] sm:$0xff] }
 0x950   :  { %v2071_v45 = vpop.f32.mrb[55].mxu0  ;;  %v9075_v47 = vld [vmem:[#allocation51_spill] sm:$0xff] }
 0x951   :  { %4764 = vmatpush3.bf16.msra.mxu1 %v9069_v33  ;;  %v9073_v45 = vld [vmem:[#allocation49_spill] sm:$0xff]  ;;  %v4049_v39 = vmul.f32 -1.442695, %v2120_v5 }
 0x952   :  { %4769 = vmatprep.subr.bf16.mxu1 %v8922_v3 }
 0x954   :  { %4766 = vmatmul.mubr.bf16.vlgmr.msra.gmra.mrb[56].mxu1 %v7006_v12  ;;  %v9074_v12 = vld [vmem:[#allocation50_spill] sm:$0xff] }
 0x955   :  { %4770 = vmatpush3.bf16.msra.mxu1 %v9070_v35  ;;  %4785 = vmatprep.mubr.msk.bf16.mxu1 %vm5746_vm1, %v8922_v3 }
 0x956   :  { %4771 = vmatprep.subr.bf16.mxu1 %v8922_v3 }
 0x959   :  { %4772 = vmatpush3.bf16.msra.mxu1 %v9071_v38  ;;  %v9078_v38 = vld [vmem:[#allocation3_spill] sm:$0xff] }
 0x95a   :  { %4773 = vmatprep.subr.bf16.mxu1 %v8922_v3 }
 0x95d   :  { %4774 = vmatpush3.bf16.msra.mxu1 %v9072_v10 }
 0x95e   :  { %4775 = vmatprep.subr.bf16.mxu1 %v8922_v3 }
 0x961   :  { %4776 = vmatpush3.bf16.msra.mxu1 %v9073_v45  ;;  %v4048_v45 = vmul.f32 -1.442695, %v2113_v42 }
 0x962   :  { %4777 = vmatprep.subr.bf16.mxu1 %v8922_v3 }
 0x963   :  { %5464 = vpow2.f32 %v4048_v45 }
 0x964   :  { %5466 = vpow2.f32 %v4049_v39 }
 0x965   :  { %4778 = vmatpush3.bf16.msra.mxu1 %v9074_v12 }
 0x966   :  { %4779 = vmatprep.subr.bf16.mxu1 %v8922_v3 }
 0x969   :  { %4780 = vmatpush3.bf16.msra.mxu1 %v9075_v47 }
 0x96a   :  { %4781 = vmatprep.subr.bf16.mxu1 %v8922_v3 }
 0x96d   :  { %4782 = vmatpush3.bf16.msra.mxu1 %v9076_v41  ;;  %v5465_v41 = vpop.eup %5464 }
 0x96e   :  { %4783 = vmatprep.subr.bf16.mxu1 %v8922_v3  ;;  %v2117_v34 = vadd.f32 1.0, %v5465_v41 }
 0x970   :  { %5468 = vrcp.f32 %v2117_v34 }
 0x971   :  { %4784 = vmatpush3.bf16.msra.mxu1 %v9077_v44  ;;  %v5467_v44 = vpop.eup %5466 }
 0x972   :  { %4789 = vmatprep.subr.bf16.mxu1 %v8922_v3  ;;  %v2124_v2 = vadd.f32 1.0, %v5467_v44  ;;  %v7306_v44 = vld [vmem:[%s8595_s5 + $0x98] ss:$12 sps:$4 sm:$0xff]  }
 0x973   :  { %9085 = vst [vmem:[#allocation65_spill] sm:$0xff] %v7306_v44 }
 0x974   :  { %5470 = vrcp.f32 %v2124_v2  ;;  %v7300_v2 = vld [vmem:[%s8595_s5 + $0x90] ss:$12 sps:$4 sm:$0xff]  }
 0x975   :  { %9084 = vst [vmem:[#allocation57_spill] sm:$0xff] %v7300_v2 }
 0x97a   :  { %v5469_v32 = vpop.eup %5468 }
 0xa07   :  { %v2018_v10 = vpop.f32.mrb[52].mxu1 }
 0xa08   :  { %v2019_v35 = vadd.f32 %v9078_v38, %v2018_v10  ;;  %v4747_v33 = vpop.f32.mrb[53].mxu1  ;;  %v9079_v10 = vld [vmem:[#allocation18_spill] sm:$0xff] }
 0xa09   :  { %v2021_v12 = vpop.f32.mrb[54].mxu1 }
 0xa0a   :  { %4047 = vst [vmem:[%s8600_s10 + $0x10] sm:$0xff] %v2019_v35  ;;  %v4748_v47 = vpop.f32.mrb[55].mxu1  ;;  %v5471_v35 = vpop.eup %5470 }
 0xa0b   :  { %v2130_v47 = vsub.f32 1.0, %v5471_v35  ;;  %v2132_v39 = vmul.f32 %v5471_v35, %v7002_v7  ;;  %v7274_v7 = vld [vmem:[%s8595_s5 + $0x7c] ss:$12 sps:$4 sm:$0xff]  }
 0xa0c   :  { %9080 = vst [vmem:[#allocation55_spill] sm:$0xff] %v7274_v7  ;;  %v7360_v35 = vld [vmem:[%s8597_s8 + $0x8] sm:$0xff]  }
 0xa0d   :  { %9092 = vst [vmem:[#allocation61_spill] sm:$0xff] %v7360_v35 }
 0xa27   :  { %v2107_v30 = vpop.f32.mrb[56].mxu1 }
 0xa28   :  { %v2127_v42 = vmul.f32 %v5469_v32, %v2107_v30  ;;  %v4767_v38 = vpop.f32.mrb[57].mxu1  ;;  %v7287_v30 = vld [vmem:[%s8595_s5 + $0x80] ss:$12 sps:$4 sm:$0xff]  }
 0xa29   :  { %v2110_v33 = vpop.f32.mrb[58].mxu1  ;;  %9082 = vst [vmem:[#allocation56_spill] sm:$0xff] %v7287_v30  ;;  %v7293_v32 = vld [vmem:[%s8595_s5 + $0x94] ss:$12 sps:$4 sm:$0xff]  }
 0xa2a   :  { %v2128_v12 = vadd.f32 %v9079_v10, %v2127_v42  ;;  %v4768_v28 = vpop.f32.mrb[59].mxu1  ;;  %9083 = vst [vmem:[#allocation64_spill] sm:$0xff] %v7293_v32  ;;  %v7312_v42 = vld [vmem:[%s8595_s5 + $0xac] ss:$12 sps:$4 sm:$0xff]   ;;  %v7319_v38 = vld [vmem:[%s8595_s5 + $0xa8] ss:$12 sps:$4 sm:$0xff]  }
 0xa2b   :  { %v7281_v28 = vld [vmem:[%s8595_s5 + $0x78] ss:$12 sps:$4 sm:$0xff]   ;;  %9086 = vst [vmem:[#allocation58_spill] sm:$0xff] %v7312_v42  ;;  %9087 = vst [vmem:[#allocation66_spill] sm:$0xff] %v7319_v38  ;;  %v7325_v33 = vld [vmem:[%s8595_s5 + $0xb0] ss:$12 sps:$4 sm:$0xff]  }
 0xa2c   :  { %5472 = vtanh.f32 %v2128_v12  ;;  %9081 = vst [vmem:[#allocation63_spill] sm:$0xff] %v7281_v28  ;;  %9088 = vst [vmem:[#allocation59_spill] sm:$0xff] %v7325_v33  ;;  %v7335_v10 = vld [vmem:[%s8596_s6] sm:$0xff]  }
 0xa2d   :  { %9089 = vst [vmem:[#allocation67_spill] sm:$0xff] %v7335_v10  ;;  %v7344_v12 = vld [vmem:[%s8597_s8] sm:$0xff]  }
 0xa2e   :  { %9090 = vst [vmem:[#allocation60_spill] sm:$0xff] %v7344_v12 }
 0xa36   :  { %v5473_v45 = vpop.eup %5472 }
 0xa37   :  { %v2131_v5 = vmul.f32 %v5473_v45, %v2130_v47  ;;  %v7367_v47 = vld [vmem:[%s8596_s6 + $0x10] sm:$0xff]  }
 0xa38   :  { %9093 = vst [vmem:[#allocation69_spill] sm:$0xff] %v7367_v47  ;;  %v7374_v45 = vld [vmem:[%s8597_s8 + $0x10] sm:$0xff]  }
 0xa39   :  { %v7242_v41 = vadd.f32 %v2132_v39, %v2131_v5  ;;  %9094 = vst [vmem:[#allocation62_spill] sm:$0xff] %v7374_v45  ;;  %v7381_v5 = vld [vmem:[%s8596_s6 + $0x18] sm:$0xff]  }
 0xa3a   :  { %9095 = vst [vmem:[#allocation12_spill] sm:$0xff] %v7381_v5  ;;  %v7388_v39 = vld [vmem:[%s8597_s8 + $0x18] sm:$0xff]  }
 0xa3b   :  { %v7246_v34 = vpack.c.bf16 %v7242_v41, %v7242_v41  ;;  %9096 = vst [vmem:[#allocation13_spill] sm:$0xff] %v7388_v39 }
 0xa3d   :  { %2168 = vmatmul.mubr.bf16.vlgmr.msra.gmra.mrb[56].mxu0 %v7246_v34  ;;  %4786 = vmatmul.mubr.bf16.vlgmr.msra.gmra.mrb[60].mxu1 %v7246_v34 }
 0xa3e   :  { %2217 = vmatpush1.bf16.msra.mxu0 %v7013_v36  ;;  %4790 = vmatpush3.bf16.msra.mxu1 %v7019_v60 }
 0xa3f   :  { %2218 = vmatprep.subr.bf16.mxu0 %v7025_v1  ;;  %4791 = vmatprep.subr.bf16.mxu1 %v8922_v3 }
 0xa40   :  { %2248 = vmatprep.mubr.bf16.mxu0 %v8923_v9  ;;  %4805 = vmatprep.mubr.msk.bf16.mxu1 %vm5746_vm1, %v8922_v3 }
 0xa42   :  { %2219 = vmatpush1.bf16.msra.mxu0 %v7035_v29  ;;  %4792 = vmatpush3.bf16.msra.mxu1 %v7041_v43 }
 0xa43   :  { %2220 = vmatprep.subr.bf16.mxu0 %v7047_v55  ;;  %4793 = vmatprep.subr.bf16.mxu1 %v8922_v3 }
 0xa46   :  { %2221 = vmatpush1.bf16.msra.mxu0 %v7054_v61  ;;  %4794 = vmatpush3.bf16.msra.mxu1 %v7060_v17 }
 0xa47   :  { %2222 = vmatprep.subr.bf16.mxu0 %v7066_v58  ;;  %4795 = vmatprep.subr.bf16.mxu1 %v8922_v3 }
 0xa4a   :  { %2223 = vmatpush1.bf16.msra.mxu0 %v7073_v6  ;;  %4796 = vmatpush3.bf16.msra.mxu1 %v7079_v4 }
 0xa4b   :  { %2224 = vmatprep.subr.bf16.mxu0 %v7085_v49  ;;  %4797 = vmatprep.subr.bf16.mxu1 %v8922_v3 }
 0xa4e   :  { %2225 = vmatpush1.bf16.msra.mxu0 %v7092_v16  ;;  %4798 = vmatpush3.bf16.msra.mxu1 %v7098_v24 }
 0xa4f   :  { %2226 = vmatprep.subr.bf16.mxu0 %v7274_v7  ;;  %4799 = vmatprep.subr.bf16.mxu1 %v8922_v3 }
 0xa52   :  { %2227 = vmatpush1.bf16.msra.mxu0 %v7281_v28  ;;  %4800 = vmatpush3.bf16.msra.mxu1 %v7287_v30 }
 0xa53   :  { %2228 = vmatprep.subr.bf16.mxu0 %v7293_v32  ;;  %4801 = vmatprep.subr.bf16.mxu1 %v8922_v3 }
 0xa56   :  { %2229 = vmatpush1.bf16.msra.mxu0 %v7300_v2  ;;  %4802 = vmatpush3.bf16.msra.mxu1 %v7306_v44 }
 0xa57   :  { %2230 = vmatprep.subr.bf16.mxu0 %v7312_v42  ;;  %4803 = vmatprep.subr.bf16.mxu1 %v8922_v3 }
 0xa5a   :  { %2231 = vmatpush1.bf16.msra.mxu0 %v7319_v38  ;;  %4804 = vmatpush3.bf16.msra.mxu1 %v7325_v33 }
 0xa5b   :  { %4809 = vmatprep.subr.bf16.mxu0 %v8922_v3  ;;  %4829 = vmatprep.subr.bf16.mxu1 %v8922_v3 }
 0xa5d   :  { %2249 = vmatmul.mubr.bf16.vlgmr.msra.gmra.mrb[56].mxu0 %v7158_v46  ;;  %4806 = vmatmul.mubr.bf16.vlgmr.msra.gmra.mrb[64].mxu1 %v7158_v46  ;;  %v7353_v46 = vld [vmem:[%s8596_s6 + $0x8] sm:$0xff]  }
 0xa5e   :  { %4810 = vmatpush3.bf16.msra.mxu0 %v7335_v10  ;;  %4825 = vmatprep.mubr.msk.bf16.mxu0 %vm5746_vm1, %v8922_v3  ;;  %9091 = vst [vmem:[#allocation68_spill] sm:$0xff] %v7353_v46 }
 0xa5f   :  { %4811 = vmatprep.subr.bf16.mxu0 %v8922_v3  ;;  %4830 = vmatpush3.bf16.msra.mxu1 %v7344_v12 }
 0xa60   :  { %4831 = vmatprep.subr.bf16.mxu1 %v8922_v3  ;;  %4845 = vmatprep.mubr.msk.bf16.mxu1 %vm5746_vm1, %v8922_v3 }
 0xa62   :  { %4812 = vmatpush3.bf16.msra.mxu0 %v7353_v46 }
 0xa63   :  { %4813 = vmatprep.subr.bf16.mxu0 %v8922_v3  ;;  %4832 = vmatpush3.bf16.msra.mxu1 %v7360_v35 }
 0xa64   :  { %4833 = vmatprep.subr.bf16.mxu1 %v8922_v3 }
 0xa66   :  { %4814 = vmatpush3.bf16.msra.mxu0 %v7367_v47 }
 0xa67   :  { %4815 = vmatprep.subr.bf16.mxu0 %v8922_v3  ;;  %4834 = vmatpush3.bf16.msra.mxu1 %v7374_v45  ;;  %v7395_v45 = vld [vmem:[%s8596_s6 + $0x20] sm:$0xff]  }
 0xa68   :  { %4835 = vmatprep.subr.bf16.mxu1 %v8922_v3  ;;  %9097 = vst [vmem:[#allocation16_spill] sm:$0xff] %v7395_v45 }
 0xa6a   :  { %4816 = vmatpush3.bf16.msra.mxu0 %v7381_v5  ;;  %v7402_v5 = vld [vmem:[%s8597_s8 + $0x20] sm:$0xff]  }
 0xa6b   :  { %4817 = vmatprep.subr.bf16.mxu0 %v8922_v3  ;;  %4836 = vmatpush3.bf16.msra.mxu1 %v7388_v39  ;;  %9098 = vst [vmem:[#allocation4_spill] sm:$0xff] %v7402_v5  ;;  %v7409_v39 = vld [vmem:[%s8596_s6 + $0x28] sm:$0xff]  }
 0xa6c   :  { %4837 = vmatprep.subr.bf16.mxu1 %v8922_v3  ;;  %9099 = vst [vmem:[#allocation5_spill] sm:$0xff] %v7409_v39 }
 0xa6e   :  { %4818 = vmatpush3.bf16.msra.mxu0 %v7395_v45  ;;  %v7416_v45 = vld [vmem:[%s8597_s8 + $0x28] sm:$0xff]  }
 0xa6f   :  { %4819 = vmatprep.subr.bf16.mxu0 %v8922_v3  ;;  %4838 = vmatpush3.bf16.msra.mxu1 %v7402_v5  ;;  %9100 = vst [vmem:[#allocation6_spill] sm:$0xff] %v7416_v45  ;;  %v7423_v5 = vld [vmem:[%s8596_s6 + $0x30] sm:$0xff]  }
 0xa70   :  { %4839 = vmatprep.subr.bf16.mxu1 %v8922_v3  ;;  %9101 = vst [vmem:[#allocation7_spill] sm:$0xff] %v7423_v5 }
 0xa72   :  { %4820 = vmatpush3.bf16.msra.mxu0 %v7409_v39  ;;  %v7430_v39 = vld [vmem:[%s8597_s8 + $0x30] sm:$0xff]  }
 0xa73   :  { %4821 = vmatprep.subr.bf16.mxu0 %v8922_v3  ;;  %4840 = vmatpush3.bf16.msra.mxu1 %v7416_v45  ;;  %9102 = vst [vmem:[#allocation8_spill] sm:$0xff] %v7430_v39  ;;  %v7437_v45 = vld [vmem:[%s8596_s6 + $0x38] sm:$0xff]  }
 0xa74   :  { %4841 = vmatprep.subr.bf16.mxu1 %v8922_v3  ;;  %9103 = vst [vmem:[#allocation9_spill] sm:$0xff] %v7437_v45 }
 0xa76   :  { %4822 = vmatpush3.bf16.msra.mxu0 %v7423_v5  ;;  %v7444_v5 = vld [vmem:[%s8597_s8 + $0x38] sm:$0xff]  }
 0xa77   :  { %4823 = vmatprep.subr.bf16.mxu0 %v8922_v3  ;;  %4842 = vmatpush3.bf16.msra.mxu1 %v7430_v39  ;;  %9104 = vst [vmem:[#allocation10_spill] sm:$0xff] %v7444_v5 }
 0xa78   :  { %4843 = vmatprep.subr.bf16.mxu1 %v8922_v3 }
 0xa7a   :  { %4824 = vmatpush3.bf16.msra.mxu0 %v7437_v45 }
 0xa7b   :  { %2409 = vmatprep.subr.bf16.mxu0 %v6668_v48  ;;  %4844 = vmatpush3.bf16.msra.mxu1 %v7444_v5 }
 0xa7c   :  { %4849 = vmatprep.subr.bf16.mxu1 %v8922_v3 }
 0xb10   :  { %v2210_v39 = vpop.f32.mrb[60].mxu1 }
 0xb11   :  { %v4787_v47 = vpop.f32.mrb[61].mxu1 }
 0xb12   :  { %v2213_v35 = vpop.f32.mrb[62].mxu1 }
 0xb13   :  { %v4788_v46 = vpop.f32.mrb[63].mxu1 }
 0xb30   :  { %v2250_v12 = vpop.f32.mrb[56].mxu0  ;;  %v2291_v10 = vpop.f32.mrb[64].mxu1 }
 0xb31   :  { %v4050_v33 = vmul.f32 -1.442695, %v2250_v12  ;;  %v2252_v38 = vpop.f32.mrb[57].mxu0  ;;  %v4807_v45 = vpop.f32.mrb[65].mxu1 }
 0xb32   :  { %v2254_v42 = vpop.f32.mrb[58].mxu0  ;;  %v2294_v48 = vpop.f32.mrb[66].mxu1  ;;  %v4051_v32 = vmul.f32 -1.442695, %v2252_v38  ;;  %v9126_v38 = vld [vmem:[#allocation51_spill] sm:$0xff] }
 0xb33   :  { %5474 = vpow2.f32 %v4050_v33  ;;  %v2255_v44 = vpop.f32.mrb[59].mxu0  ;;  %v4808_v2 = vpop.f32.mrb[67].mxu1 }
 0xb34   :  { %5476 = vpow2.f32 %v4051_v32  ;;  %v9124_v2 = vld [vmem:[#allocation49_spill] sm:$0xff] }
 0xb3d   :  { %v5475_v30 = vpop.eup %5474 }
 0xb3e   :  { %v2301_v5 = vadd.f32 1.0, %v5475_v30  ;;  %v5477_v28 = vpop.eup %5476  ;;  %v9123_v30 = vld [vmem:[#allocation48_spill] sm:$0xff] }
 0xb3f   :  { %v2308_v7 = vadd.f32 1.0, %v5477_v28  ;;  %v9122_v28 = vld [vmem:[#allocation47_spill] sm:$0xff] }
 0xb40   :  { %5478 = vrcp.f32 %v2301_v5  ;;  %v9128_v5 = vld [vmem:[#allocation53_spill] sm:$0xff] }
 0xb41   :  { %5480 = vrcp.f32 %v2308_v7  ;;  %v9121_v7 = vld [vmem:[#allocation46_spill] sm:$0xff] }
 0xb4a   :  { %v5479_v47 = vpop.eup %5478 }
 0xb4b   :  { %v2311_v35 = vmul.f32 %v5479_v47, %v2291_v10  ;;  %v5481_v12 = vpop.eup %5480  ;;  %v9127_v10 = vld [vmem:[#allocation52_spill] sm:$0xff]  ;;  %v7539_v47 = vld [vmem:[%s8599_s9] ss:$0 sm:$0xff] }
 0xb4c   :  { %v2314_v24 = vsub.f32 1.0, %v5481_v12  ;;  %v2316_v33 = vmul.f32 %v5481_v12, %v7154_v31  ;;  %v9115_v31 = vld [vmem:[#allocation42_spill] sm:$0xff]  ;;  %9129 = vst [vmem:[#allocation20_spill] sm:$0xff] %v7539_v47 }
 0xb4d   :  { %v2312_v46 = vadd.f32 %v2311_v35, %v2210_v39 }
 0xb4f   :  { %5482 = vtanh.f32 %v2312_v46 }
 0xb59   :  { %v5483_v45 = vpop.eup %5482 }
 0xb5a   :  { %v2315_v42 = vmul.f32 %v5483_v45, %v2314_v24  ;;  %v9114_v24 = vld [vmem:[#allocation41_spill] sm:$0xff] }
 0xb5c   :  { %v7449_v44 = vadd.f32 %v2316_v33, %v2315_v42 }
 0xb5e   :  { %v7453_v32 = vpack.c.bf16 %v7449_v44, %v7449_v44 }
 0xb60   :  { %4826 = vmatmul.mubr.bf16.vlgmr.msra.gmra.mrb[60].mxu0 %v7453_v32 }
 0xb61   :  { %2410 = vmatpush1.bf16.msra.mxu0 %v6684_v11  ;;  %2441 = vmatprep.mubr.bf16.mxu0 %v8923_v9  ;;  %v9105_v11 = vld [vmem:[#allocation33_spill] sm:$0xff] }
 0xb62   :  { %2411 = vmatprep.subr.bf16.mxu0 %v6691_v52  ;;  %v9106_v52 = vld [vmem:[#allocation34_spill] sm:$0xff] }
 0xb65   :  { %2412 = vmatpush1.bf16.msra.mxu0 %v6697_v13  ;;  %v9107_v13 = vld [vmem:[#allocation35_spill] sm:$0xff] }
 0xb66   :  { %2413 = vmatprep.subr.bf16.mxu0 %v6703_v14  ;;  %v9108_v14 = vld [vmem:[#allocation36_spill] sm:$0xff] }
 0xb69   :  { %2414 = vmatpush1.bf16.msra.mxu0 %v6709_v50  ;;  %v9109_v50 = vld [vmem:[#allocation37_spill] sm:$0xff] }
 0xb6a   :  { %2415 = vmatprep.subr.bf16.mxu0 %v6715_v51 }
 0xb6d   :  { %2416 = vmatpush1.bf16.msra.mxu0 %v6721_v53  ;;  %v7494_v53 = vld [vmem:[%s8598_s7] ss:$0 sm:$0xff] }
 0xb6e   :  { %2417 = vmatprep.subr.bf16.mxu0 %v6727_v54  ;;  %9110 = vst [vmem:[#allocation11_spill] sm:$0xff] %v7494_v53 }
 0xb71   :  { %2418 = vmatpush1.bf16.msra.mxu0 %v6733_v56 }
 0xb72   :  { %2419 = vmatprep.subr.bf16.mxu0 %v6739_v57 }
 0xb75   :  { %2420 = vmatpush1.bf16.msra.mxu0 %v6745_v59 }
 0xb76   :  { %2421 = vmatprep.subr.bf16.mxu0 %v6751_v62 }
 0xb79   :  { %2422 = vmatpush1.bf16.msra.mxu0 %v6757_v63 }
 0xb7a   :  { %2423 = vmatprep.subr.bf16.mxu0 %v6763_v0  ;;  %v9111_v0 = vld [vmem:[#allocation38_spill] sm:$0xff] }
 0xb7d   :  { %2424 = vmatpush1.bf16.msra.mxu0 %v6769_v40  ;;  %v9112_v40 = vld [vmem:[#allocation39_spill] sm:$0xff] }
 0xb7e   :  { %2512 = vmatprep.subr.bf16.mxu0 %v6775_v37  ;;  %v9113_v37 = vld [vmem:[#allocation40_spill] sm:$0xff] }
 0xb80   :  { %2442 = vmatmul.mubr.bf16.vlgmr.msra.gmra.mrb[64].mxu0 %v7246_v34 }
 0xb81   :  { %2513 = vmatpush1.bf16.msra.mxu0 %v9043_v8  ;;  %2544 = vmatprep.mubr.bf16.mxu0 %v8923_v9  ;;  %v9116_v8 = vld [vmem:[#allocation43_spill] sm:$0xff] }
 0xb82   :  { %2514 = vmatprep.subr.bf16.mxu0 %v9044_v18 }
 0xb85   :  { %2515 = vmatpush1.bf16.msra.mxu0 %v9045_v15  ;;  %v9117_v15 = vld [vmem:[#allocation44_spill] sm:$0xff] }
 0xb86   :  { %2516 = vmatprep.subr.bf16.mxu0 %v9046_v19  ;;  %v9118_v19 = vld [vmem:[#allocation17_spill] sm:$0xff] }
 0xb89   :  { %2517 = vmatpush1.bf16.msra.mxu0 %v9047_v20 }
 0xb8a   :  { %2518 = vmatprep.subr.bf16.mxu0 %v9048_v21 }
 0xb8d   :  { %2519 = vmatpush1.bf16.msra.mxu0 %v9049_v22  ;;  %v9119_v22 = vld [vmem:[#allocation19_spill] sm:$0xff] }
 0xb8e   :  { %2520 = vmatprep.subr.bf16.mxu0 %v9050_v23 }
 0xb91   :  { %2521 = vmatpush1.bf16.msra.mxu0 %v9051_v25 }
 0xb92   :  { %2522 = vmatprep.subr.bf16.mxu0 %v9052_v26 }
 0xb95   :  { %2523 = vmatpush1.bf16.msra.mxu0 %v9053_v27  ;;  %v9120_v27 = vld [vmem:[#allocation45_spill] sm:$0xff] }
 0xb96   :  { %2524 = vmatprep.subr.bf16.mxu0 %v9105_v11 }
 0xb99   :  { %2525 = vmatpush1.bf16.msra.mxu0 %v9106_v52 }
 0xb9a   :  { %2526 = vmatprep.subr.bf16.mxu0 %v9107_v13 }
 0xb9d   :  { %2527 = vmatpush1.bf16.msra.mxu0 %v9108_v14 }
 0xb9e   :  { %2593 = vmatprep.subr.bf16.mxu0 %v9109_v50 }
 0xc33   :  { %v2353_v51 = vpop.f32.mrb[60].mxu0 }
 0xc34   :  { %v2354_v54 = vadd.f32 %v7494_v53, %v2353_v51  ;;  %v4827_v56 = vpop.f32.mrb[61].mxu0 }
 0xc35   :  { %v2356_v57 = vpop.f32.mrb[62].mxu0 }
 0xc36   :  { %v2359_v59 = vmax.f32 %v2354_v54, 0.0  ;;  %v4828_v62 = vpop.f32.mrb[63].mxu0  ;;  %v9130_v57 = vld [vmem:[#allocation24_spill] sm:$0xff] }
 0xc38   :  { %v2360_v63 = vpack.c.bf16 %v2359_v59, %v2359_v59 }
 0xc3a   :  { %4846 = vmatmul.mubr.bf16.vlgmr.msra.gmra.mrb[68].mxu1 %v2360_v63 }
 0xc3b   :  { %4850 = vmatpush3.bf16.msra.mxu1 %v9111_v0  ;;  %4865 = vmatprep.mubr.msk.bf16.mxu1 %vm5746_vm1, %v8922_v3 }
 0xc3c   :  { %4851 = vmatprep.subr.bf16.mxu1 %v8922_v3 }
 0xc3f   :  { %4852 = vmatpush3.bf16.msra.mxu1 %v9112_v40 }
 0xc40   :  { %4853 = vmatprep.subr.bf16.mxu1 %v8922_v3 }
 0xc43   :  { %4854 = vmatpush3.bf16.msra.mxu1 %v9113_v37 }
 0xc44   :  { %4855 = vmatprep.subr.bf16.mxu1 %v8922_v3 }
 0xc47   :  { %4856 = vmatpush3.bf16.msra.mxu1 %v9114_v24 }
 0xc48   :  { %4857 = vmatprep.subr.bf16.mxu1 %v8922_v3 }
 0xc4b   :  { %4858 = vmatpush3.bf16.msra.mxu1 %v9115_v31 }
 0xc4c   :  { %4859 = vmatprep.subr.bf16.mxu1 %v8922_v3 }
 0xc4f   :  { %4860 = vmatpush3.bf16.msra.mxu1 %v9116_v8 }
 0xc50   :  { %4861 = vmatprep.subr.bf16.mxu1 %v8922_v3 }
 0xc53   :  { %v2443_v18 = vpop.f32.mrb[64].mxu0  ;;  %4862 = vmatpush3.bf16.msra.mxu1 %v9117_v15  ;;  %v9147_v15 = vld [vmem:[#allocation12_spill] sm:$0xff] }
 0xc54   :  { %v2490_v20 = vadd.f32 %v2443_v18, %v9118_v19  ;;  %v2445_v21 = vpop.f32.mrb[65].mxu0  ;;  %4863 = vmatprep.subr.bf16.mxu1 %v8922_v3  ;;  %v9146_v18 = vld [vmem:[#allocation62_spill] sm:$0xff]  ;;  %v9148_v19 = vld [vmem:[#allocation13_spill] sm:$0xff] }
 0xc55   :  { %v2497_v23 = vadd.f32 %v2445_v21, %v9119_v22  ;;  %v2447_v25 = vpop.f32.mrb[66].mxu0  ;;  %v9150_v21 = vld [vmem:[#allocation4_spill] sm:$0xff]  ;;  %v9151_v22 = vld [vmem:[#allocation5_spill] sm:$0xff] }
 0xc56   :  { %v2448_v26 = vpop.f32.mrb[67].mxu0  ;;  %v4053_v48 = vmul.f32 -1.442695, %v2490_v20  ;;  %v9149_v20 = vld [vmem:[#allocation16_spill] sm:$0xff]  ;;  %v9153_v25 = vld [vmem:[#allocation7_spill] sm:$0xff] }
 0xc57   :  { %4864 = vmatpush3.bf16.msra.mxu1 %v9120_v27  ;;  %v4054_v42 = vmul.f32 -1.442695, %v2497_v23  ;;  %v9152_v23 = vld [vmem:[#allocation6_spill] sm:$0xff]  ;;  %v9154_v26 = vld [vmem:[#allocation8_spill] sm:$0xff]  ;;  %v9155_v27 = vld [vmem:[#allocation9_spill] sm:$0xff] }
 0xc58   :  { %4869 = vmatprep.subr.bf16.mxu1 %v8922_v3  ;;  %5484 = vpow2.f32 %v4053_v48 }
 0xc59   :  { %5486 = vpow2.f32 %v4054_v42 }
 0xc5a   :  { %4866 = vmatmul.mubr.bf16.vlgmr.msra.gmra.mrb[72].mxu1 %v7246_v34  ;;  %v9125_v34 = vld [vmem:[#allocation50_spill] sm:$0xff] }
 0xc5b   :  { %4870 = vmatpush3.bf16.msra.mxu1 %v9121_v7  ;;  %4885 = vmatprep.mubr.msk.bf16.mxu1 %vm5746_vm1, %v8922_v3  ;;  %v7628_v7 = vld [vmem:[%s8592_s3 + $0x4] ss:$12 sps:$4 sm:$0xff]  }
 0xc5c   :  { %4871 = vmatprep.subr.bf16.mxu1 %v8922_v3 }
 0xc5f   :  { %4872 = vmatpush3.bf16.msra.mxu1 %v9122_v28  ;;  %v9156_v28 = vld [vmem:[#allocation10_spill] sm:$0xff] }
 0xc60   :  { %4873 = vmatprep.subr.bf16.mxu1 %v8922_v3 }
 0xc62   :  { %v5485_v33 = vpop.eup %5484 }
 0xc63   :  { %4874 = vmatpush3.bf16.msra.mxu1 %v9123_v30  ;;  %v2494_v11 = vadd.f32 1.0, %v5485_v33  ;;  %v5487_v52 = vpop.eup %5486 }
 0xc64   :  { %4875 = vmatprep.subr.bf16.mxu1 %v8922_v3  ;;  %v2501_v13 = vadd.f32 1.0, %v5487_v52 }
 0xc65   :  { %5488 = vrcp.f32 %v2494_v11 }
 0xc66   :  { %5490 = vrcp.f32 %v2501_v13 }
 0xc67   :  { %4876 = vmatpush3.bf16.msra.mxu1 %v9124_v2 }
 0xc68   :  { %4877 = vmatprep.subr.bf16.mxu1 %v8922_v3 }
 0xc6b   :  { %4878 = vmatpush3.bf16.msra.mxu1 %v9125_v34 }
 0xc6c   :  { %4879 = vmatprep.subr.bf16.mxu1 %v8922_v3 }
 0xc6f   :  { %4880 = vmatpush3.bf16.msra.mxu1 %v9126_v38  ;;  %v5489_v14 = vpop.eup %5488 }
 0xc70   :  { %4881 = vmatprep.subr.bf16.mxu1 %v8922_v3  ;;  %v5491_v63 = vpop.eup %5490 }
 0xc71   :  { %v2507_v0 = vsub.f32 1.0, %v5491_v63  ;;  %v2509_v24 = vmul.f32 %v5491_v63, %v7242_v41  ;;  %v9144_v41 = vld [vmem:[#allocation61_spill] sm:$0xff] }
 0xc73   :  { %4882 = vmatpush3.bf16.msra.mxu1 %v9127_v10 }
 0xc74   :  { %4883 = vmatprep.subr.bf16.mxu1 %v8922_v3 }
 0xc77   :  { %4884 = vmatpush3.bf16.msra.mxu1 %v9128_v5 }
 0xc78   :  { %4889 = vmatprep.subr.bf16.mxu1 %v8922_v3 }
 0xd0d   :  { %v2395_v39 = vpop.f32.mrb[68].mxu1 }
 0xd0e   :  { %v2396_v35 = vadd.f32 %v7539_v47, %v2395_v39  ;;  %v4847_v46 = vpop.f32.mrb[69].mxu1 }
 0xd0f   :  { %v2398_v12 = vpop.f32.mrb[70].mxu1 }
 0xd10   :  { %4052 = vst [vmem:[%s8600_s10 + $0x18] sm:$0xff] %v2396_v35  ;;  %v4848_v45 = vpop.f32.mrb[71].mxu1 }
 0xd2d   :  { %v2484_v50 = vpop.f32.mrb[72].mxu1 }
 0xd2e   :  { %v2504_v51 = vmul.f32 %v5489_v14, %v2484_v50  ;;  %v4867_v54 = vpop.f32.mrb[73].mxu1 }
 0xd2f   :  { %v2487_v56 = vpop.f32.mrb[74].mxu1 }
 0xd30   :  { %v2505_v59 = vadd.f32 %v2504_v51, %v9130_v57  ;;  %v4868_v62 = vpop.f32.mrb[75].mxu1 }
 0xd32   :  { %5492 = vtanh.f32 %v2505_v59 }
 0xd3c   :  { %v5493_v40 = vpop.eup %5492 }
 0xd3d   :  { %v2508_v37 = vmul.f32 %v5493_v40, %v2507_v0 }
 0xd3f   :  { %v7547_v31 = vadd.f32 %v2509_v24, %v2508_v37  ;;  %v7644_v37 = vld [vmem:[%s8592_s3] ss:$12 sps:$4 sm:$0xff]   ;;  %v7657_v24 = vld [vmem:[%s8592_s3 + $0x18] ss:$12 sps:$4 sm:$0xff]  }
 0xd41   :  { %v7551_v8 = vpack.c.bf16 %v7547_v31, %v7547_v31 }
 0xd43   :  { %2545 = vmatmul.mubr.bf16.vlgmr.msra.gmra.mrb[68].mxu0 %v7551_v8  ;;  %4886 = vmatmul.mubr.bf16.vlgmr.msra.gmra.mrb[76].mxu1 %v7551_v8 }
 0xd44   :  { %2594 = vmatpush1.bf16.msra.mxu0 %v7013_v36  ;;  %4890 = vmatpush3.bf16.msra.mxu1 %v7019_v60  ;;  %v9131_v36 = vld [vmem:[#allocation54_spill] sm:$0xff]  ;;  %v9132_v60 = vld [vmem:[#allocation55_spill] sm:$0xff] }
 0xd45   :  { %2595 = vmatprep.subr.bf16.mxu0 %v7025_v1  ;;  %4891 = vmatprep.subr.bf16.mxu1 %v8922_v3  ;;  %v9133_v1 = vld [vmem:[#allocation63_spill] sm:$0xff] }
 0xd46   :  { %2625 = vmatprep.mubr.bf16.mxu0 %v8923_v9  ;;  %4905 = vmatprep.mubr.msk.bf16.mxu1 %vm5746_vm1, %v8922_v3 }
 0xd48   :  { %2596 = vmatpush1.bf16.msra.mxu0 %v7035_v29  ;;  %4892 = vmatpush3.bf16.msra.mxu1 %v7041_v43  ;;  %v9134_v29 = vld [vmem:[#allocation56_spill] sm:$0xff] }
 0xd49   :  { %2597 = vmatprep.subr.bf16.mxu0 %v7047_v55  ;;  %4893 = vmatprep.subr.bf16.mxu1 %v8922_v3  ;;  %v9135_v43 = vld [vmem:[#allocation64_spill] sm:$0xff]  ;;  %v9136_v55 = vld [vmem:[#allocation57_spill] sm:$0xff] }
 0xd4c   :  { %2598 = vmatpush1.bf16.msra.mxu0 %v7054_v61  ;;  %4894 = vmatpush3.bf16.msra.mxu1 %v7060_v17  ;;  %v9137_v61 = vld [vmem:[#allocation65_spill] sm:$0xff]  ;;  %v9138_v17 = vld [vmem:[#allocation58_spill] sm:$0xff] }
 0xd4d   :  { %2599 = vmatprep.subr.bf16.mxu0 %v7066_v58  ;;  %4895 = vmatprep.subr.bf16.mxu1 %v8922_v3  ;;  %v9139_v58 = vld [vmem:[#allocation66_spill] sm:$0xff] }
 0xd50   :  { %2600 = vmatpush1.bf16.msra.mxu0 %v7073_v6  ;;  %4896 = vmatpush3.bf16.msra.mxu1 %v7079_v4  ;;  %v9140_v6 = vld [vmem:[#allocation59_spill] sm:$0xff] }
 0xd51   :  { %2601 = vmatprep.subr.bf16.mxu0 %v7085_v49  ;;  %4897 = vmatprep.subr.bf16.mxu1 %v8922_v3  ;;  %v9141_v4 = vld [vmem:[#allocation67_spill] sm:$0xff]  ;;  %v9142_v49 = vld [vmem:[#allocation60_spill] sm:$0xff] }
 0xd54   :  { %2602 = vmatpush1.bf16.msra.mxu0 %v7092_v16  ;;  %4898 = vmatpush3.bf16.msra.mxu1 %v9131_v36  ;;  %v9143_v16 = vld [vmem:[#allocation68_spill] sm:$0xff]  ;;  %v7663_v36 = vld [vmem:[%s8592_s3 + $0x34] ss:$12 sps:$4 sm:$0xff]  }
 0xd55   :  { %2603 = vmatprep.subr.bf16.mxu0 %v9132_v60  ;;  %4899 = vmatprep.subr.bf16.mxu1 %v8922_v3 }
 0xd58   :  { %2604 = vmatpush1.bf16.msra.mxu0 %v9133_v1  ;;  %4900 = vmatpush3.bf16.msra.mxu1 %v9134_v29 }
 0xd59   :  { %2605 = vmatprep.subr.bf16.mxu0 %v9135_v43  ;;  %4901 = vmatprep.subr.bf16.mxu1 %v8922_v3 }
 0xd5c   :  { %2606 = vmatpush1.bf16.msra.mxu0 %v9136_v55  ;;  %4902 = vmatpush3.bf16.msra.mxu1 %v9137_v61 }
 0xd5d   :  { %2607 = vmatprep.subr.bf16.mxu0 %v9138_v17  ;;  %4903 = vmatprep.subr.bf16.mxu1 %v8922_v3 }
 0xd60   :  { %2608 = vmatpush1.bf16.msra.mxu0 %v9139_v58  ;;  %4904 = vmatpush3.bf16.msra.mxu1 %v9140_v6 }
 0xd61   :  { %4909 = vmatprep.subr.bf16.mxu0 %v8922_v3  ;;  %4929 = vmatprep.subr.bf16.mxu1 %v8922_v3 }
 0xd63   :  { %2626 = vmatmul.mubr.bf16.vlgmr.msra.gmra.mrb[68].mxu0 %v7453_v32  ;;  %4906 = vmatmul.mubr.bf16.vlgmr.msra.gmra.mrb[80].mxu1 %v7453_v32  ;;  %v9145_v32 = vld [vmem:[#allocation69_spill] sm:$0xff] }
 0xd64   :  { %4910 = vmatpush3.bf16.msra.mxu0 %v9141_v4  ;;  %4925 = vmatprep.mubr.msk.bf16.mxu0 %vm5746_vm1, %v8922_v3 }
 0xd65   :  { %4911 = vmatprep.subr.bf16.mxu0 %v8922_v3  ;;  %4930 = vmatpush3.bf16.msra.mxu1 %v9142_v49 }
 0xd66   :  { %4931 = vmatprep.subr.bf16.mxu1 %v8922_v3  ;;  %4945 = vmatprep.mubr.msk.bf16.mxu1 %vm5746_vm1, %v8922_v3 }
 0xd68   :  { %4912 = vmatpush3.bf16.msra.mxu0 %v9143_v16 }
 0xd69   :  { %4913 = vmatprep.subr.bf16.mxu0 %v8922_v3  ;;  %4932 = vmatpush3.bf16.msra.mxu1 %v9144_v41 }
 0xd6a   :  { %4933 = vmatprep.subr.bf16.mxu1 %v8922_v3 }
 0xd6c   :  { %4914 = vmatpush3.bf16.msra.mxu0 %v9145_v32 }
 0xd6d   :  { %4915 = vmatprep.subr.bf16.mxu0 %v8922_v3  ;;  %4934 = vmatpush3.bf16.msra.mxu1 %v9146_v18 }
 0xd6e   :  { %4935 = vmatprep.subr.bf16.mxu1 %v8922_v3 }
 0xd70   :  { %4916 = vmatpush3.bf16.msra.mxu0 %v9147_v15 }
 0xd71   :  { %4917 = vmatprep.subr.bf16.mxu0 %v8922_v3  ;;  %4936 = vmatpush3.bf16.msra.mxu1 %v9148_v19 }
 0xd72   :  { %4937 = vmatprep.subr.bf16.mxu1 %v8922_v3 }
 0xd74   :  { %4918 = vmatpush3.bf16.msra.mxu0 %v9149_v20 }
 0xd75   :  { %4919 = vmatprep.subr.bf16.mxu0 %v8922_v3  ;;  %4938 = vmatpush3.bf16.msra.mxu1 %v9150_v21 }
 0xd76   :  { %4939 = vmatprep.subr.bf16.mxu1 %v8922_v3 }
 0xd78   :  { %4920 = vmatpush3.bf16.msra.mxu0 %v9151_v22 }
 0xd79   :  { %4921 = vmatprep.subr.bf16.mxu0 %v8922_v3  ;;  %4940 = vmatpush3.bf16.msra.mxu1 %v9152_v23 }
 0xd7a   :  { %4941 = vmatprep.subr.bf16.mxu1 %v8922_v3 }
 0xd7c   :  { %4922 = vmatpush3.bf16.msra.mxu0 %v9153_v25 }
 0xd7d   :  { %4923 = vmatprep.subr.bf16.mxu0 %v8922_v3  ;;  %4942 = vmatpush3.bf16.msra.mxu1 %v9154_v26 }
 0xd7e   :  { %4943 = vmatprep.subr.bf16.mxu1 %v8922_v3 }
 0xd80   :  { %4924 = vmatpush3.bf16.msra.mxu0 %v9155_v27 }
 0xd81   :  { %2786 = vmatprep.subr.bf16.mxu0 %v7628_v7  ;;  %4944 = vmatpush3.bf16.msra.mxu1 %v9156_v28 }
 0xd82   :  { %4949 = vmatprep.subr.bf16.mxu1 %v8922_v3 }
 0xe16   :  { %v2587_v30 = vpop.f32.mrb[76].mxu1 }
 0xe17   :  { %v4887_v2 = vpop.f32.mrb[77].mxu1 }
 0xe18   :  { %v2590_v34 = vpop.f32.mrb[78].mxu1  ;;  %v7675_v2 = vld [vmem:[%s8592_s3 + $0x4c] ss:$12 sps:$4 sm:$0xff]  }
 0xe19   :  { %v4888_v38 = vpop.f32.mrb[79].mxu1  ;;  %v7681_v34 = vld [vmem:[%s8592_s3 + $0x48] ss:$12 sps:$4 sm:$0xff]  }
 0xe1a   :  { %v7687_v38 = vld [vmem:[%s8592_s3 + $0x64] ss:$12 sps:$4 sm:$0xff]  }
 0xe36   :  { %v2627_v10 = vpop.f32.mrb[68].mxu0  ;;  %v2668_v5 = vpop.f32.mrb[80].mxu1 }
 0xe37   :  { %v4055_v39 = vmul.f32 -1.442695, %v2627_v10  ;;  %v2629_v48 = vpop.f32.mrb[69].mxu0  ;;  %v4907_v35 = vpop.f32.mrb[81].mxu1  ;;  %v7693_v10 = vld [vmem:[%s8592_s3 + $0x60] ss:$12 sps:$4 sm:$0xff]  }
 0xe38   :  { %v2631_v46 = vpop.f32.mrb[70].mxu0  ;;  %v2671_v12 = vpop.f32.mrb[82].mxu1  ;;  %v4056_v33 = vmul.f32 -1.442695, %v2629_v48  ;;  %v7711_v48 = vld [vmem:[%s8592_s3 + $0x94] ss:$12 sps:$4 sm:$0xff]  }
 0xe39   :  { %5494 = vpow2.f32 %v4055_v39  ;;  %v2632_v45 = vpop.f32.mrb[71].mxu0  ;;  %v4908_v42 = vpop.f32.mrb[83].mxu1  ;;  %v7705_v39 = vld [vmem:[%s8592_s3 + $0x78] ss:$12 sps:$4 sm:$0xff]   ;;  %v7717_v35 = vld [vmem:[%s8592_s3 + $0x90] ss:$12 sps:$4 sm:$0xff]  }
 0xe3a   :  { %5496 = vpow2.f32 %v4056_v33  ;;  %v7723_v46 = vld [vmem:[%s8592_s3 + $0xac] ss:$12 sps:$4 sm:$0xff]   ;;  %v7729_v12 = vld [vmem:[%s8592_s3 + $0xa8] ss:$12 sps:$4 sm:$0xff]   ;;  %v7735_v45 = vld [vmem:[%s8594_s4 + $0x4] ss:$12 sps:$4 sm:$0xff]  }
 0xe3b   :  { %v7742_v42 = vld [vmem:[%s8594_s4] ss:$12 sps:$4 sm:$0xff]   ;;  %v7749_v33 = vld [vmem:[%s8594_s4 + $0x1c] ss:$12 sps:$4 sm:$0xff]  }
 0xe3c   :  { %9157 = vst [vmem:[#allocation31_spill] sm:$0xff] %v7742_v42  ;;  %9158 = vst [vmem:[#allocation32_spill] sm:$0xff] %v7749_v33 }
 0xe43   :  { %v5495_v11 = vpop.eup %5494 }
 0xe44   :  { %v2678_v52 = vadd.f32 1.0, %v5495_v11  ;;  %v5497_v13 = vpop.eup %5496  ;;  %v7755_v11 = vld [vmem:[%s8594_s4 + $0x18] ss:$12 sps:$4 sm:$0xff]  }
 0xe45   :  { %v2685_v14 = vadd.f32 1.0, %v5497_v13  ;;  %9159 = vst [vmem:[#allocation70_spill] sm:$0xff] %v7755_v11  ;;  %v7767_v13 = vld [vmem:[%s8594_s4 + $0x30] ss:$12 sps:$4 sm:$0xff]  }
 0xe46   :  { %5498 = vrcp.f32 %v2678_v52  ;;  %v7761_v52 = vld [vmem:[%s8594_s4 + $0x34] ss:$12 sps:$4 sm:$0xff]   ;;  %9161 = vst [vmem:[#allocation15_spill] sm:$0xff] %v7767_v13 }
 0xe47   :  { %5500 = vrcp.f32 %v2685_v14  ;;  %9160 = vst [vmem:[#allocation14_spill] sm:$0xff] %v7761_v52  ;;  %v7773_v14 = vld [vmem:[%s8594_s4 + $0x4c] ss:$12 sps:$4 sm:$0xff]  }
 0xe48   :  { %9162 = vst [vmem:[#allocation3_spill] sm:$0xff] %v7773_v14 }
 0xe50   :  { %v5499_v50 = vpop.eup %5498 }
 0xe51   :  { %v2688_v51 = vmul.f32 %v5499_v50, %v2668_v5  ;;  %v5501_v56 = vpop.eup %5500  ;;  %v7699_v5 = vld [vmem:[%s8592_s3 + $0x7c] ss:$12 sps:$4 sm:$0xff]  }
 0xe52   :  { %v2691_v57 = vsub.f32 1.0, %v5501_v56  ;;  %v2693_v63 = vmul.f32 %v5501_v56, %v7449_v44  ;;  %v7651_v44 = vld [vmem:[%s8592_s3 + $0x1c] ss:$12 sps:$4 sm:$0xff]  }
 0xe53   :  { %v2689_v54 = vadd.f32 %v2688_v51, %v2587_v30  ;;  %v7669_v30 = vld [vmem:[%s8592_s3 + $0x30] ss:$12 sps:$4 sm:$0xff]   ;;  %v7779_v50 = vld [vmem:[%s8594_s4 + $0x48] ss:$12 sps:$4 sm:$0xff]  }
 0xe54   :  { %9163 = vst [vmem:[#allocation18_spill] sm:$0xff] %v7779_v50  ;;  %v7785_v51 = vld [vmem:[%s8594_s4 + $0x64] ss:$12 sps:$4 sm:$0xff]   ;;  %v7797_v56 = vld [vmem:[%s8594_s4 + $0x7c] ss:$12 sps:$4 sm:$0xff]  }
 0xe55   :  { %5502 = vtanh.f32 %v2689_v54  ;;  %9164 = vst [vmem:[#allocation33_spill] sm:$0xff] %v7785_v51  ;;  %v7791_v54 = vld [vmem:[%s8594_s4 + $0x60] ss:$12 sps:$4 sm:$0xff]   ;;  %9166 = vst [vmem:[#allocation35_spill] sm:$0xff] %v7797_v56 }
 0xe56   :  { %9165 = vst [vmem:[#allocation34_spill] sm:$0xff] %v7791_v54 }
 0xe5f   :  { %v5503_v59 = vpop.eup %5502 }
 0xe60   :  { %v2692_v62 = vmul.f32 %v5503_v59, %v2691_v57  ;;  %v7803_v57 = vld [vmem:[%s8594_s4 + $0x78] ss:$12 sps:$4 sm:$0xff]   ;;  %v7809_v59 = vld [vmem:[%s8594_s4 + $0x94] ss:$12 sps:$4 sm:$0xff]  }
 0xe61   :  { %9167 = vst [vmem:[#allocation36_spill] sm:$0xff] %v7803_v57  ;;  %9168 = vst [vmem:[#allocation37_spill] sm:$0xff] %v7809_v59 }
 0xe62   :  { %v7634_v0 = vadd.f32 %v2693_v63, %v2692_v62  ;;  %v7815_v62 = vld [vmem:[%s8594_s4 + $0x90] ss:$12 sps:$4 sm:$0xff]   ;;  %v7821_v63 = vld [vmem:[%s8594_s4 + $0xac] ss:$12 sps:$4 sm:$0xff]  }
 0xe63   :  { %9169 = vst [vmem:[#allocation38_spill] sm:$0xff] %v7815_v62  ;;  %9170 = vst [vmem:[#allocation39_spill] sm:$0xff] %v7821_v63 }
 0xe64   :  { %v7638_v40 = vpack.c.bf16 %v7634_v0, %v7634_v0 }
 0xe66   :  { %4926 = vmatmul.mubr.bf16.vlgmr.msra.gmra.mrb[72].mxu0 %v7638_v40 }
 0xe67   :  { %2787 = vmatpush1.bf16.msra.mxu0 %v7644_v37  ;;  %2818 = vmatprep.mubr.bf16.mxu0 %v8923_v9 }
 0xe68   :  { %2788 = vmatprep.subr.bf16.mxu0 %v7651_v44 }
 0xe6b   :  { %2789 = vmatpush1.bf16.msra.mxu0 %v7657_v24 }
 0xe6c   :  { %2790 = vmatprep.subr.bf16.mxu0 %v7663_v36 }
 0xe6f   :  { %2791 = vmatpush1.bf16.msra.mxu0 %v7669_v30 }
 0xe70   :  { %2792 = vmatprep.subr.bf16.mxu0 %v7675_v2 }
 0xe73   :  { %2793 = vmatpush1.bf16.msra.mxu0 %v7681_v34 }
 0xe74   :  { %2794 = vmatprep.subr.bf16.mxu0 %v7687_v38 }
 0xe77   :  { %2795 = vmatpush1.bf16.msra.mxu0 %v7693_v10 }
 0xe78   :  { %2796 = vmatprep.subr.bf16.mxu0 %v7699_v5 }
 0xe7b   :  { %2797 = vmatpush1.bf16.msra.mxu0 %v7705_v39 }
 0xe7c   :  { %2798 = vmatprep.subr.bf16.mxu0 %v7711_v48 }
 0xe7f   :  { %2799 = vmatpush1.bf16.msra.mxu0 %v7717_v35 }
 0xe80   :  { %2800 = vmatprep.subr.bf16.mxu0 %v7723_v46 }
 0xe83   :  { %2801 = vmatpush1.bf16.msra.mxu0 %v7729_v12 }
 0xe84   :  { %2889 = vmatprep.subr.bf16.mxu0 %v7735_v45 }
 0xe86   :  { %2819 = vmatmul.mubr.bf16.vlgmr.msra.gmra.mrb[76].mxu0 %v7551_v8 }
 0xe87   :  { %2890 = vmatpush1.bf16.msra.mxu0 %v7742_v42  ;;  %2921 = vmatprep.mubr.bf16.mxu0 %v8923_v9 }
 0xe88   :  { %2891 = vmatprep.subr.bf16.mxu0 %v7749_v33 }
 0xe8b   :  { %2892 = vmatpush1.bf16.msra.mxu0 %v7755_v11 }
 0xe8c   :  { %2893 = vmatprep.subr.bf16.mxu0 %v7761_v52 }
 0xe8f   :  { %2894 = vmatpush1.bf16.msra.mxu0 %v7767_v13 }
 0xe90   :  { %2895 = vmatprep.subr.bf16.mxu0 %v7773_v14 }
 0xe93   :  { %2896 = vmatpush1.bf16.msra.mxu0 %v7779_v50 }
 0xe94   :  { %2897 = vmatprep.subr.bf16.mxu0 %v7785_v51 }
 0xe97   :  { %2898 = vmatpush1.bf16.msra.mxu0 %v7791_v54 }
 0xe98   :  { %2899 = vmatprep.subr.bf16.mxu0 %v7797_v56 }
 0xe9b   :  { %2900 = vmatpush1.bf16.msra.mxu0 %v7803_v57  ;;  %v7827_v57 = vld [vmem:[%s8594_s4 + $0xa8] ss:$12 sps:$4 sm:$0xff]  }
 0xe9c   :  { %2901 = vmatprep.subr.bf16.mxu0 %v7809_v59  ;;  %9171 = vst [vmem:[#allocation40_spill] sm:$0xff] %v7827_v57  ;;  %v7833_v59 = vld [vmem:[%s8595_s5 + $0x4] ss:$12 sps:$4 sm:$0xff]  }
 0xe9d   :  { %9172 = vst [vmem:[#allocation41_spill] sm:$0xff] %v7833_v59 }
 0xe9f   :  { %2902 = vmatpush1.bf16.msra.mxu0 %v7815_v62 }
 0xea0   :  { %2903 = vmatprep.subr.bf16.mxu0 %v7821_v63 }
 0xea3   :  { %2904 = vmatpush1.bf16.msra.mxu0 %v7827_v57  ;;  %v7840_v57 = vld [vmem:[%s8592_s3 + $0x8] ss:$12 sps:$4 sm:$0xff]  }
 0xea4   :  { %2970 = vmatprep.subr.bf16.mxu0 %v7833_v59  ;;  %9173 = vst [vmem:[#allocation42_spill] sm:$0xff] %v7840_v57 }
 0xf39   :  { %v2730_v62 = vpop.f32.mrb[72].mxu0 }
 0xf3a   :  { %v2731_v56 = vadd.f32 %v7494_v53, %v2730_v62  ;;  %v4927_v54 = vpop.f32.mrb[73].mxu0 }
 0xf3b   :  { %v2733_v51 = vpop.f32.mrb[74].mxu0  ;;  %v7870_v54 = vld [vmem:[%s8592_s3 + $0x68] ss:$12 sps:$4 sm:$0xff]  }
 0xf3c   :  { %v2736_v63 = vmax.f32 %v2731_v56, 0.0  ;;  %v4928_v50 = vpop.f32.mrb[75].mxu0  ;;  %v7849_v51 = vld [vmem:[%s8592_s3 + $0x20] ss:$12 sps:$4 sm:$0xff]   ;;  %9177 = vst [vmem:[#allocation19_spill] sm:$0xff] %v7870_v54 }
 0xf3d   :  { %9174 = vst [vmem:[#allocation43_spill] sm:$0xff] %v7849_v51  ;;  %v7863_v50 = vld [vmem:[%s8592_s3 + $0x50] ss:$12 sps:$4 sm:$0xff]   ;;  %v7877_v56 = vld [vmem:[%s8592_s3 + $0x80] ss:$12 sps:$4 sm:$0xff]  }
 0xf3e   :  { %v2737_v14 = vpack.c.bf16 %v2736_v63, %v2736_v63  ;;  %9176 = vst [vmem:[#allocation17_spill] sm:$0xff] %v7863_v50  ;;  %9178 = vst [vmem:[#allocation45_spill] sm:$0xff] %v7877_v56  ;;  %v7884_v63 = vld [vmem:[%s8592_s3 + $0x98] ss:$12 sps:$4 sm:$0xff]  }
 0xf3f   :  { %9179 = vst [vmem:[#allocation46_spill] sm:$0xff] %v7884_v63 }
 0xf40   :  { %4946 = vmatmul.mubr.bf16.vlgmr.msra.gmra.mrb[84].mxu1 %v2737_v14  ;;  %v7856_v14 = vld [vmem:[%s8592_s3 + $0x38] ss:$12 sps:$4 sm:$0xff]  }
 0xf41   :  { %4950 = vmatpush3.bf16.msra.mxu1 %v7840_v57  ;;  %4965 = vmatprep.mubr.msk.bf16.mxu1 %vm5746_vm1, %v8922_v3  ;;  %9175 = vst [vmem:[#allocation44_spill] sm:$0xff] %v7856_v14 }
 0xf42   :  { %4951 = vmatprep.subr.bf16.mxu1 %v8922_v3 }
 0xf45   :  { %4952 = vmatpush3.bf16.msra.mxu1 %v7849_v51  ;;  %v9181_v51 = vld [vmem:[#allocation22_spill] sm:$0xff] }
 0xf46   :  { %4953 = vmatprep.subr.bf16.mxu1 %v8922_v3 }
 0xf49   :  { %4954 = vmatpush3.bf16.msra.mxu1 %v7856_v14 }
 0xf4a   :  { %4955 = vmatprep.subr.bf16.mxu1 %v8922_v3 }
 0xf4d   :  { %4956 = vmatpush3.bf16.msra.mxu1 %v7863_v50 }
 0xf4e   :  { %4957 = vmatprep.subr.bf16.mxu1 %v8922_v3 }
 0xf51   :  { %4958 = vmatpush3.bf16.msra.mxu1 %v7870_v54  ;;  %v9180_v54 = vld [vmem:[#allocation21_spill] sm:$0xff] }
 0xf52   :  { %4959 = vmatprep.subr.bf16.mxu1 %v8922_v3 }
 0xf55   :  { %4960 = vmatpush3.bf16.msra.mxu1 %v7877_v56  ;;  %v7893_v56 = vld [vmem:[%s8592_s3 + $0xb0] ss:$12 sps:$4 sm:$0xff]  }
 0xf56   :  { %4961 = vmatprep.subr.bf16.mxu1 %v8922_v3  ;;  %9182 = vst [vmem:[#allocation47_spill] sm:$0xff] %v7893_v56 }
 0xf59   :  { %v2820_v62 = vpop.f32.mrb[76].mxu0  ;;  %4962 = vmatpush3.bf16.msra.mxu1 %v7884_v63 }
 0xf5a   :  { %v2867_v50 = vadd.f32 %v2820_v62, %v9180_v54  ;;  %v2822_v14 = vpop.f32.mrb[77].mxu0  ;;  %4963 = vmatprep.subr.bf16.mxu1 %v8922_v3  ;;  %v7901_v54 = vld [vmem:[%s8594_s4 + $0x8] ss:$12 sps:$4 sm:$0xff]   ;;  %v7945_v62 = vld [vmem:[%s8594_s4 + $0x98] ss:$12 sps:$4 sm:$0xff]  }
 0xf5b   :  { %v2874_v57 = vadd.f32 %v2822_v14, %v9181_v51  ;;  %v2824_v53 = vpop.f32.mrb[78].mxu0  ;;  %9183 = vst [vmem:[#allocation48_spill] sm:$0xff] %v7901_v54  ;;  %v7931_v51 = vld [vmem:[%s8594_s4 + $0x68] ss:$12 sps:$4 sm:$0xff]   ;;  %v7938_v14 = vld [vmem:[%s8594_s4 + $0x80] ss:$12 sps:$4 sm:$0xff]  }
 0xf5c   :  { %v2825_v59 = vpop.f32.mrb[79].mxu0  ;;  %v7910_v53 = vld [vmem:[%s8594_s4 + $0x20] ss:$12 sps:$4 sm:$0xff]   ;;  %9187 = vst [vmem:[#allocation52_spill] sm:$0xff] %v7931_v51  ;;  %9188 = vst [vmem:[#allocation53_spill] sm:$0xff] %v7938_v14 }
 0xf5d   :  { %4964 = vmatpush3.bf16.msra.mxu1 %v7893_v56  ;;  %9184 = vst [vmem:[#allocation49_spill] sm:$0xff] %v7910_v53  ;;  %v7924_v59 = vld [vmem:[%s8594_s4 + $0x50] ss:$12 sps:$4 sm:$0xff]   ;;  %9189 = vst [vmem:[#allocation24_spill] sm:$0xff] %v7945_v62  ;;  %v4059_v56 = vmul.f32 -1.442695, %v2874_v57 }
 0xf5e   :  { %4969 = vmatprep.subr.bf16.mxu1 %v8922_v3  ;;  %9186 = vst [vmem:[#allocation51_spill] sm:$0xff] %v7924_v59 }
 0xf60   :  { %4966 = vmatmul.mubr.bf16.vlgmr.msra.gmra.mrb[88].mxu1 %v7551_v8  ;;  %v7917_v8 = vld [vmem:[%s8594_s4 + $0x38] ss:$12 sps:$4 sm:$0xff]  }
 0xf61   :  { %4970 = vmatpush3.bf16.msra.mxu1 %v7901_v54  ;;  %4985 = vmatprep.mubr.msk.bf16.mxu1 %vm5746_vm1, %v8922_v3  ;;  %9185 = vst [vmem:[#allocation50_spill] sm:$0xff] %v7917_v8 }
 0xf62   :  { %4971 = vmatprep.subr.bf16.mxu1 %v8922_v3 }
 0xf65   :  { %4972 = vmatpush3.bf16.msra.mxu1 %v7910_v53 }
 0xf66   :  { %4973 = vmatprep.subr.bf16.mxu1 %v8922_v3 }
 0xf69   :  { %4974 = vmatpush3.bf16.msra.mxu1 %v7917_v8 }
 0xf6a   :  { %4975 = vmatprep.subr.bf16.mxu1 %v8922_v3 }
 0xf6d   :  { %4976 = vmatpush3.bf16.msra.mxu1 %v7924_v59  ;;  %v4058_v59 = vmul.f32 -1.442695, %v2867_v50 }
 0xf6e   :  { %4977 = vmatprep.subr.bf16.mxu1 %v8922_v3 }
 0xf6f   :  { %5504 = vpow2.f32 %v4058_v59 }
 0xf70   :  { %5506 = vpow2.f32 %v4059_v56 }
 0xf71   :  { %4978 = vmatpush3.bf16.msra.mxu1 %v7931_v51  ;;  %v7952_v51 = vld [vmem:[%s8594_s4 + $0xb0] ss:$12 sps:$4 sm:$0xff]  }
 0xf72   :  { %4979 = vmatprep.subr.bf16.mxu1 %v8922_v3  ;;  %9190 = vst [vmem:[#allocation54_spill] sm:$0xff] %v7952_v51 }
 0xf75   :  { %4980 = vmatpush3.bf16.msra.mxu1 %v7938_v14 }
 0xf76   :  { %4981 = vmatprep.subr.bf16.mxu1 %v8922_v3 }
 0xf79   :  { %4982 = vmatpush3.bf16.msra.mxu1 %v7945_v62  ;;  %v5505_v63 = vpop.eup %5504 }
 0xf7a   :  { %4983 = vmatprep.subr.bf16.mxu1 %v8922_v3  ;;  %v2871_v13 = vadd.f32 1.0, %v5505_v63 }
 0xf7c   :  { %5508 = vrcp.f32 %v2871_v13 }
 0xf7d   :  { %4984 = vmatpush3.bf16.msra.mxu1 %v7952_v51  ;;  %v5507_v51 = vpop.eup %5506 }
 0xf7e   :  { %4989 = vmatprep.subr.bf16.mxu1 %v8922_v3  ;;  %v2878_v52 = vadd.f32 1.0, %v5507_v51  ;;  %v8014_v51 = vld [vmem:[%s8595_s5 + $0x30] ss:$12 sps:$4 sm:$0xff]  }
 0xf80   :  { %5510 = vrcp.f32 %v2878_v52  ;;  %v8007_v52 = vld [vmem:[%s8595_s5 + $0x34] ss:$12 sps:$4 sm:$0xff]  }
 0xf86   :  { %v5509_v11 = vpop.eup %5508 }
0x1013   :  { %v2772_v14 = vpop.f32.mrb[84].mxu1 }
0x1014   :  { %v2773_v8 = vadd.f32 %v7539_v47, %v2772_v14  ;;  %v4947_v53 = vpop.f32.mrb[85].mxu1 }
0x1015   :  { %v2775_v54 = vpop.f32.mrb[86].mxu1 }
0x1016   :  { %4057 = vst [vmem:[%s8600_s10 + $0x20] sm:$0xff] %v2773_v8  ;;  %v4948_v62 = vpop.f32.mrb[87].mxu1  ;;  %v9191_v54 = vld [vmem:[#allocation28_spill] sm:$0xff]  ;;  %v5511_v8 = vpop.eup %5510 }
0x1017   :  { %v2884_v62 = vsub.f32 1.0, %v5511_v8  ;;  %v2886_v56 = vmul.f32 %v5511_v8, %v7547_v31  ;;  %v7979_v31 = vld [vmem:[%s8595_s5 + $0x8] ss:$12 sps:$4 sm:$0xff]   ;;  %v8045_v8 = vld [vmem:[%s8595_s5 + $0x64] ss:$12 sps:$4 sm:$0xff]  }
0x1033   :  { %v2861_v33 = vpop.f32.mrb[88].mxu1 }
0x1034   :  { %v2881_v50 = vmul.f32 %v5509_v11, %v2861_v33  ;;  %v4967_v14 = vpop.f32.mrb[89].mxu1  ;;  %v7995_v33 = vld [vmem:[%s8595_s5 + $0x18] ss:$12 sps:$4 sm:$0xff]   ;;  %v8001_v11 = vld [vmem:[%s8595_s5 + $0x20] ss:$12 sps:$4 sm:$0xff]  }
0x1035   :  { %v2864_v53 = vpop.f32.mrb[90].mxu1  ;;  %v8026_v14 = vld [vmem:[%s8595_s5 + $0x4c] ss:$12 sps:$4 sm:$0xff]  }
0x1036   :  { %v2882_v47 = vadd.f32 %v2881_v50, %v9191_v54  ;;  %v4968_v42 = vpop.f32.mrb[91].mxu1  ;;  %v8020_v50 = vld [vmem:[%s8595_s5 + $0x38] ss:$12 sps:$4 sm:$0xff]   ;;  %v8033_v53 = vld [vmem:[%s8595_s5 + $0x48] ss:$12 sps:$4 sm:$0xff]  }
0x1037   :  { %v7985_v42 = vld [vmem:[%s8595_s5 + $0x1c] ss:$12 sps:$4 sm:$0xff]  }
0x1038   :  { %5512 = vtanh.f32 %v2882_v47  ;;  %v7973_v47 = vld [vmem:[%s8595_s5] ss:$12 sps:$4 sm:$0xff]   ;;  %v8039_v54 = vld [vmem:[%s8595_s5 + $0x50] ss:$12 sps:$4 sm:$0xff]  }
0x1042   :  { %v5513_v59 = vpop.eup %5512 }
0x1043   :  { %v2885_v57 = vmul.f32 %v5513_v59, %v2884_v62  ;;  %v8052_v62 = vld [vmem:[%s8595_s5 + $0x60] ss:$12 sps:$4 sm:$0xff]   ;;  %v8058_v59 = vld [vmem:[%s8595_s5 + $0x68] ss:$12 sps:$4 sm:$0xff]  }
0x1044   :  { %9192 = vst [vmem:[#allocation55_spill] sm:$0xff] %v8058_v59 }
0x1045   :  { %v7962_v63 = vadd.f32 %v2886_v56, %v2885_v57 }
0x1047   :  { %v7966_v13 = vpack.c.bf16 %v7962_v63, %v7962_v63 }
0x1049   :  { %2922 = vmatmul.mubr.bf16.vlgmr.msra.gmra.mrb[80].mxu0 %v7966_v13  ;;  %4986 = vmatmul.mubr.bf16.vlgmr.msra.gmra.mrb[92].mxu1 %v7966_v13 }
0x104a   :  { %2971 = vmatpush1.bf16.msra.mxu0 %v7973_v47  ;;  %4990 = vmatpush3.bf16.msra.mxu1 %v7979_v31 }
0x104b   :  { %2972 = vmatprep.subr.bf16.mxu0 %v7985_v42  ;;  %4991 = vmatprep.subr.bf16.mxu1 %v8922_v3 }
0x104c   :  { %3002 = vmatprep.mubr.bf16.mxu0 %v8923_v9  ;;  %5005 = vmatprep.mubr.msk.bf16.mxu1 %vm5746_vm1, %v8922_v3 }
0x104e   :  { %2973 = vmatpush1.bf16.msra.mxu0 %v7995_v33  ;;  %4992 = vmatpush3.bf16.msra.mxu1 %v8001_v11 }
0x104f   :  { %2974 = vmatprep.subr.bf16.mxu0 %v8007_v52  ;;  %4993 = vmatprep.subr.bf16.mxu1 %v8922_v3 }
0x1052   :  { %2975 = vmatpush1.bf16.msra.mxu0 %v8014_v51  ;;  %4994 = vmatpush3.bf16.msra.mxu1 %v8020_v50 }
0x1053   :  { %2976 = vmatprep.subr.bf16.mxu0 %v8026_v14  ;;  %4995 = vmatprep.subr.bf16.mxu1 %v8922_v3 }
0x1056   :  { %2977 = vmatpush1.bf16.msra.mxu0 %v8033_v53  ;;  %4996 = vmatpush3.bf16.msra.mxu1 %v8039_v54 }
0x1057   :  { %2978 = vmatprep.subr.bf16.mxu0 %v8045_v8  ;;  %4997 = vmatprep.subr.bf16.mxu1 %v8922_v3 }
0x105a   :  { %2979 = vmatpush1.bf16.msra.mxu0 %v8052_v62  ;;  %4998 = vmatpush3.bf16.msra.mxu1 %v8058_v59 }
0x105b   :  { %2980 = vmatprep.subr.bf16.mxu0 %v9132_v60  ;;  %4999 = vmatprep.subr.bf16.mxu1 %v8922_v3 }
0x105e   :  { %2981 = vmatpush1.bf16.msra.mxu0 %v9133_v1  ;;  %5000 = vmatpush3.bf16.msra.mxu1 %v9134_v29 }
0x105f   :  { %2982 = vmatprep.subr.bf16.mxu0 %v9135_v43  ;;  %5001 = vmatprep.subr.bf16.mxu1 %v8922_v3 }
0x1062   :  { %2983 = vmatpush1.bf16.msra.mxu0 %v9136_v55  ;;  %5002 = vmatpush3.bf16.msra.mxu1 %v9137_v61 }
0x1063   :  { %2984 = vmatprep.subr.bf16.mxu0 %v9138_v17  ;;  %5003 = vmatprep.subr.bf16.mxu1 %v8922_v3 }
0x1066   :  { %2985 = vmatpush1.bf16.msra.mxu0 %v9139_v58  ;;  %5004 = vmatpush3.bf16.msra.mxu1 %v9140_v6 }
0x1067   :  { %5009 = vmatprep.subr.bf16.mxu0 %v8922_v3  ;;  %5029 = vmatprep.subr.bf16.mxu1 %v8922_v3 }
0x1069   :  { %3003 = vmatmul.mubr.bf16.vlgmr.msra.gmra.mrb[80].mxu0 %v7638_v40  ;;  %5006 = vmatmul.mubr.bf16.vlgmr.msra.gmra.mrb[96].mxu1 %v7638_v40 }
0x106a   :  { %5010 = vmatpush3.bf16.msra.mxu0 %v9141_v4  ;;  %5025 = vmatprep.mubr.msk.bf16.mxu0 %vm5746_vm1, %v8922_v3 }
0x106b   :  { %5011 = vmatprep.subr.bf16.mxu0 %v8922_v3  ;;  %5030 = vmatpush3.bf16.msra.mxu1 %v9142_v49 }
0x106c   :  { %5031 = vmatprep.subr.bf16.mxu1 %v8922_v3  ;;  %5045 = vmatprep.mubr.msk.bf16.mxu1 %vm5746_vm1, %v8922_v3 }
0x106e   :  { %5012 = vmatpush3.bf16.msra.mxu0 %v9143_v16 }
0x106f   :  { %5013 = vmatprep.subr.bf16.mxu0 %v8922_v3  ;;  %5032 = vmatpush3.bf16.msra.mxu1 %v9144_v41 }
0x1070   :  { %5033 = vmatprep.subr.bf16.mxu1 %v8922_v3 }
0x1072   :  { %5014 = vmatpush3.bf16.msra.mxu0 %v9145_v32 }
0x1073   :  { %5015 = vmatprep.subr.bf16.mxu0 %v8922_v3  ;;  %5034 = vmatpush3.bf16.msra.mxu1 %v9146_v18 }
0x1074   :  { %5035 = vmatprep.subr.bf16.mxu1 %v8922_v3 }
0x1076   :  { %5016 = vmatpush3.bf16.msra.mxu0 %v9147_v15 }
0x1077   :  { %5017 = vmatprep.subr.bf16.mxu0 %v8922_v3  ;;  %5036 = vmatpush3.bf16.msra.mxu1 %v9148_v19 }
0x1078   :  { %5037 = vmatprep.subr.bf16.mxu1 %v8922_v3 }
0x107a   :  { %5018 = vmatpush3.bf16.msra.mxu0 %v9149_v20 }
0x107b   :  { %5019 = vmatprep.subr.bf16.mxu0 %v8922_v3  ;;  %5038 = vmatpush3.bf16.msra.mxu1 %v9150_v21 }
0x107c   :  { %5039 = vmatprep.subr.bf16.mxu1 %v8922_v3 }
0x107e   :  { %5020 = vmatpush3.bf16.msra.mxu0 %v9151_v22 }
0x107f   :  { %5021 = vmatprep.subr.bf16.mxu0 %v8922_v3  ;;  %5040 = vmatpush3.bf16.msra.mxu1 %v9152_v23 }
0x1080   :  { %5041 = vmatprep.subr.bf16.mxu1 %v8922_v3 }
0x1082   :  { %5022 = vmatpush3.bf16.msra.mxu0 %v9153_v25 }
0x1083   :  { %5023 = vmatprep.subr.bf16.mxu0 %v8922_v3  ;;  %5042 = vmatpush3.bf16.msra.mxu1 %v9154_v26 }
0x1084   :  { %5043 = vmatprep.subr.bf16.mxu1 %v8922_v3 }
0x1086   :  { %5024 = vmatpush3.bf16.msra.mxu0 %v9155_v27 }
0x1087   :  { %3163 = vmatprep.subr.bf16.mxu0 %v7628_v7  ;;  %5044 = vmatpush3.bf16.msra.mxu1 %v9156_v28 }
0x1088   :  { %5049 = vmatprep.subr.bf16.mxu1 %v8922_v3 }
0x111c   :  { %v2964_v60 = vpop.f32.mrb[92].mxu1 }
0x111d   :  { %v4987_v1 = vpop.f32.mrb[93].mxu1 }
0x111e   :  { %v2967_v29 = vpop.f32.mrb[94].mxu1  ;;  %v9195_v1 = vld [vmem:[#allocation70_spill] sm:$0xff] }
0x111f   :  { %v4988_v43 = vpop.f32.mrb[95].mxu1  ;;  %v9196_v29 = vld [vmem:[#allocation14_spill] sm:$0xff] }
0x1120   :  { %v9197_v43 = vld [vmem:[#allocation15_spill] sm:$0xff] }
0x113c   :  { %v3004_v55 = vpop.f32.mrb[80].mxu0  ;;  %v3045_v61 = vpop.f32.mrb[96].mxu1 }
0x113d   :  { %v4060_v17 = vmul.f32 -1.442695, %v3004_v55  ;;  %v3006_v58 = vpop.f32.mrb[81].mxu0  ;;  %v5007_v6 = vpop.f32.mrb[97].mxu1  ;;  %v9198_v55 = vld [vmem:[#allocation3_spill] sm:$0xff] }
0x113e   :  { %v3008_v4 = vpop.f32.mrb[82].mxu0  ;;  %v3048_v49 = vpop.f32.mrb[98].mxu1  ;;  %v4061_v32 = vmul.f32 -1.442695, %v3006_v58  ;;  %v9201_v58 = vld [vmem:[#allocation34_spill] sm:$0xff]  ;;  %v9202_v6 = vld [vmem:[#allocation35_spill] sm:$0xff] }
0x113f   :  { %5514 = vpow2.f32 %v4060_v17  ;;  %v3009_v16 = vpop.f32.mrb[83].mxu0  ;;  %v5008_v41 = vpop.f32.mrb[99].mxu1  ;;  %v9200_v17 = vld [vmem:[#allocation33_spill] sm:$0xff]  ;;  %v9203_v4 = vld [vmem:[#allocation36_spill] sm:$0xff] }
0x1140   :  { %5516 = vpow2.f32 %v4061_v32  ;;  %v9204_v49 = vld [vmem:[#allocation37_spill] sm:$0xff]  ;;  %v9205_v16 = vld [vmem:[#allocation38_spill] sm:$0xff]  ;;  %v9206_v41 = vld [vmem:[#allocation39_spill] sm:$0xff] }
0x1141   :  { %v9207_v32 = vld [vmem:[#allocation40_spill] sm:$0xff] }
0x1149   :  { %v5515_v18 = vpop.eup %5514 }
0x114a   :  { %v3055_v15 = vadd.f32 1.0, %v5515_v18  ;;  %v5517_v19 = vpop.eup %5516  ;;  %v9208_v18 = vld [vmem:[#allocation41_spill] sm:$0xff] }
0x114b   :  { %v3062_v20 = vadd.f32 1.0, %v5517_v19  ;;  %v9209_v19 = vld [vmem:[#allocation11_spill] sm:$0xff] }
0x114c   :  { %5518 = vrcp.f32 %v3055_v15 }
0x114d   :  { %5520 = vrcp.f32 %v3062_v20 }
0x1156   :  { %v5519_v21 = vpop.eup %5518 }
0x1157   :  { %v3065_v22 = vmul.f32 %v5519_v21, %v3045_v61  ;;  %v5521_v25 = vpop.eup %5520  ;;  %v9199_v61 = vld [vmem:[#allocation18_spill] sm:$0xff] }
0x1158   :  { %v3068_v26 = vsub.f32 1.0, %v5521_v25  ;;  %v3070_v40 = vmul.f32 %v5521_v25, %v7634_v0  ;;  %v9193_v0 = vld [vmem:[#allocation31_spill] sm:$0xff] }
0x1159   :  { %v3066_v23 = vadd.f32 %v3065_v22, %v2964_v60  ;;  %v9194_v60 = vld [vmem:[#allocation32_spill] sm:$0xff] }
0x115b   :  { %5522 = vtanh.f32 %v3066_v23 }
0x1165   :  { %v5523_v27 = vpop.eup %5522 }
0x1166   :  { %v3069_v28 = vmul.f32 %v5523_v27, %v3068_v26  ;;  %v9210_v27 = vld [vmem:[#allocation42_spill] sm:$0xff] }
0x1168   :  { %v8114_v57 = vadd.f32 %v3070_v40, %v3069_v28  ;;  %v9211_v28 = vld [vmem:[#allocation43_spill] sm:$0xff]  ;;  %v9212_v40 = vld [vmem:[#allocation44_spill] sm:$0xff] }
0x116a   :  { %v8118_v56 = vpack.c.bf16 %v8114_v57, %v8114_v57 }
0x116c   :  { %5026 = vmatmul.mubr.bf16.vlgmr.msra.gmra.mrb[84].mxu0 %v8118_v56 }
0x116d   :  { %3164 = vmatpush1.bf16.msra.mxu0 %v7644_v37  ;;  %3195 = vmatprep.mubr.bf16.mxu0 %v8923_v9 }
0x116e   :  { %3165 = vmatprep.subr.bf16.mxu0 %v7651_v44 }
0x1171   :  { %3166 = vmatpush1.bf16.msra.mxu0 %v7657_v24 }
0x1172   :  { %3167 = vmatprep.subr.bf16.mxu0 %v7663_v36 }
0x1175   :  { %3168 = vmatpush1.bf16.msra.mxu0 %v7669_v30 }
0x1176   :  { %3169 = vmatprep.subr.bf16.mxu0 %v7675_v2 }
0x1179   :  { %3170 = vmatpush1.bf16.msra.mxu0 %v7681_v34 }
0x117a   :  { %3171 = vmatprep.subr.bf16.mxu0 %v7687_v38 }
0x117d   :  { %3172 = vmatpush1.bf16.msra.mxu0 %v7693_v10 }
0x117e   :  { %3173 = vmatprep.subr.bf16.mxu0 %v7699_v5 }
0x1181   :  { %3174 = vmatpush1.bf16.msra.mxu0 %v7705_v39 }
0x1182   :  { %3175 = vmatprep.subr.bf16.mxu0 %v7711_v48 }
0x1185   :  { %3176 = vmatpush1.bf16.msra.mxu0 %v7717_v35 }
0x1186   :  { %3177 = vmatprep.subr.bf16.mxu0 %v7723_v46 }
0x1189   :  { %3178 = vmatpush1.bf16.msra.mxu0 %v7729_v12 }
0x118a   :  { %3266 = vmatprep.subr.bf16.mxu0 %v7735_v45 }
0x118c   :  { %3196 = vmatmul.mubr.bf16.vlgmr.msra.gmra.mrb[88].mxu0 %v7966_v13 }
0x118d   :  { %3267 = vmatpush1.bf16.msra.mxu0 %v9193_v0  ;;  %3298 = vmatprep.mubr.bf16.mxu0 %v8923_v9 }
0x118e   :  { %3268 = vmatprep.subr.bf16.mxu0 %v9194_v60 }
0x1191   :  { %3269 = vmatpush1.bf16.msra.mxu0 %v9195_v1 }
0x1192   :  { %3270 = vmatprep.subr.bf16.mxu0 %v9196_v29 }
0x1195   :  { %3271 = vmatpush1.bf16.msra.mxu0 %v9197_v43 }
0x1196   :  { %3272 = vmatprep.subr.bf16.mxu0 %v9198_v55 }
0x1199   :  { %3273 = vmatpush1.bf16.msra.mxu0 %v9199_v61 }
0x119a   :  { %3274 = vmatprep.subr.bf16.mxu0 %v9200_v17 }
0x119d   :  { %3275 = vmatpush1.bf16.msra.mxu0 %v9201_v58 }
0x119e   :  { %3276 = vmatprep.subr.bf16.mxu0 %v9202_v6 }
0x11a1   :  { %3277 = vmatpush1.bf16.msra.mxu0 %v9203_v4 }
0x11a2   :  { %3278 = vmatprep.subr.bf16.mxu0 %v9204_v49 }
0x11a5   :  { %3279 = vmatpush1.bf16.msra.mxu0 %v9205_v16 }
0x11a6   :  { %3280 = vmatprep.subr.bf16.mxu0 %v9206_v41 }
0x11a9   :  { %3281 = vmatpush1.bf16.msra.mxu0 %v9207_v32 }
0x11aa   :  { %3347 = vmatprep.subr.bf16.mxu0 %v9208_v18  ;;  %v9219_v18 = vld [vmem:[#allocation47_spill] sm:$0xff] }
0x123f   :  { %v3107_v15 = vpop.f32.mrb[84].mxu0 }
0x1240   :  { %v3108_v20 = vadd.f32 %v9209_v19, %v3107_v15  ;;  %v5027_v21 = vpop.f32.mrb[85].mxu0  ;;  %v9213_v15 = vld [vmem:[#allocation17_spill] sm:$0xff]  ;;  %v9214_v19 = vld [vmem:[#allocation19_spill] sm:$0xff] }
0x1241   :  { %v3110_v22 = vpop.f32.mrb[86].mxu0 }
0x1242   :  { %v3113_v23 = vmax.f32 %v3108_v20, 0.0  ;;  %v5028_v25 = vpop.f32.mrb[87].mxu0  ;;  %v9215_v20 = vld [vmem:[#allocation45_spill] sm:$0xff]  ;;  %v9216_v22 = vld [vmem:[#allocation46_spill] sm:$0xff] }
0x1244   :  { %v3114_v26 = vpack.c.bf16 %v3113_v23, %v3113_v23  ;;  %v9217_v23 = vld [vmem:[#allocation25_spill] sm:$0xff] }
0x1246   :  { %5046 = vmatmul.mubr.bf16.vlgmr.msra.gmra.mrb[100].mxu1 %v3114_v26 }
0x1247   :  { %5050 = vmatpush3.bf16.msra.mxu1 %v9210_v27  ;;  %5065 = vmatprep.mubr.msk.bf16.mxu1 %vm5746_vm1, %v8922_v3 }
0x1248   :  { %5051 = vmatprep.subr.bf16.mxu1 %v8922_v3 }
0x124b   :  { %5052 = vmatpush3.bf16.msra.mxu1 %v9211_v28 }
0x124c   :  { %5053 = vmatprep.subr.bf16.mxu1 %v8922_v3 }
0x124f   :  { %5054 = vmatpush3.bf16.msra.mxu1 %v9212_v40  ;;  %v9218_v40 = vld [vmem:[#allocation27_spill] sm:$0xff] }
0x1250   :  { %5055 = vmatprep.subr.bf16.mxu1 %v8922_v3 }
0x1253   :  { %5056 = vmatpush3.bf16.msra.mxu1 %v9213_v15 }
0x1254   :  { %5057 = vmatprep.subr.bf16.mxu1 %v8922_v3 }
0x1257   :  { %5058 = vmatpush3.bf16.msra.mxu1 %v9214_v19 }
0x1258   :  { %5059 = vmatprep.subr.bf16.mxu1 %v8922_v3 }
0x125b   :  { %5060 = vmatpush3.bf16.msra.mxu1 %v9215_v20  ;;  %v9220_v20 = vld [vmem:[#allocation48_spill] sm:$0xff] }
0x125c   :  { %5061 = vmatprep.subr.bf16.mxu1 %v8922_v3 }
0x125f   :  { %v3197_v21 = vpop.f32.mrb[88].mxu0  ;;  %5062 = vmatpush3.bf16.msra.mxu1 %v9216_v22 }
0x1260   :  { %v3244_v25 = vadd.f32 %v3197_v21, %v9217_v23  ;;  %v3199_v26 = vpop.f32.mrb[89].mxu0  ;;  %5063 = vmatprep.subr.bf16.mxu1 %v8922_v3  ;;  %v9221_v21 = vld [vmem:[#allocation49_spill] sm:$0xff]  ;;  %v9226_v23 = vld [vmem:[#allocation24_spill] sm:$0xff] }
0x1261   :  { %v3251_v15 = vadd.f32 %v3199_v26, %v9218_v40  ;;  %v3201_v28 = vpop.f32.mrb[90].mxu0  ;;  %v9222_v40 = vld [vmem:[#allocation50_spill] sm:$0xff] }
0x1262   :  { %v3202_v27 = vpop.f32.mrb[91].mxu0  ;;  %v9225_v28 = vld [vmem:[#allocation53_spill] sm:$0xff]  ;;  %v9227_v26 = vld [vmem:[#allocation54_spill] sm:$0xff] }
0x1263   :  { %5064 = vmatpush3.bf16.msra.mxu1 %v9219_v18  ;;  %v9223_v27 = vld [vmem:[#allocation51_spill] sm:$0xff]  ;;  %v4064_v22 = vmul.f32 -1.442695, %v3251_v15 }
0x1264   :  { %5069 = vmatprep.subr.bf16.mxu1 %v8922_v3 }
0x1266   :  { %5066 = vmatmul.mubr.bf16.vlgmr.msra.gmra.mrb[104].mxu1 %v7966_v13  ;;  %v9224_v13 = vld [vmem:[#allocation52_spill] sm:$0xff] }
0x1267   :  { %5070 = vmatpush3.bf16.msra.mxu1 %v9220_v20  ;;  %5085 = vmatprep.mubr.msk.bf16.mxu1 %vm5746_vm1, %v8922_v3 }
0x1268   :  { %5071 = vmatprep.subr.bf16.mxu1 %v8922_v3 }
0x126b   :  { %5072 = vmatpush3.bf16.msra.mxu1 %v9221_v21  ;;  %v9228_v21 = vld [vmem:[#allocation20_spill] sm:$0xff] }
0x126c   :  { %5073 = vmatprep.subr.bf16.mxu1 %v8922_v3 }
0x126f   :  { %5074 = vmatpush3.bf16.msra.mxu1 %v9222_v40 }
0x1270   :  { %5075 = vmatprep.subr.bf16.mxu1 %v8922_v3 }
0x1273   :  { %5076 = vmatpush3.bf16.msra.mxu1 %v9223_v27  ;;  %v4063_v27 = vmul.f32 -1.442695, %v3244_v25 }
0x1274   :  { %5077 = vmatprep.subr.bf16.mxu1 %v8922_v3 }
0x1275   :  { %5524 = vpow2.f32 %v4063_v27 }
0x1276   :  { %5526 = vpow2.f32 %v4064_v22 }
0x1277   :  { %5078 = vmatpush3.bf16.msra.mxu1 %v9224_v13 }
0x1278   :  { %5079 = vmatprep.subr.bf16.mxu1 %v8922_v3 }
0x127b   :  { %5080 = vmatpush3.bf16.msra.mxu1 %v9225_v28 }
0x127c   :  { %5081 = vmatprep.subr.bf16.mxu1 %v8922_v3 }
0x127f   :  { %5082 = vmatpush3.bf16.msra.mxu1 %v9226_v23  ;;  %v5525_v23 = vpop.eup %5524 }
0x1280   :  { %5083 = vmatprep.subr.bf16.mxu1 %v8922_v3  ;;  %v3248_v19 = vadd.f32 1.0, %v5525_v23 }
0x1282   :  { %5528 = vrcp.f32 %v3248_v19 }
0x1283   :  { %5084 = vmatpush3.bf16.msra.mxu1 %v9227_v26  ;;  %v5527_v26 = vpop.eup %5526 }
0x1284   :  { %5089 = vmatprep.subr.bf16.mxu1 %v8922_v3  ;;  %v3255_v32 = vadd.f32 1.0, %v5527_v26  ;;  %v8266_v26 = vld [vmem:[%s8595_s5 + $0x98] ss:$12 sps:$4 sm:$0xff]  }
0x1285   :  { %9235 = vst [vmem:[#allocation58_spill] sm:$0xff] %v8266_v26 }
0x1286   :  { %5530 = vrcp.f32 %v3255_v32  ;;  %v8260_v32 = vld [vmem:[%s8595_s5 + $0x90] ss:$12 sps:$4 sm:$0xff]  }
0x1287   :  { %9234 = vst [vmem:[#allocation65_spill] sm:$0xff] %v8260_v32 }
0x128c   :  { %v5529_v41 = vpop.eup %5528 }
0x1319   :  { %v3149_v40 = vpop.f32.mrb[100].mxu1 }
0x131a   :  { %v3150_v20 = vadd.f32 %v9228_v21, %v3149_v40  ;;  %v5047_v18 = vpop.f32.mrb[101].mxu1  ;;  %v9229_v40 = vld [vmem:[#allocation23_spill] sm:$0xff] }
0x131b   :  { %v3152_v13 = vpop.f32.mrb[102].mxu1 }
0x131c   :  { %4062 = vst [vmem:[%s8600_s10 + $0x28] sm:$0xff] %v3150_v20  ;;  %v5048_v28 = vpop.f32.mrb[103].mxu1  ;;  %v5531_v20 = vpop.eup %5530 }
0x131d   :  { %v3261_v28 = vsub.f32 1.0, %v5531_v20  ;;  %v3263_v22 = vmul.f32 %v5531_v20, %v7962_v63  ;;  %v8234_v63 = vld [vmem:[%s8595_s5 + $0x7c] ss:$12 sps:$4 sm:$0xff]  }
0x131e   :  { %9230 = vst [vmem:[#allocation63_spill] sm:$0xff] %v8234_v63  ;;  %v8320_v20 = vld [vmem:[%s8597_s8 + $0x8] sm:$0xff]  }
0x131f   :  { %9242 = vst [vmem:[#allocation69_spill] sm:$0xff] %v8320_v20 }
0x1339   :  { %v3238_v16 = vpop.f32.mrb[104].mxu1 }
0x133a   :  { %v3258_v25 = vmul.f32 %v5529_v41, %v3238_v16  ;;  %v5067_v21 = vpop.f32.mrb[105].mxu1  ;;  %v8247_v16 = vld [vmem:[%s8595_s5 + $0x80] ss:$12 sps:$4 sm:$0xff]  }
0x133b   :  { %v3241_v18 = vpop.f32.mrb[106].mxu1  ;;  %9232 = vst [vmem:[#allocation64_spill] sm:$0xff] %v8247_v16  ;;  %v8253_v41 = vld [vmem:[%s8595_s5 + $0x94] ss:$12 sps:$4 sm:$0xff]  }
0x133c   :  { %v3259_v13 = vadd.f32 %v9229_v40, %v3258_v25  ;;  %v5068_v49 = vpop.f32.mrb[107].mxu1  ;;  %9233 = vst [vmem:[#allocation57_spill] sm:$0xff] %v8253_v41  ;;  %v8272_v25 = vld [vmem:[%s8595_s5 + $0xac] ss:$12 sps:$4 sm:$0xff]   ;;  %v8279_v21 = vld [vmem:[%s8595_s5 + $0xa8] ss:$12 sps:$4 sm:$0xff]  }
0x133d   :  { %v8241_v49 = vld [vmem:[%s8595_s5 + $0x78] ss:$12 sps:$4 sm:$0xff]   ;;  %9236 = vst [vmem:[#allocation66_spill] sm:$0xff] %v8272_v25  ;;  %9237 = vst [vmem:[#allocation59_spill] sm:$0xff] %v8279_v21  ;;  %v8285_v18 = vld [vmem:[%s8595_s5 + $0xb0] ss:$12 sps:$4 sm:$0xff]  }
0x133e   :  { %5532 = vtanh.f32 %v3259_v13  ;;  %9231 = vst [vmem:[#allocation56_spill] sm:$0xff] %v8241_v49  ;;  %9238 = vst [vmem:[#allocation67_spill] sm:$0xff] %v8285_v18  ;;  %v8295_v40 = vld [vmem:[%s8596_s6] sm:$0xff]  }
0x133f   :  { %9239 = vst [vmem:[#allocation60_spill] sm:$0xff] %v8295_v40  ;;  %v8304_v13 = vld [vmem:[%s8597_s8] sm:$0xff]  }
0x1340   :  { %9240 = vst [vmem:[#allocation68_spill] sm:$0xff] %v8304_v13 }
0x1348   :  { %v5533_v27 = vpop.eup %5532 }
0x1349   :  { %v3262_v15 = vmul.f32 %v5533_v27, %v3261_v28  ;;  %v8327_v28 = vld [vmem:[%s8596_s6 + $0x10] sm:$0xff]  }
0x134a   :  { %9243 = vst [vmem:[#allocation62_spill] sm:$0xff] %v8327_v28  ;;  %v8334_v27 = vld [vmem:[%s8597_s8 + $0x10] sm:$0xff]  }
0x134b   :  { %v8202_v23 = vadd.f32 %v3263_v22, %v3262_v15  ;;  %9244 = vst [vmem:[#allocation12_spill] sm:$0xff] %v8334_v27  ;;  %v8341_v15 = vld [vmem:[%s8596_s6 + $0x18] sm:$0xff]  }
0x134c   :  { %9245 = vst [vmem:[#allocation13_spill] sm:$0xff] %v8341_v15  ;;  %v8348_v22 = vld [vmem:[%s8597_s8 + $0x18] sm:$0xff]  }
0x134d   :  { %v8206_v19 = vpack.c.bf16 %v8202_v23, %v8202_v23  ;;  %9246 = vst [vmem:[#allocation16_spill] sm:$0xff] %v8348_v22 }
0x134f   :  { %3299 = vmatmul.mubr.bf16.vlgmr.msra.gmra.mrb[92].mxu0 %v8206_v19  ;;  %5086 = vmatmul.mubr.bf16.vlgmr.msra.gmra.mrb[108].mxu1 %v8206_v19 }
0x1350   :  { %3348 = vmatpush1.bf16.msra.mxu0 %v7973_v47  ;;  %5090 = vmatpush3.bf16.msra.mxu1 %v7979_v31 }
0x1351   :  { %3349 = vmatprep.subr.bf16.mxu0 %v7985_v42  ;;  %5091 = vmatprep.subr.bf16.mxu1 %v8922_v3 }
0x1352   :  { %3379 = vmatprep.mubr.bf16.mxu0 %v8923_v9  ;;  %5105 = vmatprep.mubr.msk.bf16.mxu1 %vm5746_vm1, %v8922_v3 }
0x1354   :  { %3350 = vmatpush1.bf16.msra.mxu0 %v7995_v33  ;;  %5092 = vmatpush3.bf16.msra.mxu1 %v8001_v11 }
0x1355   :  { %3351 = vmatprep.subr.bf16.mxu0 %v8007_v52  ;;  %5093 = vmatprep.subr.bf16.mxu1 %v8922_v3 }
0x1358   :  { %3352 = vmatpush1.bf16.msra.mxu0 %v8014_v51  ;;  %5094 = vmatpush3.bf16.msra.mxu1 %v8020_v50 }
0x1359   :  { %3353 = vmatprep.subr.bf16.mxu0 %v8026_v14  ;;  %5095 = vmatprep.subr.bf16.mxu1 %v8922_v3 }
0x135c   :  { %3354 = vmatpush1.bf16.msra.mxu0 %v8033_v53  ;;  %5096 = vmatpush3.bf16.msra.mxu1 %v8039_v54 }
0x135d   :  { %3355 = vmatprep.subr.bf16.mxu0 %v8045_v8  ;;  %5097 = vmatprep.subr.bf16.mxu1 %v8922_v3 }
0x1360   :  { %3356 = vmatpush1.bf16.msra.mxu0 %v8052_v62  ;;  %5098 = vmatpush3.bf16.msra.mxu1 %v8058_v59 }
0x1361   :  { %3357 = vmatprep.subr.bf16.mxu0 %v8234_v63  ;;  %5099 = vmatprep.subr.bf16.mxu1 %v8922_v3 }
0x1364   :  { %3358 = vmatpush1.bf16.msra.mxu0 %v8241_v49  ;;  %5100 = vmatpush3.bf16.msra.mxu1 %v8247_v16 }
0x1365   :  { %3359 = vmatprep.subr.bf16.mxu0 %v8253_v41  ;;  %5101 = vmatprep.subr.bf16.mxu1 %v8922_v3 }
0x1368   :  { %3360 = vmatpush1.bf16.msra.mxu0 %v8260_v32  ;;  %5102 = vmatpush3.bf16.msra.mxu1 %v8266_v26 }
0x1369   :  { %3361 = vmatprep.subr.bf16.mxu0 %v8272_v25  ;;  %5103 = vmatprep.subr.bf16.mxu1 %v8922_v3 }
0x136c   :  { %3362 = vmatpush1.bf16.msra.mxu0 %v8279_v21  ;;  %5104 = vmatpush3.bf16.msra.mxu1 %v8285_v18 }
0x136d   :  { %5109 = vmatprep.subr.bf16.mxu0 %v8922_v3  ;;  %5129 = vmatprep.subr.bf16.mxu1 %v8922_v3 }
0x136f   :  { %3380 = vmatmul.mubr.bf16.vlgmr.msra.gmra.mrb[92].mxu0 %v8118_v56  ;;  %5106 = vmatmul.mubr.bf16.vlgmr.msra.gmra.mrb[112].mxu1 %v8118_v56  ;;  %v8313_v56 = vld [vmem:[%s8596_s6 + $0x8] sm:$0xff]  }
0x1370   :  { %5110 = vmatpush3.bf16.msra.mxu0 %v8295_v40  ;;  %5125 = vmatprep.mubr.msk.bf16.mxu0 %vm5746_vm1, %v8922_v3  ;;  %9241 = vst [vmem:[#allocation61_spill] sm:$0xff] %v8313_v56 }
0x1371   :  { %5111 = vmatprep.subr.bf16.mxu0 %v8922_v3  ;;  %5130 = vmatpush3.bf16.msra.mxu1 %v8304_v13 }
0x1372   :  { %5131 = vmatprep.subr.bf16.mxu1 %v8922_v3  ;;  %5145 = vmatprep.mubr.msk.bf16.mxu1 %vm5746_vm1, %v8922_v3 }
0x1374   :  { %5112 = vmatpush3.bf16.msra.mxu0 %v8313_v56 }
0x1375   :  { %5113 = vmatprep.subr.bf16.mxu0 %v8922_v3  ;;  %5132 = vmatpush3.bf16.msra.mxu1 %v8320_v20 }
0x1376   :  { %5133 = vmatprep.subr.bf16.mxu1 %v8922_v3 }
0x1378   :  { %5114 = vmatpush3.bf16.msra.mxu0 %v8327_v28 }
0x1379   :  { %5115 = vmatprep.subr.bf16.mxu0 %v8922_v3  ;;  %5134 = vmatpush3.bf16.msra.mxu1 %v8334_v27  ;;  %v8355_v27 = vld [vmem:[%s8596_s6 + $0x20] sm:$0xff]  }
0x137a   :  { %5135 = vmatprep.subr.bf16.mxu1 %v8922_v3  ;;  %9247 = vst [vmem:[#allocation4_spill] sm:$0xff] %v8355_v27 }
0x137c   :  { %5116 = vmatpush3.bf16.msra.mxu0 %v8341_v15  ;;  %v8362_v15 = vld [vmem:[%s8597_s8 + $0x20] sm:$0xff]  }
0x137d   :  { %5117 = vmatprep.subr.bf16.mxu0 %v8922_v3  ;;  %5136 = vmatpush3.bf16.msra.mxu1 %v8348_v22  ;;  %9248 = vst [vmem:[#allocation5_spill] sm:$0xff] %v8362_v15  ;;  %v8369_v22 = vld [vmem:[%s8596_s6 + $0x28] sm:$0xff]  }
0x137e   :  { %5137 = vmatprep.subr.bf16.mxu1 %v8922_v3  ;;  %9249 = vst [vmem:[#allocation6_spill] sm:$0xff] %v8369_v22 }
0x1380   :  { %5118 = vmatpush3.bf16.msra.mxu0 %v8355_v27  ;;  %v8376_v27 = vld [vmem:[%s8597_s8 + $0x28] sm:$0xff]  }
0x1381   :  { %5119 = vmatprep.subr.bf16.mxu0 %v8922_v3  ;;  %5138 = vmatpush3.bf16.msra.mxu1 %v8362_v15  ;;  %9250 = vst [vmem:[#allocation7_spill] sm:$0xff] %v8376_v27  ;;  %v8383_v15 = vld [vmem:[%s8596_s6 + $0x30] sm:$0xff]  }
0x1382   :  { %5139 = vmatprep.subr.bf16.mxu1 %v8922_v3  ;;  %9251 = vst [vmem:[#allocation8_spill] sm:$0xff] %v8383_v15 }
0x1384   :  { %5120 = vmatpush3.bf16.msra.mxu0 %v8369_v22  ;;  %v8390_v22 = vld [vmem:[%s8597_s8 + $0x30] sm:$0xff]  }
0x1385   :  { %5121 = vmatprep.subr.bf16.mxu0 %v8922_v3  ;;  %5140 = vmatpush3.bf16.msra.mxu1 %v8376_v27  ;;  %9252 = vst [vmem:[#allocation9_spill] sm:$0xff] %v8390_v22  ;;  %v8397_v27 = vld [vmem:[%s8596_s6 + $0x38] sm:$0xff]  }
0x1386   :  { %5141 = vmatprep.subr.bf16.mxu1 %v8922_v3  ;;  %9253 = vst [vmem:[#allocation10_spill] sm:$0xff] %v8397_v27 }
0x1388   :  { %5122 = vmatpush3.bf16.msra.mxu0 %v8383_v15  ;;  %v8404_v15 = vld [vmem:[%s8597_s8 + $0x38] sm:$0xff]  }
0x1389   :  { %5123 = vmatprep.subr.bf16.mxu0 %v8922_v3  ;;  %5142 = vmatpush3.bf16.msra.mxu1 %v8390_v22  ;;  %9254 = vst [vmem:[#allocation21_spill] sm:$0xff] %v8404_v15 }
0x138a   :  { %5143 = vmatprep.subr.bf16.mxu1 %v8922_v3 }
0x138c   :  { %5124 = vmatpush3.bf16.msra.mxu0 %v8397_v27 }
0x138d   :  { %3540 = vmatprep.subr.bf16.mxu0 %v7628_v7  ;;  %5144 = vmatpush3.bf16.msra.mxu1 %v8404_v15 }
0x138e   :  { %5149 = vmatprep.subr.bf16.mxu1 %v8922_v3 }
0x1422   :  { %v3341_v22 = vpop.f32.mrb[108].mxu1 }
0x1423   :  { %v5087_v28 = vpop.f32.mrb[109].mxu1 }
0x1424   :  { %v3344_v20 = vpop.f32.mrb[110].mxu1 }
0x1425   :  { %v5088_v56 = vpop.f32.mrb[111].mxu1 }
0x1442   :  { %v3381_v13 = vpop.f32.mrb[92].mxu0  ;;  %v3422_v40 = vpop.f32.mrb[112].mxu1 }
0x1443   :  { %v4065_v18 = vmul.f32 -1.442695, %v3381_v13  ;;  %v3383_v21 = vpop.f32.mrb[93].mxu0  ;;  %v5107_v27 = vpop.f32.mrb[113].mxu1 }
0x1444   :  { %v3385_v25 = vpop.f32.mrb[94].mxu0  ;;  %v3425_v7 = vpop.f32.mrb[114].mxu1  ;;  %v4066_v41 = vmul.f32 -1.442695, %v3383_v21  ;;  %v9275_v21 = vld [vmem:[#allocation53_spill] sm:$0xff] }
0x1445   :  { %5534 = vpow2.f32 %v4065_v18  ;;  %v3386_v26 = vpop.f32.mrb[95].mxu0  ;;  %v5108_v32 = vpop.f32.mrb[115].mxu1 }
0x1446   :  { %5536 = vpow2.f32 %v4066_v41  ;;  %v9273_v32 = vld [vmem:[#allocation51_spill] sm:$0xff] }
0x144f   :  { %v5535_v16 = vpop.eup %5534 }
0x1450   :  { %v3432_v15 = vadd.f32 1.0, %v5535_v16  ;;  %v5537_v49 = vpop.eup %5536  ;;  %v9272_v16 = vld [vmem:[#allocation50_spill] sm:$0xff] }
0x1451   :  { %v3439_v63 = vadd.f32 1.0, %v5537_v49  ;;  %v9271_v49 = vld [vmem:[#allocation49_spill] sm:$0xff] }
0x1452   :  { %5538 = vrcp.f32 %v3432_v15  ;;  %v9277_v15 = vld [vmem:[#allocation54_spill] sm:$0xff] }
0x1453   :  { %5540 = vrcp.f32 %v3439_v63  ;;  %v9270_v63 = vld [vmem:[#allocation48_spill] sm:$0xff] }
0x145c   :  { %v5539_v28 = vpop.eup %5538 }
0x145d   :  { %v3442_v20 = vmul.f32 %v5539_v28, %v3422_v40  ;;  %v5541_v13 = vpop.eup %5540  ;;  %v9276_v40 = vld [vmem:[#allocation24_spill] sm:$0xff]  ;;  %v8499_v28 = vld [vmem:[%s8599_s9] ss:$0 sm:$0xff] }
0x145e   :  { %v3445_v59 = vsub.f32 1.0, %v5541_v13  ;;  %v3447_v18 = vmul.f32 %v5541_v13, %v8114_v57  ;;  %v9264_v57 = vld [vmem:[#allocation19_spill] sm:$0xff] }
0x145f   :  { %v3443_v56 = vadd.f32 %v3442_v20, %v3341_v22 }
0x1461   :  { %5542 = vtanh.f32 %v3443_v56 }
0x146b   :  { %v5543_v27 = vpop.eup %5542 }
0x146c   :  { %v3446_v25 = vmul.f32 %v5543_v27, %v3445_v59  ;;  %v9263_v59 = vld [vmem:[#allocation17_spill] sm:$0xff] }
0x146e   :  { %v8409_v26 = vadd.f32 %v3447_v18, %v3446_v25 }
0x1470   :  { %v8413_v41 = vpack.c.bf16 %v8409_v26, %v8409_v26 }
0x1472   :  { %5126 = vmatmul.mubr.bf16.vlgmr.msra.gmra.mrb[96].mxu0 %v8413_v41 }
0x1473   :  { %3541 = vmatpush1.bf16.msra.mxu0 %v7644_v37  ;;  %3572 = vmatprep.mubr.bf16.mxu0 %v8923_v9  ;;  %v9255_v37 = vld [vmem:[#allocation37_spill] sm:$0xff] }
0x1474   :  { %3542 = vmatprep.subr.bf16.mxu0 %v7651_v44  ;;  %v9256_v44 = vld [vmem:[#allocation38_spill] sm:$0xff] }
0x1477   :  { %3543 = vmatpush1.bf16.msra.mxu0 %v7657_v24  ;;  %v9257_v24 = vld [vmem:[#allocation39_spill] sm:$0xff] }
0x1478   :  { %3544 = vmatprep.subr.bf16.mxu0 %v7663_v36  ;;  %v9258_v36 = vld [vmem:[#allocation40_spill] sm:$0xff] }
0x147b   :  { %3545 = vmatpush1.bf16.msra.mxu0 %v7669_v30  ;;  %v9259_v30 = vld [vmem:[#allocation41_spill] sm:$0xff] }
0x147c   :  { %3546 = vmatprep.subr.bf16.mxu0 %v7675_v2 }
0x147f   :  { %3547 = vmatpush1.bf16.msra.mxu0 %v7681_v34  ;;  %v8454_v34 = vld [vmem:[%s8598_s7] ss:$0 sm:$0xff] }
0x1480   :  { %3548 = vmatprep.subr.bf16.mxu0 %v7687_v38 }
0x1483   :  { %3549 = vmatpush1.bf16.msra.mxu0 %v7693_v10 }
0x1484   :  { %3550 = vmatprep.subr.bf16.mxu0 %v7699_v5 }
0x1487   :  { %3551 = vmatpush1.bf16.msra.mxu0 %v7705_v39 }
0x1488   :  { %3552 = vmatprep.subr.bf16.mxu0 %v7711_v48 }
0x148b   :  { %3553 = vmatpush1.bf16.msra.mxu0 %v7717_v35 }
0x148c   :  { %3554 = vmatprep.subr.bf16.mxu0 %v7723_v46  ;;  %v9260_v46 = vld [vmem:[#allocation42_spill] sm:$0xff] }
0x148f   :  { %3555 = vmatpush1.bf16.msra.mxu0 %v7729_v12  ;;  %v9261_v12 = vld [vmem:[#allocation43_spill] sm:$0xff] }
0x1490   :  { %3643 = vmatprep.subr.bf16.mxu0 %v7735_v45  ;;  %v9262_v45 = vld [vmem:[#allocation44_spill] sm:$0xff] }
0x1492   :  { %3573 = vmatmul.mubr.bf16.vlgmr.msra.gmra.mrb[100].mxu0 %v8206_v19 }
0x1493   :  { %3644 = vmatpush1.bf16.msra.mxu0 %v9193_v0  ;;  %3675 = vmatprep.mubr.bf16.mxu0 %v8923_v9  ;;  %v9265_v0 = vld [vmem:[#allocation45_spill] sm:$0xff] }
0x1494   :  { %3645 = vmatprep.subr.bf16.mxu0 %v9194_v60 }
0x1497   :  { %3646 = vmatpush1.bf16.msra.mxu0 %v9195_v1  ;;  %v9266_v1 = vld [vmem:[#allocation46_spill] sm:$0xff] }
0x1498   :  { %3647 = vmatprep.subr.bf16.mxu0 %v9196_v29  ;;  %v9267_v29 = vld [vmem:[#allocation29_spill] sm:$0xff] }
0x149b   :  { %3648 = vmatpush1.bf16.msra.mxu0 %v9197_v43 }
0x149c   :  { %3649 = vmatprep.subr.bf16.mxu0 %v9198_v55 }
0x149f   :  { %3650 = vmatpush1.bf16.msra.mxu0 %v9199_v61  ;;  %v9268_v61 = vld [vmem:[#allocation30_spill] sm:$0xff] }
0x14a0   :  { %3651 = vmatprep.subr.bf16.mxu0 %v9200_v17 }
0x14a3   :  { %3652 = vmatpush1.bf16.msra.mxu0 %v9201_v58 }
0x14a4   :  { %3653 = vmatprep.subr.bf16.mxu0 %v9202_v6 }
0x14a7   :  { %3654 = vmatpush1.bf16.msra.mxu0 %v9203_v4  ;;  %v9269_v4 = vld [vmem:[#allocation47_spill] sm:$0xff] }
0x14a8   :  { %3655 = vmatprep.subr.bf16.mxu0 %v9255_v37 }
0x14ab   :  { %3656 = vmatpush1.bf16.msra.mxu0 %v9256_v44 }
0x14ac   :  { %3657 = vmatprep.subr.bf16.mxu0 %v9257_v24 }
0x14af   :  { %3658 = vmatpush1.bf16.msra.mxu0 %v9258_v36 }
0x14b0   :  { %3724 = vmatprep.subr.bf16.mxu0 %v9259_v30 }
0x1545   :  { %v3484_v2 = vpop.f32.mrb[96].mxu0 }
0x1546   :  { %v3485_v38 = vadd.f32 %v8454_v34, %v3484_v2  ;;  %v5127_v10 = vpop.f32.mrb[97].mxu0 }
0x1547   :  { %v3487_v5 = vpop.f32.mrb[98].mxu0 }
0x1548   :  { %v3490_v39 = vmax.f32 %v3485_v38, 0.0  ;;  %v5128_v48 = vpop.f32.mrb[99].mxu0  ;;  %v9278_v5 = vld [vmem:[#allocation26_spill] sm:$0xff] }
0x154a   :  { %v3491_v35 = vpack.c.bf16 %v3490_v39, %v3490_v39 }
0x154c   :  { %5146 = vmatmul.mubr.bf16.vlgmr.msra.gmra.mrb[116].mxu1 %v3491_v35 }
0x154d   :  { %5150 = vmatpush3.bf16.msra.mxu1 %v9260_v46  ;;  %5165 = vmatprep.mubr.msk.bf16.mxu1 %vm5746_vm1, %v8922_v3 }
0x154e   :  { %5151 = vmatprep.subr.bf16.mxu1 %v8922_v3 }
0x1551   :  { %5152 = vmatpush3.bf16.msra.mxu1 %v9261_v12 }
0x1552   :  { %5153 = vmatprep.subr.bf16.mxu1 %v8922_v3 }
0x1555   :  { %5154 = vmatpush3.bf16.msra.mxu1 %v9262_v45 }
0x1556   :  { %5155 = vmatprep.subr.bf16.mxu1 %v8922_v3 }
0x1559   :  { %5156 = vmatpush3.bf16.msra.mxu1 %v9263_v59 }
0x155a   :  { %5157 = vmatprep.subr.bf16.mxu1 %v8922_v3 }
0x155d   :  { %5158 = vmatpush3.bf16.msra.mxu1 %v9264_v57 }
0x155e   :  { %5159 = vmatprep.subr.bf16.mxu1 %v8922_v3 }
0x1561   :  { %5160 = vmatpush3.bf16.msra.mxu1 %v9265_v0 }
0x1562   :  { %5161 = vmatprep.subr.bf16.mxu1 %v8922_v3 }
0x1565   :  { %v3574_v60 = vpop.f32.mrb[100].mxu0  ;;  %5162 = vmatpush3.bf16.msra.mxu1 %v9266_v1  ;;  %v9296_v1 = vld [vmem:[#allocation16_spill] sm:$0xff] }
0x1566   :  { %v3621_v43 = vadd.f32 %v3574_v60, %v9267_v29  ;;  %v3576_v55 = vpop.f32.mrb[101].mxu0  ;;  %5163 = vmatprep.subr.bf16.mxu1 %v8922_v3  ;;  %v9295_v60 = vld [vmem:[#allocation13_spill] sm:$0xff]  ;;  %v9297_v29 = vld [vmem:[#allocation4_spill] sm:$0xff] }
0x1567   :  { %v3628_v17 = vadd.f32 %v3576_v55, %v9268_v61  ;;  %v3578_v58 = vpop.f32.mrb[102].mxu0  ;;  %v9299_v55 = vld [vmem:[#allocation6_spill] sm:$0xff]  ;;  %v9300_v61 = vld [vmem:[#allocation7_spill] sm:$0xff] }
0x1568   :  { %v3579_v6 = vpop.f32.mrb[103].mxu0  ;;  %v4068_v7 = vmul.f32 -1.442695, %v3621_v43  ;;  %v9298_v43 = vld [vmem:[#allocation5_spill] sm:$0xff] }
0x1569   :  { %5164 = vmatpush3.bf16.msra.mxu1 %v9269_v4  ;;  %v4069_v25 = vmul.f32 -1.442695, %v3628_v17  ;;  %v9301_v17 = vld [vmem:[#allocation8_spill] sm:$0xff]  ;;  %v9302_v58 = vld [vmem:[#allocation9_spill] sm:$0xff]  ;;  %v9303_v6 = vld [vmem:[#allocation10_spill] sm:$0xff] }
0x156a   :  { %5169 = vmatprep.subr.bf16.mxu1 %v8922_v3  ;;  %5544 = vpow2.f32 %v4068_v7  ;;  %v9304_v4 = vld [vmem:[#allocation21_spill] sm:$0xff] }
0x156b   :  { %5546 = vpow2.f32 %v4069_v25 }
0x156c   :  { %5166 = vmatmul.mubr.bf16.vlgmr.msra.gmra.mrb[120].mxu1 %v8206_v19  ;;  %v9274_v19 = vld [vmem:[#allocation52_spill] sm:$0xff] }
0x156d   :  { %5170 = vmatpush3.bf16.msra.mxu1 %v9270_v63  ;;  %5185 = vmatprep.mubr.msk.bf16.mxu1 %vm5746_vm1, %v8922_v3 }
0x156e   :  { %5171 = vmatprep.subr.bf16.mxu1 %v8922_v3 }
0x1571   :  { %5172 = vmatpush3.bf16.msra.mxu1 %v9271_v49 }
0x1572   :  { %5173 = vmatprep.subr.bf16.mxu1 %v8922_v3 }
0x1574   :  { %v5545_v18 = vpop.eup %5544 }
0x1575   :  { %5174 = vmatpush3.bf16.msra.mxu1 %v9272_v16  ;;  %v3625_v37 = vadd.f32 1.0, %v5545_v18  ;;  %v5547_v44 = vpop.eup %5546 }
0x1576   :  { %5175 = vmatprep.subr.bf16.mxu1 %v8922_v3  ;;  %v3632_v24 = vadd.f32 1.0, %v5547_v44 }
0x1577   :  { %5548 = vrcp.f32 %v3625_v37 }
0x1578   :  { %5550 = vrcp.f32 %v3632_v24 }
0x1579   :  { %5176 = vmatpush3.bf16.msra.mxu1 %v9273_v32 }
0x157a   :  { %5177 = vmatprep.subr.bf16.mxu1 %v8922_v3 }
0x157d   :  { %5178 = vmatpush3.bf16.msra.mxu1 %v9274_v19 }
0x157e   :  { %5179 = vmatprep.subr.bf16.mxu1 %v8922_v3 }
0x1581   :  { %5180 = vmatpush3.bf16.msra.mxu1 %v9275_v21  ;;  %v5549_v36 = vpop.eup %5548 }
0x1582   :  { %5181 = vmatprep.subr.bf16.mxu1 %v8922_v3  ;;  %v5551_v35 = vpop.eup %5550 }
0x1583   :  { %v3638_v46 = vsub.f32 1.0, %v5551_v35  ;;  %v3640_v59 = vmul.f32 %v5551_v35, %v8202_v23  ;;  %v9293_v23 = vld [vmem:[#allocation62_spill] sm:$0xff] }
0x1585   :  { %5182 = vmatpush3.bf16.msra.mxu1 %v9276_v40 }
0x1586   :  { %5183 = vmatprep.subr.bf16.mxu1 %v8922_v3 }
0x1589   :  { %5184 = vmatpush3.bf16.msra.mxu1 %v9277_v15 }
0x158a   :  { %5189 = vmatprep.subr.bf16.mxu1 %v8922_v3 }
0x161f   :  { %v3526_v22 = vpop.f32.mrb[116].mxu1 }
0x1620   :  { %v3527_v20 = vadd.f32 %v8499_v28, %v3526_v22  ;;  %v5147_v56 = vpop.f32.mrb[117].mxu1 }
0x1621   :  { %v3529_v13 = vpop.f32.mrb[118].mxu1 }
0x1622   :  { %4067 = vst [vmem:[%s8600_s10 + $0x30] sm:$0xff] %v3527_v20  ;;  %v5148_v27 = vpop.f32.mrb[119].mxu1 }
0x163f   :  { %v3615_v30 = vpop.f32.mrb[120].mxu1 }
0x1640   :  { %v3635_v2 = vmul.f32 %v5549_v36, %v3615_v30  ;;  %v5167_v38 = vpop.f32.mrb[121].mxu1 }
0x1641   :  { %v3618_v10 = vpop.f32.mrb[122].mxu1 }
0x1642   :  { %v3636_v39 = vadd.f32 %v9278_v5, %v3635_v2  ;;  %v5168_v48 = vpop.f32.mrb[123].mxu1 }
0x1644   :  { %5552 = vtanh.f32 %v3636_v39 }
0x164e   :  { %v5553_v12 = vpop.eup %5552 }
0x164f   :  { %v3639_v45 = vmul.f32 %v5553_v12, %v3638_v46 }
0x1651   :  { %v3641_v57 = vadd.f32 %v3640_v59, %v3639_v45 }
0x1653   :  { %v3642_v0 = vpack.c.bf16 %v3641_v57, %v3641_v57  ;;  %3911 = vst [vmem:[%s8601_s11] sm:$0xff] %v3641_v57 }
0x1655   :  { %3676 = vmatmul.mubr.bf16.vlgmr.msra.gmra.mrb[104].mxu0 %v3642_v0  ;;  %5186 = vmatmul.mubr.bf16.vlgmr.msra.gmra.mrb[124].mxu1 %v3642_v0 }
0x1656   :  { %3725 = vmatpush1.bf16.msra.mxu0 %v7973_v47  ;;  %5190 = vmatpush3.bf16.msra.mxu1 %v7979_v31  ;;  %v9280_v47 = vld [vmem:[#allocation63_spill] sm:$0xff]  ;;  %v9281_v31 = vld [vmem:[#allocation56_spill] sm:$0xff] }
0x1657   :  { %3726 = vmatprep.subr.bf16.mxu0 %v7985_v42  ;;  %5191 = vmatprep.subr.bf16.mxu1 %v8922_v3  ;;  %v9282_v42 = vld [vmem:[#allocation64_spill] sm:$0xff] }
0x1658   :  { %3756 = vmatprep.mubr.bf16.mxu0 %v8923_v9  ;;  %5205 = vmatprep.mubr.msk.bf16.mxu1 %vm5746_vm1, %v8922_v3  ;;  %v9279_v9 = vld [vmem:[#allocation55_spill] sm:$0xff] }
0x165a   :  { %3727 = vmatpush1.bf16.msra.mxu0 %v7995_v33  ;;  %5192 = vmatpush3.bf16.msra.mxu1 %v8001_v11  ;;  %v9283_v33 = vld [vmem:[#allocation57_spill] sm:$0xff] }
0x165b   :  { %3728 = vmatprep.subr.bf16.mxu0 %v8007_v52  ;;  %5193 = vmatprep.subr.bf16.mxu1 %v8922_v3  ;;  %v9284_v11 = vld [vmem:[#allocation65_spill] sm:$0xff]  ;;  %v9285_v52 = vld [vmem:[#allocation58_spill] sm:$0xff] }
0x165e   :  { %3729 = vmatpush1.bf16.msra.mxu0 %v8014_v51  ;;  %5194 = vmatpush3.bf16.msra.mxu1 %v8020_v50  ;;  %v9286_v51 = vld [vmem:[#allocation66_spill] sm:$0xff]  ;;  %v9287_v50 = vld [vmem:[#allocation59_spill] sm:$0xff] }
0x165f   :  { %3730 = vmatprep.subr.bf16.mxu0 %v8026_v14  ;;  %5195 = vmatprep.subr.bf16.mxu1 %v8922_v3  ;;  %v9288_v14 = vld [vmem:[#allocation67_spill] sm:$0xff] }
0x1662   :  { %3731 = vmatpush1.bf16.msra.mxu0 %v8033_v53  ;;  %5196 = vmatpush3.bf16.msra.mxu1 %v8039_v54  ;;  %v9289_v53 = vld [vmem:[#allocation60_spill] sm:$0xff] }
0x1663   :  { %3732 = vmatprep.subr.bf16.mxu0 %v8045_v8  ;;  %5197 = vmatprep.subr.bf16.mxu1 %v8922_v3  ;;  %v9290_v54 = vld [vmem:[#allocation68_spill] sm:$0xff]  ;;  %v9291_v8 = vld [vmem:[#allocation61_spill] sm:$0xff] }
0x1666   :  { %3733 = vmatpush1.bf16.msra.mxu0 %v8052_v62  ;;  %5198 = vmatpush3.bf16.msra.mxu1 %v9279_v9  ;;  %v9292_v62 = vld [vmem:[#allocation69_spill] sm:$0xff] }
0x1667   :  { %3734 = vmatprep.subr.bf16.mxu0 %v9280_v47  ;;  %5199 = vmatprep.subr.bf16.mxu1 %v8922_v3 }
0x166a   :  { %3735 = vmatpush1.bf16.msra.mxu0 %v9281_v31  ;;  %5200 = vmatpush3.bf16.msra.mxu1 %v9282_v42 }
0x166b   :  { %3736 = vmatprep.subr.bf16.mxu0 %v9283_v33  ;;  %5201 = vmatprep.subr.bf16.mxu1 %v8922_v3 }
0x166e   :  { %3737 = vmatpush1.bf16.msra.mxu0 %v9284_v11  ;;  %5202 = vmatpush3.bf16.msra.mxu1 %v9285_v52 }
0x166f   :  { %3738 = vmatprep.subr.bf16.mxu0 %v9286_v51  ;;  %5203 = vmatprep.subr.bf16.mxu1 %v8922_v3 }
0x1672   :  { %3739 = vmatpush1.bf16.msra.mxu0 %v9287_v50  ;;  %5204 = vmatpush3.bf16.msra.mxu1 %v9288_v14 }
0x1673   :  { %5209 = vmatprep.subr.bf16.mxu0 %v8922_v3  ;;  %5229 = vmatprep.subr.bf16.mxu1 %v8922_v3 }
0x1675   :  { %3757 = vmatmul.mubr.bf16.vlgmr.msra.gmra.mrb[104].mxu0 %v8413_v41  ;;  %5206 = vmatmul.mubr.bf16.vlgmr.msra.gmra.mrb[128].mxu1 %v8413_v41  ;;  %v9294_v41 = vld [vmem:[#allocation12_spill] sm:$0xff] }
0x1676   :  { %5210 = vmatpush3.bf16.msra.mxu0 %v9289_v53  ;;  %5225 = vmatprep.mubr.msk.bf16.mxu0 %vm5746_vm1, %v8922_v3 }
0x1677   :  { %5211 = vmatprep.subr.bf16.mxu0 %v8922_v3  ;;  %5230 = vmatpush3.bf16.msra.mxu1 %v9290_v54 }
0x1678   :  { %5231 = vmatprep.subr.bf16.mxu1 %v8922_v3  ;;  %5245 = vmatprep.mubr.msk.bf16.mxu1 %vm5746_vm1, %v8922_v3 }
0x167a   :  { %5212 = vmatpush3.bf16.msra.mxu0 %v9291_v8 }
0x167b   :  { %5213 = vmatprep.subr.bf16.mxu0 %v8922_v3  ;;  %5232 = vmatpush3.bf16.msra.mxu1 %v9292_v62 }
0x167c   :  { %5233 = vmatprep.subr.bf16.mxu1 %v8922_v3 }
0x167e   :  { %5214 = vmatpush3.bf16.msra.mxu0 %v9293_v23 }
0x167f   :  { %5215 = vmatprep.subr.bf16.mxu0 %v8922_v3  ;;  %5234 = vmatpush3.bf16.msra.mxu1 %v9294_v41 }
0x1680   :  { %5235 = vmatprep.subr.bf16.mxu1 %v8922_v3 }
0x1682   :  { %5216 = vmatpush3.bf16.msra.mxu0 %v9295_v60 }
0x1683   :  { %5217 = vmatprep.subr.bf16.mxu0 %v8922_v3  ;;  %5236 = vmatpush3.bf16.msra.mxu1 %v9296_v1 }
0x1684   :  { %5237 = vmatprep.subr.bf16.mxu1 %v8922_v3 }
0x1686   :  { %5218 = vmatpush3.bf16.msra.mxu0 %v9297_v29 }
0x1687   :  { %5219 = vmatprep.subr.bf16.mxu0 %v8922_v3  ;;  %5238 = vmatpush3.bf16.msra.mxu1 %v9298_v43 }
0x1688   :  { %5239 = vmatprep.subr.bf16.mxu1 %v8922_v3 }
0x168a   :  { %5220 = vmatpush3.bf16.msra.mxu0 %v9299_v55 }
0x168b   :  { %5221 = vmatprep.subr.bf16.mxu0 %v8922_v3  ;;  %5240 = vmatpush3.bf16.msra.mxu1 %v9300_v61 }
0x168c   :  { %5241 = vmatprep.subr.bf16.mxu1 %v8922_v3 }
0x168e   :  { %5222 = vmatpush3.bf16.msra.mxu0 %v9301_v17 }
0x168f   :  { %5223 = vmatprep.subr.bf16.mxu0 %v8922_v3  ;;  %5242 = vmatpush3.bf16.msra.mxu1 %v9302_v58 }
0x1690   :  { %5243 = vmatprep.subr.bf16.mxu1 %v8922_v3 }
0x1692   :  { %5224 = vmatpush3.bf16.msra.mxu0 %v9303_v6 }
0x1693   :  { %5244 = vmatpush3.bf16.msra.mxu1 %v9304_v4 }
0x1728   :  { %v3718_v63 = vpop.f32.mrb[124].mxu1 }
0x1729   :  { %v5187_v49 = vpop.f32.mrb[125].mxu1 }
0x172a   :  { %v3721_v16 = vpop.f32.mrb[126].mxu1 }
0x172b   :  { %v5188_v32 = vpop.f32.mrb[127].mxu1 }
0x1748   :  { %v3758_v19 = vpop.f32.mrb[104].mxu0  ;;  %v3799_v21 = vpop.f32.mrb[128].mxu1 }
0x1749   :  { %v4070_v40 = vmul.f32 -1.442695, %v3758_v19  ;;  %v3760_v15 = vpop.f32.mrb[105].mxu0  ;;  %v5207_v22 = vpop.f32.mrb[129].mxu1 }
0x174a   :  { %v3762_v7 = vpop.f32.mrb[106].mxu0  ;;  %v3802_v20 = vpop.f32.mrb[130].mxu1  ;;  %v4071_v27 = vmul.f32 -1.442695, %v3760_v15 }
0x174b   :  { %5554 = vpow2.f32 %v4070_v40  ;;  %v3763_v56 = vpop.f32.mrb[107].mxu0  ;;  %v5208_v13 = vpop.f32.mrb[131].mxu1 }
0x174c   :  { %5556 = vpow2.f32 %v4071_v27 }
0x1755   :  { %v5555_v3 = vpop.eup %5554 }
0x1756   :  { %v3809_v25 = vadd.f32 1.0, %v5555_v3  ;;  %v5557_v18 = vpop.eup %5556 }
0x1757   :  { %v3816_v37 = vadd.f32 1.0, %v5557_v18 }
0x1758   :  { %5558 = vrcp.f32 %v3809_v25 }
0x1759   :  { %5560 = vrcp.f32 %v3816_v37 }
0x1762   :  { %v5559_v44 = vpop.eup %5558 }
0x1763   :  { %v3819_v24 = vmul.f32 %v5559_v44, %v3799_v21  ;;  %v5561_v30 = vpop.eup %5560 }
0x1764   :  { %v3822_v2 = vsub.f32 1.0, %v5561_v30  ;;  %v3824_v5 = vmul.f32 %v5561_v30, %v8409_v26 }
0x1765   :  { %v3820_v36 = vadd.f32 %v3819_v24, %v3718_v63 }
0x1767   :  { %5562 = vtanh.f32 %v3820_v36 }
0x1771   :  { %v5563_v38 = vpop.eup %5562 }
0x1772   :  { %v3823_v10 = vmul.f32 %v5563_v38, %v3822_v2 }
0x1774   :  { %v3825_v39 = vadd.f32 %v3824_v5, %v3823_v10 }
0x1776   :  { %v3826_v48 = vpack.c.bf16 %v3825_v39, %v3825_v39  ;;  %4073 = vst [vmem:[%s8601_s11 + $0x8] sm:$0xff] %v3825_v39 }
0x1778   :  { %5226 = vmatmul.mubr.bf16.vlgmr.msra.gmra.mrb[108].mxu0 %v3826_v48 }
0x184b   :  { %v3861_v35 = vpop.f32.mrb[108].mxu0 }
0x184c   :  { %v3862_v46 = vadd.f32 %v8454_v34, %v3861_v35  ;;  %v5227_v12 = vpop.f32.mrb[109].mxu0 }
0x184d   :  { %v3864_v45 = vpop.f32.mrb[110].mxu0 }
0x184e   :  { %v3867_v59 = vmax.f32 %v3862_v46, 0.0  ;;  %v5228_v57 = vpop.f32.mrb[111].mxu0 }
0x1850   :  { %v3868_v0 = vpack.c.bf16 %v3867_v59, %v3867_v59 }
0x1852   :  { %5246 = vmatmul.mubr.bf16.vlgmr.msra.gmra.mrb[132].mxu1 %v3868_v0 }
0x1925   :  { %v3903_v9 = vpop.f32.mrb[132].mxu1 }
0x1926   :  { %v3904_v47 = vadd.f32 %v8499_v28, %v3903_v9  ;;  %v5247_v26 = vpop.f32.mrb[133].mxu1 }
0x1927   :  { %v3906_v31 = vpop.f32.mrb[134].mxu1 }
0x1928   :  { %4072 = vst [vmem:[%s8600_s10 + $0x38] sm:$0xff] %v3904_v47  ;;  %v5248_v42 = vpop.f32.mrb[135].mxu1 }

</bundles_post_ra>
